<compile_context>
chip_gen: v7x
topology: tpu7x:2x2x1
jax: 0.10.0
libtpu: 0.0.40
codegen_flags: <defaults>
</compile_context>

<pallas_src>
import functools

import jax
import jax.numpy as jnp
from jax.experimental import pallas as pl
from jax.experimental.pallas import tpu as pltpu


def _round_up(x, m):
    return (x + m - 1) // m * m


# ---------------------------------------------------------------------------
# Pallas kernel 1: M-tiled fused matmul -> bias -> (ReLU)
# x tile [bm, K] bf16, w [K, N] bf16 (resident, same block every step),
# bias [1, N] f32, output tile [bm, N].
# ---------------------------------------------------------------------------
def _matmul_bias_kernel(x_ref, w_ref, b_ref, o_ref, *, relu):
    acc = jnp.dot(x_ref[...], w_ref[...], preferred_element_type=jnp.float32)
    acc = acc + b_ref[...]                      # (1, N) broadcast, f32
    if relu:
        acc = jnp.maximum(acc, 0.0)
    o_ref[...] = acc.astype(o_ref.dtype)


def matmul_bias(x, w, b, *, relu=False, out_dtype=jnp.float32, block_m=512):
    """y = relu?( x @ w + b ).  x:[M,K] bf16, w:[K,N] bf16, b:[1,N] f32."""
    M, K = x.shape
    Kw, N = w.shape
    assert K == Kw, (K, Kw)
    # Choose an 8-aligned M tile that minimizes padding while keeping <= block_m.
    M8 = _round_up(M, 8)
    grid_m = pl.cdiv(M8, block_m)
    bm = _round_up(pl.cdiv(M8, grid_m), 8)
    Mp = bm * grid_m
    if Mp != M:
        x = jnp.pad(x, ((0, Mp - M), (0, 0)))
    out = pl.pallas_call(
        functools.partial(_matmul_bias_kernel, relu=relu),
        out_shape=jax.ShapeDtypeStruct((Mp, N), out_dtype),
        grid=(grid_m,),
        in_specs=[
            pl.BlockSpec((bm, K), lambda i: (i, 0)),   # activation tile streams
            pl.BlockSpec((K, N), lambda i: (0, 0)),    # weight resident
            pl.BlockSpec((1, N), lambda i: (0, 0)),    # bias resident
        ],
        out_specs=pl.BlockSpec((bm, N), lambda i: (i, 0)),
        compiler_params=pltpu.CompilerParams(
            dimension_semantics=("parallel",),          # shard M tiles across TCs
            vmem_limit_bytes=48 * 1024 * 1024,          # safe on v5e/v6e/v7x
        ),
    )(x, w, b)
    return out[:M] if Mp != M else out


# ---------------------------------------------------------------------------
# Pallas kernel 2: fused FC(3136->512) + ReLU + fused actor/critic head.
# Head weights are concatenated to [512, A+1] and lane-padded to 128 so the
# output store is lane-dense (no vst.msk). `feat` stays in registers/VMEM.
# ---------------------------------------------------------------------------
def _fc_heads_kernel(x_ref, wfc_ref, bfc_ref, wh_ref, bh_ref, o_ref):
    feat = jnp.dot(x_ref[...], wfc_ref[...], preferred_element_type=jnp.float32)
    feat = jnp.maximum(feat + bfc_ref[...], 0.0)                     # ReLU, f32
    out = jnp.dot(feat.astype(wh_ref.dtype), wh_ref[...],
                  preferred_element_type=jnp.float32)
    o_ref[...] = out + bh_ref[...]


def fc_heads(x, w_fc, b_fc, w_h, b_h, *, block_m=256):
    M, K = x.shape
    Kf, F = w_fc.shape
    Fh, N = w_h.shape
    assert K == Kf and F == Fh, (K, Kf, F, Fh)
    M8 = _round_up(M, 8)
    grid_m = pl.cdiv(M8, block_m)
    bm = _round_up(pl.cdiv(M8, grid_m), 8)
    Mp = bm * grid_m
    if Mp != M:
        x = jnp.pad(x, ((0, Mp - M), (0, 0)))
    out = pl.pallas_call(
        _fc_heads_kernel,
        out_shape=jax.ShapeDtypeStruct((Mp, N), jnp.float32),
        grid=(grid_m,),
        in_specs=[
            pl.BlockSpec((bm, K), lambda i: (i, 0)),
            pl.BlockSpec((K, F), lambda i: (0, 0)),
            pl.BlockSpec((1, F), lambda i: (0, 0)),
            pl.BlockSpec((F, N), lambda i: (0, 0)),
            pl.BlockSpec((1, N), lambda i: (0, 0)),
        ],
        out_specs=pl.BlockSpec((bm, N), lambda i: (i, 0)),
        compiler_params=pltpu.CompilerParams(
            dimension_semantics=("parallel",),
            vmem_limit_bytes=48 * 1024 * 1024,
        ),
    )(x, w_fc, b_fc, w_h, b_h)
    return out[:M] if Mp != M else out


# ---------------------------------------------------------------------------
# Glue: NHWC im2col (channels-last keeps OC/IC on the lane axis, no per-layer
# NCHW transposes).  Matmul itself stays in Pallas.
# TODO(synk): move the patch gather into the kernel DMA stage (scalar-prefetch /
# Element index_map) to avoid materializing the im2col matrix in HBM.
# ---------------------------------------------------------------------------
def _im2col_nhwc(x, kh, kw, stride):
    B, H, W, C = x.shape
    oh = (H - kh) // stride + 1
    ow = (W - kw) // stride + 1
    cols = []
    for i in range(kh):
        for j in range(kw):
            cols.append(x[:, i:i + stride * oh:stride, j:j + stride * ow:stride, :])
    p = jnp.concatenate(cols, axis=-1)          # last-dim order: (kh, kw, c)
    return p.reshape(B * oh * ow, kh * kw * C), oh, ow


def conv2d_nhwc(x, w_km_n, b, kh, kw, stride, *, relu=True, block_m=512):
    # x: [B, H, W, C] bf16; w_km_n: [KH*KW*C, OC] bf16 (pre-permuted); b: [1, OC] f32
    B = x.shape[0]
    patches, oh, ow = _im2col_nhwc(x, kh, kw, stride)
    out = matmul_bias(patches, w_km_n, b, relu=relu,
                      out_dtype=jnp.bfloat16, block_m=block_m)
    return out.reshape(B, oh, ow, -1)           # stay NHWC


# ---------------------------------------------------------------------------
# Parameters: init in PyTorch layouts, then prepare once into kernel layouts
# ([K, N] weights, bf16, scale folded, heads fused).  Done OUTSIDE jit so no
# transposes are traced into the forward pass.
# ---------------------------------------------------------------------------
def init_params_torch_layout(key, in_ch, n_actions):
    ks = jax.random.split(key, 12)

    def w(k, shape, fan_in):
        return jax.random.normal(k, shape, jnp.float32) / jnp.sqrt(jnp.float32(fan_in))

    return {
        "c1_w": w(ks[0], (32, in_ch, 8, 8), in_ch * 64),
        "c1_b": w(ks[1], (32,), in_ch * 64),
        "c2_w": w(ks[2], (64, 32, 4, 4), 32 * 16),
        "c2_b": w(ks[3], (64,), 32 * 16),
        "c3_w": w(ks[4], (64, 64, 3, 3), 64 * 9),
        "c3_b": w(ks[5], (64,), 64 * 9),
        "fc_w": w(ks[6], (512, 64 * 7 * 7), 64 * 7 * 7),   # PyTorch Linear: [out, in]
        "fc_b": w(ks[7], (512,), 64 * 7 * 7),
        "actor_w": w(ks[8], (n_actions, 512), 512),
        "actor_b": w(ks[9], (n_actions,), 512),
        "critic_w": w(ks[10], (1, 512), 512),
        "critic_b": w(ks[11], (1,), 512),
    }


HEAD_PAD = 128   # lane-dense padded width of the fused actor+critic output


def prepare_params(p, n_actions):
    def conv_w(w):   # [OC, IC, KH, KW] -> [(kh,kw,ic), OC]  (matches NHWC im2col order)
        oc, ic, kh, kw = w.shape
        return jnp.transpose(w, (2, 3, 1, 0)).reshape(kh * kw * ic, oc)

    out = {}
    # conv1: fold the x/255 input scaling into the weights  ((x/255) @ W == x @ (W/255))
    out["c1_w"] = (conv_w(p["c1_w"]) / 255.0).astype(jnp.bfloat16)
    out["c1_b"] = p["c1_b"].reshape(1, -1).astype(jnp.float32)
    out["c2_w"] = conv_w(p["c2_w"]).astype(jnp.bfloat16)
    out["c2_b"] = p["c2_b"].reshape(1, -1).astype(jnp.float32)
    out["c3_w"] = conv_w(p["c3_w"]).astype(jnp.bfloat16)
    out["c3_b"] = p["c3_b"].reshape(1, -1).astype(jnp.float32)
    # FC: PyTorch flattens NCHW (c,h,w); our features are NHWC (h,w,c) -> permute once.
    fc = p["fc_w"].reshape(512, 64, 7, 7).transpose(2, 3, 1, 0).reshape(7 * 7 * 64, 512)
    out["fc_w"] = fc.astype(jnp.bfloat16)
    out["fc_b"] = p["fc_b"].reshape(1, -1).astype(jnp.float32)
    # Fuse actor + critic into one [512, A+1] head, pad lanes to 128 (zeros).
    wh = jnp.concatenate([p["actor_w"].T, p["critic_w"].T], axis=1)     # [512, A+1]
    bh = jnp.concatenate([p["actor_b"], p["critic_b"]], axis=0)         # [A+1]
    wh = jnp.pad(wh, ((0, 0), (0, HEAD_PAD - wh.shape[1])))
    bh = jnp.pad(bh, (0, HEAD_PAD - bh.shape[0]))
    out["head_w"] = wh.astype(jnp.bfloat16)
    out["head_b"] = bh.reshape(1, -1).astype(jnp.float32)
    return out


# ---------------------------------------------------------------------------
# Forward pass == CNNPolicy.forward  (logits, value)
# ---------------------------------------------------------------------------
def cnn_policy_forward(params, x, *, n_actions):
    # x: [B, C, 84, 84] (PyTorch NCHW conv-input convention).  Converted once to
    # NHWC; x/255 already folded into conv1 weights in prepare_params().
    x = jnp.transpose(x, (0, 2, 3, 1)).astype(jnp.bfloat16)          # NHWC
    h = conv2d_nhwc(x, params["c1_w"], params["c1_b"], 8, 8, 4)      # [B,20,20,32]
    h = conv2d_nhwc(h, params["c2_w"], params["c2_b"], 4, 4, 2)      # [B, 9, 9,64]
    h = conv2d_nhwc(h, params["c3_w"], params["c3_b"], 3, 3, 1)      # [B, 7, 7,64]
    B = h.shape[0]
    feat_in = h.reshape(B, -1)                                       # NHWC flatten
    out = fc_heads(feat_in, params["fc_w"], params["fc_b"],
                   params["head_w"], params["head_b"])               # [B, 128] f32
    logits = out[:, :n_actions]
    value = out[:, n_actions:n_actions + 1]
    return logits, value
    # TODO(synk): act() (Categorical sampling / log_prob / entropy) is RNG policy
    # glue outside the forward hot path and is not implemented here.


if __name__ == "__main__":
    B, C, H, W = 2, 4, 84, 84          # 84x84 required by Linear(64*7*7, 512)
    n_actions = 6

    key = jax.random.PRNGKey(0)
    k_params, k_x = jax.random.split(key)
    raw = init_params_torch_layout(k_params, C, n_actions)
    params = jax.device_put(prepare_params(raw, n_actions))   # one-time layout prep

    # synthetic uint8-like observation in [0, 255], NCHW
    x = jax.random.randint(k_x, (B, C, H, W), 0, 256, dtype=jnp.int32).astype(jnp.float32)

    fwd = jax.jit(functools.partial(cnn_policy_forward, n_actions=n_actions))
    logits, value = fwd(params, x)
    logits, value = jax.block_until_ready((logits, value))

    assert logits.shape == (B, n_actions), logits.shape
    assert value.shape == (B, 1), value.shape
    assert logits.dtype == jnp.float32 and value.dtype == jnp.float32
    assert bool(jnp.all(jnp.isfinite(logits))) and bool(jnp.all(jnp.isfinite(value)))

    print("KERNEL_OK")
</pallas_src>

<mosaic_0001>
module attributes {stable_mosaic.version = 11 : i64} {
  func.func @_matmul_bias_kernel(%arg0: i32, %arg1: memref<400x256xbf16, #tpu.memory_space<vmem>>, %arg2: memref<256x32xbf16, #tpu.memory_space<vmem>>, %arg3: memref<1x32xf32, #tpu.memory_space<vmem>>, %arg4: memref<400x32xbf16, #tpu.memory_space<vmem>>) attributes {dimension_semantics = [#tpu.dimension_semantics<parallel>], iteration_bounds = array<i64: 2>, scalar_prefetch = 0 : i64, scratch_operands = 0 : i64, tpu.core_type = #tpu.core_type<tc>, window_params = [{transform_indices = @transform_0, window_bounds = array<i64: 400, 256>}, {pipeline_mode = #tpu.pipeline_mode<synchronous>, transform_indices = @transform_1, window_bounds = array<i64: 256, 32>}, {pipeline_mode = #tpu.pipeline_mode<synchronous>, transform_indices = @transform_2, window_bounds = array<i64: 1, 32>}, {transform_indices = @transform_3, window_bounds = array<i64: 400, 32>}]} {
    %c0 = arith.constant 0 : index
    %c0_0 = arith.constant 0 : index
    %0 = vector.load %arg1[%c0, %c0_0] : memref<400x256xbf16, #tpu.memory_space<vmem>>, vector<400x256xbf16>
    %c0_1 = arith.constant 0 : index
    %c0_2 = arith.constant 0 : index
    %1 = vector.load %arg2[%c0_1, %c0_2] : memref<256x32xbf16, #tpu.memory_space<vmem>>, vector<256x32xbf16>
    %cst = arith.constant dense<0.000000e+00> : vector<400x32xf32>
    %2 = tpu.matmul %0, %1, %cst {dimension_numbers = #tpu.dot_dimension_numbers<[1], [0], [0], [1], [0, 0, 1, 1], [], []>} : vector<400x256xbf16>, vector<256x32xbf16>, vector<400x32xf32> -> vector<400x32xf32>
    %c0_3 = arith.constant 0 : index
    %c0_4 = arith.constant 0 : index
    %3 = vector.load %arg3[%c0_3, %c0_4] : memref<1x32xf32, #tpu.memory_space<vmem>>, vector<1x32xf32>
    %4 = vector.broadcast %3 : vector<1x32xf32> to vector<400x32xf32>
    %5 = arith.addf %2, %4 : vector<400x32xf32>
    %cst_5 = arith.constant 0.000000e+00 : f32
    %6 = vector.broadcast %cst_5 : f32 to vector<400x32xf32>
    %7 = arith.maximumf %5, %6 : vector<400x32xf32>
    %8 = arith.truncf %7 : vector<400x32xf32> to vector<400x32xbf16>
    %c0_6 = arith.constant 0 : index
    %c0_7 = arith.constant 0 : index
    %9 = vector.load %arg4[%c0_6, %c0_7] : memref<400x32xbf16, #tpu.memory_space<vmem>>, vector<400x32xbf16>
    tpu.vector_store %arg4[%c0_6, %c0_7], %8 {strides = array<i32>} : memref<400x32xbf16, #tpu.memory_space<vmem>>, vector<400x32xbf16>,
    return
  }
  func.func @transform_0(%arg0: i32) -> (i32, i32) {
    %c0_i32 = arith.constant 0 : i32
    %c0_i32_0 = arith.constant 0 : i32
    return %arg0, %c0_i32 : i32, i32
  }
  func.func @transform_1(%arg0: i32) -> (i32, i32) {
    %c0_i32 = arith.constant 0 : i32
    %c0_i32_0 = arith.constant 0 : i32
    %c0_i32_1 = arith.constant 0 : i32
    return %c0_i32, %c0_i32_0 : i32, i32
  }
  func.func @transform_2(%arg0: i32) -> (i32, i32) {
    %c0_i32 = arith.constant 0 : i32
    %c0_i32_0 = arith.constant 0 : i32
    %c0_i32_1 = arith.constant 0 : i32
    return %c0_i32, %c0_i32_0 : i32, i32
  }
  func.func @transform_3(%arg0: i32) -> (i32, i32) {
    %c0_i32 = arith.constant 0 : i32
    %c0_i32_0 = arith.constant 0 : i32
    return %arg0, %c0_i32 : i32, i32
  }
}

module attributes {stable_mosaic.version = 11 : i64} {
  func.func @_matmul_bias_kernel(%arg0: i32, %arg1: memref<168x512xbf16, #tpu.memory_space<vmem>>, %arg2: memref<512x64xbf16, #tpu.memory_space<vmem>>, %arg3: memref<1x64xf32, #tpu.memory_space<vmem>>, %arg4: memref<168x64xbf16, #tpu.memory_space<vmem>>) attributes {dimension_semantics = [#tpu.dimension_semantics<parallel>], iteration_bounds = array<i64: 1>, scalar_prefetch = 0 : i64, scratch_operands = 0 : i64, tpu.core_type = #tpu.core_type<tc>, window_params = [{transform_indices = @transform_0, window_bounds = array<i64: 168, 512>}, {pipeline_mode = #tpu.pipeline_mode<synchronous>, transform_indices = @transform_1, window_bounds = array<i64: 512, 64>}, {pipeline_mode = #tpu.pipeline_mode<synchronous>, transform_indices = @transform_2, window_bounds = array<i64: 1, 64>}, {transform_indices = @transform_3, window_bounds = array<i64: 168, 64>}]} {
    %c0 = arith.constant 0 : index
    %c0_0 = arith.constant 0 : index
    %0 = vector.load %arg1[%c0, %c0_0] : memref<168x512xbf16, #tpu.memory_space<vmem>>, vector<168x512xbf16>
    %c0_1 = arith.constant 0 : index
    %c0_2 = arith.constant 0 : index
    %1 = vector.load %arg2[%c0_1, %c0_2] : memref<512x64xbf16, #tpu.memory_space<vmem>>, vector<512x64xbf16>
    %cst = arith.constant dense<0.000000e+00> : vector<168x64xf32>
    %2 = tpu.matmul %0, %1, %cst {dimension_numbers = #tpu.dot_dimension_numbers<[1], [0], [0], [1], [0, 0, 1, 1], [], []>} : vector<168x512xbf16>, vector<512x64xbf16>, vector<168x64xf32> -> vector<168x64xf32>
    %c0_3 = arith.constant 0 : index
    %c0_4 = arith.constant 0 : index
    %3 = vector.load %arg3[%c0_3, %c0_4] : memref<1x64xf32, #tpu.memory_space<vmem>>, vector<1x64xf32>
    %4 = vector.broadcast %3 : vector<1x64xf32> to vector<168x64xf32>
    %5 = arith.addf %2, %4 : vector<168x64xf32>
    %cst_5 = arith.constant 0.000000e+00 : f32
    %6 = vector.broadcast %cst_5 : f32 to vector<168x64xf32>
    %7 = arith.maximumf %5, %6 : vector<168x64xf32>
    %8 = arith.truncf %7 : vector<168x64xf32> to vector<168x64xbf16>
    %c0_6 = arith.constant 0 : index
    %c0_7 = arith.constant 0 : index
    %9 = vector.load %arg4[%c0_6, %c0_7] : memref<168x64xbf16, #tpu.memory_space<vmem>>, vector<168x64xbf16>
    tpu.vector_store %arg4[%c0_6, %c0_7], %8 {strides = array<i32>} : memref<168x64xbf16, #tpu.memory_space<vmem>>, vector<168x64xbf16>,
    return
  }
  func.func @transform_0(%arg0: i32) -> (i32, i32) {
    %c0_i32 = arith.constant 0 : i32
    %c0_i32_0 = arith.constant 0 : i32
    return %arg0, %c0_i32 : i32, i32
  }
  func.func @transform_1(%arg0: i32) -> (i32, i32) {
    %c0_i32 = arith.constant 0 : i32
    %c0_i32_0 = arith.constant 0 : i32
    %c0_i32_1 = arith.constant 0 : i32
    return %c0_i32, %c0_i32_0 : i32, i32
  }
  func.func @transform_2(%arg0: i32) -> (i32, i32) {
    %c0_i32 = arith.constant 0 : i32
    %c0_i32_0 = arith.constant 0 : i32
    %c0_i32_1 = arith.constant 0 : i32
    return %c0_i32, %c0_i32_0 : i32, i32
  }
  func.func @transform_3(%arg0: i32) -> (i32, i32) {
    %c0_i32 = arith.constant 0 : i32
    %c0_i32_0 = arith.constant 0 : i32
    return %arg0, %c0_i32 : i32, i32
  }
}

module attributes {stable_mosaic.version = 11 : i64} {
  func.func @_matmul_bias_kernel(%arg0: i32, %arg1: memref<104x576xbf16, #tpu.memory_space<vmem>>, %arg2: memref<576x64xbf16, #tpu.memory_space<vmem>>, %arg3: memref<1x64xf32, #tpu.memory_space<vmem>>, %arg4: memref<104x64xbf16, #tpu.memory_space<vmem>>) attributes {dimension_semantics = [#tpu.dimension_semantics<parallel>], iteration_bounds = array<i64: 1>, scalar_prefetch = 0 : i64, scratch_operands = 0 : i64, tpu.core_type = #tpu.core_type<tc>, window_params = [{transform_indices = @transform_0, window_bounds = array<i64: 104, 576>}, {pipeline_mode = #tpu.pipeline_mode<synchronous>, transform_indices = @transform_1, window_bounds = array<i64: 576, 64>}, {pipeline_mode = #tpu.pipeline_mode<synchronous>, transform_indices = @transform_2, window_bounds = array<i64: 1, 64>}, {transform_indices = @transform_3, window_bounds = array<i64: 104, 64>}]} {
    %c0 = arith.constant 0 : index
    %c0_0 = arith.constant 0 : index
    %0 = vector.load %arg1[%c0, %c0_0] : memref<104x576xbf16, #tpu.memory_space<vmem>>, vector<104x576xbf16>
    %c0_1 = arith.constant 0 : index
    %c0_2 = arith.constant 0 : index
    %1 = vector.load %arg2[%c0_1, %c0_2] : memref<576x64xbf16, #tpu.memory_space<vmem>>, vector<576x64xbf16>
    %cst = arith.constant dense<0.000000e+00> : vector<104x64xf32>
    %2 = tpu.matmul %0, %1, %cst {dimension_numbers = #tpu.dot_dimension_numbers<[1], [0], [0], [1], [0, 0, 1, 1], [], []>} : vector<104x576xbf16>, vector<576x64xbf16>, vector<104x64xf32> -> vector<104x64xf32>
    %c0_3 = arith.constant 0 : index
    %c0_4 = arith.constant 0 : index
    %3 = vector.load %arg3[%c0_3, %c0_4] : memref<1x64xf32, #tpu.memory_space<vmem>>, vector<1x64xf32>
    %4 = vector.broadcast %3 : vector<1x64xf32> to vector<104x64xf32>
    %5 = arith.addf %2, %4 : vector<104x64xf32>
    %cst_5 = arith.constant 0.000000e+00 : f32
    %6 = vector.broadcast %cst_5 : f32 to vector<104x64xf32>
    %7 = arith.maximumf %5, %6 : vector<104x64xf32>
    %8 = arith.truncf %7 : vector<104x64xf32> to vector<104x64xbf16>
    %c0_6 = arith.constant 0 : index
    %c0_7 = arith.constant 0 : index
    %9 = vector.load %arg4[%c0_6, %c0_7] : memref<104x64xbf16, #tpu.memory_space<vmem>>, vector<104x64xbf16>
    tpu.vector_store %arg4[%c0_6, %c0_7], %8 {strides = array<i32>} : memref<104x64xbf16, #tpu.memory_space<vmem>>, vector<104x64xbf16>,
    return
  }
  func.func @transform_0(%arg0: i32) -> (i32, i32) {
    %c0_i32 = arith.constant 0 : i32
    %c0_i32_0 = arith.constant 0 : i32
    return %arg0, %c0_i32 : i32, i32
  }
  func.func @transform_1(%arg0: i32) -> (i32, i32) {
    %c0_i32 = arith.constant 0 : i32
    %c0_i32_0 = arith.constant 0 : i32
    %c0_i32_1 = arith.constant 0 : i32
    return %c0_i32, %c0_i32_0 : i32, i32
  }
  func.func @transform_2(%arg0: i32) -> (i32, i32) {
    %c0_i32 = arith.constant 0 : i32
    %c0_i32_0 = arith.constant 0 : i32
    %c0_i32_1 = arith.constant 0 : i32
    return %c0_i32, %c0_i32_0 : i32, i32
  }
  func.func @transform_3(%arg0: i32) -> (i32, i32) {
    %c0_i32 = arith.constant 0 : i32
    %c0_i32_0 = arith.constant 0 : i32
    return %arg0, %c0_i32 : i32, i32
  }
}

module attributes {stable_mosaic.version = 11 : i64} {
  func.func @_fc_heads_kernel(%arg0: i32, %arg1: memref<8x3136xbf16, #tpu.memory_space<vmem>>, %arg2: memref<3136x512xbf16, #tpu.memory_space<vmem>>, %arg3: memref<1x512xf32, #tpu.memory_space<vmem>>, %arg4: memref<512x128xbf16, #tpu.memory_space<vmem>>, %arg5: memref<1x128xf32, #tpu.memory_space<vmem>>, %arg6: memref<8x128xf32, #tpu.memory_space<vmem>>) attributes {dimension_semantics = [#tpu.dimension_semantics<parallel>], iteration_bounds = array<i64: 1>, scalar_prefetch = 0 : i64, scratch_operands = 0 : i64, tpu.core_type = #tpu.core_type<tc>, window_params = [{transform_indices = @transform_0, window_bounds = array<i64: 8, 3136>}, {pipeline_mode = #tpu.pipeline_mode<synchronous>, transform_indices = @transform_1, window_bounds = array<i64: 3136, 512>}, {pipeline_mode = #tpu.pipeline_mode<synchronous>, transform_indices = @transform_2, window_bounds = array<i64: 1, 512>}, {pipeline_mode = #tpu.pipeline_mode<synchronous>, transform_indices = @transform_3, window_bounds = array<i64: 512, 128>}, {pipeline_mode = #tpu.pipeline_mode<synchronous>, transform_indices = @transform_4, window_bounds = array<i64: 1, 128>}, {transform_indices = @transform_5, window_bounds = array<i64: 8, 128>}]} {
    %c0 = arith.constant 0 : index
    %c0_0 = arith.constant 0 : index
    %0 = vector.load %arg1[%c0, %c0_0] : memref<8x3136xbf16, #tpu.memory_space<vmem>>, vector<8x3136xbf16>
    %c0_1 = arith.constant 0 : index
    %c0_2 = arith.constant 0 : index
    %1 = vector.load %arg2[%c0_1, %c0_2] : memref<3136x512xbf16, #tpu.memory_space<vmem>>, vector<3136x512xbf16>
    %cst = arith.constant dense<0.000000e+00> : vector<8x512xf32>
    %2 = tpu.matmul %0, %1, %cst {dimension_numbers = #tpu.dot_dimension_numbers<[1], [0], [0], [1], [0, 0, 1, 1], [], []>} : vector<8x3136xbf16>, vector<3136x512xbf16>, vector<8x512xf32> -> vector<8x512xf32>
    %c0_3 = arith.constant 0 : index
    %c0_4 = arith.constant 0 : index
    %3 = vector.load %arg3[%c0_3, %c0_4] : memref<1x512xf32, #tpu.memory_space<vmem>>, vector<1x512xf32>
    %4 = vector.broadcast %3 : vector<1x512xf32> to vector<8x512xf32>
    %5 = arith.addf %2, %4 : vector<8x512xf32>
    %cst_5 = arith.constant 0.000000e+00 : f32
    %6 = vector.broadcast %cst_5 : f32 to vector<8x512xf32>
    %7 = arith.maximumf %5, %6 : vector<8x512xf32>
    %8 = arith.truncf %7 : vector<8x512xf32> to vector<8x512xbf16>
    %c0_6 = arith.constant 0 : index
    %c0_7 = arith.constant 0 : index
    %9 = vector.load %arg4[%c0_6, %c0_7] : memref<512x128xbf16, #tpu.memory_space<vmem>>, vector<512x128xbf16>
    %cst_8 = arith.constant dense<0.000000e+00> : vector<8x128xf32>
    %10 = tpu.matmul %8, %9, %cst_8 {dimension_numbers = #tpu.dot_dimension_numbers<[1], [0], [0], [1], [0, 0, 1, 1], [], []>} : vector<8x512xbf16>, vector<512x128xbf16>, vector<8x128xf32> -> vector<8x128xf32>
    %c0_9 = arith.constant 0 : index
    %c0_10 = arith.constant 0 : index
    %11 = vector.load %arg5[%c0_9, %c0_10] : memref<1x128xf32, #tpu.memory_space<vmem>>, vector<1x128xf32>
    %12 = vector.broadcast %11 : vector<1x128xf32> to vector<8x128xf32>
    %13 = arith.addf %10, %12 : vector<8x128xf32>
    %c0_11 = arith.constant 0 : index
    %c0_12 = arith.constant 0 : index
    %14 = vector.load %arg6[%c0_11, %c0_12] : memref<8x128xf32, #tpu.memory_space<vmem>>, vector<8x128xf32>
    tpu.vector_store %arg6[%c0_11, %c0_12], %13 {strides = array<i32>} : memref<8x128xf32, #tpu.memory_space<vmem>>, vector<8x128xf32>,
    return
  }
  func.func @transform_0(%arg0: i32) -> (i32, i32) {
    %c0_i32 = arith.constant 0 : i32
    %c0_i32_0 = arith.constant 0 : i32
    return %arg0, %c0_i32 : i32, i32
  }
  func.func @transform_1(%arg0: i32) -> (i32, i32) {
    %c0_i32 = arith.constant 0 : i32
    %c0_i32_0 = arith.constant 0 : i32
    %c0_i32_1 = arith.constant 0 : i32
    return %c0_i32, %c0_i32_0 : i32, i32
  }
  func.func @transform_2(%arg0: i32) -> (i32, i32) {
    %c0_i32 = arith.constant 0 : i32
    %c0_i32_0 = arith.constant 0 : i32
    %c0_i32_1 = arith.constant 0 : i32
    return %c0_i32, %c0_i32_0 : i32, i32
  }
  func.func @transform_3(%arg0: i32) -> (i32, i32) {
    %c0_i32 = arith.constant 0 : i32
    %c0_i32_0 = arith.constant 0 : i32
    %c0_i32_1 = arith.constant 0 : i32
    return %c0_i32, %c0_i32_0 : i32, i32
  }
  func.func @transform_4(%arg0: i32) -> (i32, i32) {
    %c0_i32 = arith.constant 0 : i32
    %c0_i32_0 = arith.constant 0 : i32
    %c0_i32_1 = arith.constant 0 : i32
    return %c0_i32, %c0_i32_0 : i32, i32
  }
  func.func @transform_5(%arg0: i32) -> (i32, i32) {
    %c0_i32 = arith.constant 0 : i32
    %c0_i32_0 = arith.constant 0 : i32
    return %arg0, %c0_i32 : i32, i32
  }
}

</mosaic_0001>

<bundles_post_ra>
// kernel: cnn_policy_forward.4
= control target key start
LH: loop header
LB: loop body
LE: loop exit
PB: predicated region body
PF: predicated region fallthrough
CT: control target
= control target key end

     0   :  { %s1542_s12 = smov 0   ;;  %s1852_s0 = inlined_call_operand.vmem [shape: bf16[800,256], index: 0, kind: input, shape index: {}]   ;;  %s1853_s1 = inlined_call_operand.vmem [shape: bf16[256,32], index: 1, kind: input, shape index: {}]   ;;  %s1854_s2 = inlined_call_operand.vmem [shape: f32[1,32], index: 2, kind: input, shape index: {}]   ;;  %s1855_s3 = inlined_call_operand.vmem [shape: bf16[800,32], index: 3, kind: output, shape index: {}]  }
   0x1 LB: > { %s1203_s13 = sadd.s32 4294967295, %s1519_s12   ;;  %p1207_p0 = scmp.ge.s32.totalorder %s1519_s12, 1  ;;  %s1519_s12 = sphi %s1542_s12, %s13_s12  }
   0x2   : > { %p139_p1 = scmp.lt.s32.totalorder %s1519_s12, 3 }
   0x4   : > { %p140_p2 = pnand %p1207_p0, %p139_p1 }
   0x5   : > { %v1422_v0 = vld [vmem:[%s1853_s1] sm:$0xff] (!%p140_p2)   ;;  %v1521_v1 = vmov (!%p140_p2), 0   ;;  %s164_s16 = smul.u32 (!%p140_p2), 50, %s1203_s13  ;;  %v1423_v2 = vld [vmem:[%s1853_s1 + $0x8] sm:$0xff] (!%p140_p2)   ;;  %v1424_v3 = vld [vmem:[%s1853_s1 + $0x10] sm:$0xff] (!%p140_p2)   ;;  %vm1096_vm0 = vcmask (!%p140_p2), 257024  }
   0x6   : > { %143 = sbr.rel (%p140_p2) target bundleno = 387 (0x183), region = 32  ;;  %613 = vmatprep.subr.bf16.mxu0 (!%p140_p2), %v1521_v1  ;;  %1381 = vmatprep.subr.bf16.mxu1 (!%p140_p2), %v1521_v1  ;;  %v1425_v4 = vld [vmem:[%s1853_s1 + $0x18] sm:$0xff] (!%p140_p2)   ;;  %v1426_v5 = vld [vmem:[%s1853_s1 + $0x20] sm:$0xff] (!%p140_p2)   ;;  %v1427_v7 = vld [vmem:[%s1853_s1 + $0x28] sm:$0xff] (!%p140_p2)  }
   0x7   : > { %614 = vmatpush1.bf16.msra.mxu0 (!%p140_p2), %v1422_v0  ;;  %1397 = vmatpush1.bf16.msra.mxu1 (!%p140_p2), %v1422_v0  ;;  %p165_p3 = scmp.lt.s32.totalorder (!%p140_p2), %s164_s16, 99  ;;  %v1428_v9 = vld [vmem:[%s1853_s1 + $0x30] sm:$0xff] (!%p140_p2)   ;;  %v1429_v10 = vld [vmem:[%s1853_s1 + $0x38] sm:$0xff] (!%p140_p2)   ;;  %v1430_v11 = vld [vmem:[%s1853_s1 + $0x40] sm:$0xff] (!%p140_p2)  }
   0x8   : > { %615 = vmatprep.subr.bf16.mxu0 (!%p140_p2), %v1521_v1  ;;  %1382 = vmatprep.subr.bf16.mxu1 (!%p140_p2), %v1521_v1  ;;  %v1431_v12 = vld [vmem:[%s1853_s1 + $0x48] sm:$0xff] (!%p140_p2)   ;;  %v1432_v13 = vld [vmem:[%s1853_s1 + $0x50] sm:$0xff] (!%p140_p2)   ;;  %v1433_v14 = vld [vmem:[%s1853_s1 + $0x58] sm:$0xff] (!%p140_p2)  }
   0x9   : > { %v1434_v15 = vld [vmem:[%s1853_s1 + $0x60] sm:$0xff] (!%p140_p2)   ;;  %v1435_v16 = vld [vmem:[%s1853_s1 + $0x68] sm:$0xff] (!%p140_p2)   ;;  %v1436_v17 = vld [vmem:[%s1853_s1 + $0x70] sm:$0xff] (!%p140_p2)  }
   0xa   : > { %v1437_v18 = vld [vmem:[%s1853_s1 + $0x78] sm:$0xff] (!%p140_p2)  }
   0xb   : > { %616 = vmatpush1.bf16.msra.mxu0 (!%p140_p2), %v1423_v2  ;;  %1398 = vmatpush1.bf16.msra.mxu1 (!%p140_p2), %v1423_v2 }
   0xc   : > { %617 = vmatprep.subr.bf16.mxu0 (!%p140_p2), %v1521_v1  ;;  %1383 = vmatprep.subr.bf16.mxu1 (!%p140_p2), %v1521_v1 }
   0xd   : > { %s1857_s16 = smov (!%p165_p3, %s164_s16), 99 }
   0xe   : > { %s1330_s23 = sshll.u32 %s1857_s16, 3  ;;  %s1210_s29 = sshll.u32 %s1857_s16, 2 }
   0xf   : > { %618 = vmatpush1.bf16.msra.mxu0 %v1424_v3  ;;  %1399 = vmatpush1.bf16.msra.mxu1 %v1424_v3  ;;  %s1579_s28 = scalar_lea.vmem %s1852_s0, %s1330_s23  ;;  %v1691_v3 = vld [vmem:[%s1854_s2] ss:$0 sm:$0xff]  ;;  %s1701_s16 = scalar_lea.vmem %s1855_s3, %s1210_s29 }
  0x10   : > { %619 = vmatprep.subr.bf16.mxu0 %v1521_v1  ;;  %1384 = vmatprep.subr.bf16.mxu1 %v1521_v1  ;;  %v1440_v6 = vld [vmem:[%s1579_s28 + $0x4] ss:$8 sps:$4 sm:$0xff]   ;;  %v1443_v8 = vld [vmem:[%s1579_s28 + $0xd4] ss:$8 sps:$4 sm:$0xff]   ;;  %v1438_v19 = vld [vmem:[%s1579_s28] ss:$8 sps:$4 sm:$0xff]  }
  0x11   : > { %645 = vmatprep.mubr.bf16.mxu0 %v1440_v6  ;;  %749 = vmatprep.mubr.bf16.mxu1 %v1443_v8  ;;  %v1441_v20 = vld [vmem:[%s1579_s28 + $0xd0] ss:$8 sps:$4 sm:$0xff]   ;;  %v1444_v21 = vld [vmem:[%s1579_s28 + $0x14] ss:$8 sps:$4 sm:$0xff]   ;;  %v1447_v22 = vld [vmem:[%s1579_s28 + $0xe4] ss:$8 sps:$4 sm:$0xff]  }
  0x12   : > { %v1446_v23 = vld [vmem:[%s1579_s28 + $0x10] ss:$8 sps:$4 sm:$0xff]   ;;  %v1449_v24 = vld [vmem:[%s1579_s28 + $0xe0] ss:$8 sps:$4 sm:$0xff]   ;;  %v1450_v25 = vld [vmem:[%s1579_s28 + $0x24] ss:$8 sps:$4 sm:$0xff]  }
  0x13   : > { %620 = vmatpush1.bf16.msra.mxu0 %v1425_v4  ;;  %1400 = vmatpush1.bf16.msra.mxu1 %v1425_v4  ;;  %v1453_v26 = vld [vmem:[%s1579_s28 + $0xf4] ss:$8 sps:$4 sm:$0xff]   ;;  %v1452_v27 = vld [vmem:[%s1579_s28 + $0x20] ss:$8 sps:$4 sm:$0xff]   ;;  %v1455_v28 = vld [vmem:[%s1579_s28 + $0xf0] ss:$8 sps:$4 sm:$0xff]  }
  0x14   : > { %621 = vmatprep.subr.bf16.mxu0 %v1521_v1  ;;  %1385 = vmatprep.subr.bf16.mxu1 %v1521_v1  ;;  %v1456_v29 = vld [vmem:[%s1579_s28 + $0x34] ss:$8 sps:$4 sm:$0xff]   ;;  %v1459_v30 = vld [vmem:[%s1579_s28 + $0x104] ss:$8 sps:$4 sm:$0xff]   ;;  %v1458_v31 = vld [vmem:[%s1579_s28 + $0x30] ss:$8 sps:$4 sm:$0xff]  }
  0x15   : > { %v1461_v32 = vld [vmem:[%s1579_s28 + $0x100] ss:$8 sps:$4 sm:$0xff]   ;;  %v1462_v33 = vld [vmem:[%s1579_s28 + $0x44] ss:$8 sps:$4 sm:$0xff]   ;;  %v1465_v34 = vld [vmem:[%s1579_s28 + $0x114] ss:$8 sps:$4 sm:$0xff]  }
  0x16   : > { %v1464_v35 = vld [vmem:[%s1579_s28 + $0x40] ss:$8 sps:$4 sm:$0xff]   ;;  %v1467_v36 = vld [vmem:[%s1579_s28 + $0x110] ss:$8 sps:$4 sm:$0xff]   ;;  %v1468_v37 = vld [vmem:[%s1579_s28 + $0x54] ss:$8 sps:$4 sm:$0xff]  }
  0x17   : > { %622 = vmatpush1.bf16.msra.mxu0 %v1426_v5  ;;  %1401 = vmatpush1.bf16.msra.mxu1 %v1426_v5  ;;  %v1471_v38 = vld [vmem:[%s1579_s28 + $0x124] ss:$8 sps:$4 sm:$0xff]   ;;  %v1470_v39 = vld [vmem:[%s1579_s28 + $0x50] ss:$8 sps:$4 sm:$0xff]   ;;  %v1473_v40 = vld [vmem:[%s1579_s28 + $0x120] ss:$8 sps:$4 sm:$0xff]  }
  0x18   : > { %623 = vmatprep.subr.bf16.mxu0 %v1521_v1  ;;  %1386 = vmatprep.subr.bf16.mxu1 %v1521_v1  ;;  %v1474_v41 = vld [vmem:[%s1579_s28 + $0x64] ss:$8 sps:$4 sm:$0xff]   ;;  %v1477_v42 = vld [vmem:[%s1579_s28 + $0x134] ss:$8 sps:$4 sm:$0xff]   ;;  %v1476_v43 = vld [vmem:[%s1579_s28 + $0x60] ss:$8 sps:$4 sm:$0xff]  }
  0x19   : > { %v1479_v44 = vld [vmem:[%s1579_s28 + $0x130] ss:$8 sps:$4 sm:$0xff]   ;;  %v1480_v45 = vld [vmem:[%s1579_s28 + $0x74] ss:$8 sps:$4 sm:$0xff]   ;;  %v1483_v46 = vld [vmem:[%s1579_s28 + $0x144] ss:$8 sps:$4 sm:$0xff]  }
  0x1a   : > { %v1482_v47 = vld [vmem:[%s1579_s28 + $0x70] ss:$8 sps:$4 sm:$0xff]   ;;  %v1485_v48 = vld [vmem:[%s1579_s28 + $0x140] ss:$8 sps:$4 sm:$0xff]   ;;  %v1486_v49 = vld [vmem:[%s1579_s28 + $0x84] ss:$8 sps:$4 sm:$0xff]  }
  0x1b   : > { %624 = vmatpush1.bf16.msra.mxu0 %v1427_v7  ;;  %1402 = vmatpush1.bf16.msra.mxu1 %v1427_v7  ;;  %v1489_v50 = vld [vmem:[%s1579_s28 + $0x154] ss:$8 sps:$4 sm:$0xff]   ;;  %v1488_v51 = vld [vmem:[%s1579_s28 + $0x80] ss:$8 sps:$4 sm:$0xff]   ;;  %v1491_v52 = vld [vmem:[%s1579_s28 + $0x150] ss:$8 sps:$4 sm:$0xff]  }
  0x1c   : > { %625 = vmatprep.subr.bf16.mxu0 %v1521_v1  ;;  %1387 = vmatprep.subr.bf16.mxu1 %v1521_v1  ;;  %v1492_v53 = vld [vmem:[%s1579_s28 + $0x94] ss:$8 sps:$4 sm:$0xff]   ;;  %v1495_v54 = vld [vmem:[%s1579_s28 + $0x164] ss:$8 sps:$4 sm:$0xff]   ;;  %v1494_v55 = vld [vmem:[%s1579_s28 + $0x90] ss:$8 sps:$4 sm:$0xff]  }
  0x1d   : > { %v1497_v56 = vld [vmem:[%s1579_s28 + $0x160] ss:$8 sps:$4 sm:$0xff]   ;;  %v1498_v57 = vld [vmem:[%s1579_s28 + $0xa4] ss:$8 sps:$4 sm:$0xff]   ;;  %v1501_v58 = vld [vmem:[%s1579_s28 + $0x174] ss:$8 sps:$4 sm:$0xff]  }
  0x1e   : > { %v1500_v59 = vld [vmem:[%s1579_s28 + $0xa0] ss:$8 sps:$4 sm:$0xff]   ;;  %v1503_v60 = vld [vmem:[%s1579_s28 + $0x170] ss:$8 sps:$4 sm:$0xff]   ;;  %v1504_v61 = vld [vmem:[%s1579_s28 + $0xb4] ss:$8 sps:$4 sm:$0xff]  }
  0x1f   : > { %626 = vmatpush1.bf16.msra.mxu0 %v1428_v9  ;;  %1403 = vmatpush1.bf16.msra.mxu1 %v1428_v9  ;;  %v1507_v62 = vld [vmem:[%s1579_s28 + $0x184] ss:$8 sps:$4 sm:$0xff]   ;;  %v1506_v63 = vld [vmem:[%s1579_s28 + $0xb0] ss:$8 sps:$4 sm:$0xff]   ;;  %v1509_v0 = vld [vmem:[%s1579_s28 + $0x180] ss:$8 sps:$4 sm:$0xff]  }
  0x20   : > { %627 = vmatprep.subr.bf16.mxu0 %v1521_v1  ;;  %1388 = vmatprep.subr.bf16.mxu1 %v1521_v1  ;;  %v1512_v2 = vld [vmem:[%s1579_s28 + $0xc0] ss:$8 sps:$4 sm:$0xff]  }
  0x23   : > { %628 = vmatpush1.bf16.msra.mxu0 %v1429_v10  ;;  %1404 = vmatpush1.bf16.msra.mxu1 %v1429_v10 }
  0x24   : > { %629 = vmatprep.subr.bf16.mxu0 %v1521_v1  ;;  %1389 = vmatprep.subr.bf16.mxu1 %v1521_v1 }
  0x27   : > { %630 = vmatpush1.bf16.msra.mxu0 %v1430_v11  ;;  %1405 = vmatpush1.bf16.msra.mxu1 %v1430_v11 }
  0x28   : > { %631 = vmatprep.subr.bf16.mxu0 %v1521_v1  ;;  %1390 = vmatprep.subr.bf16.mxu1 %v1521_v1 }
  0x2b   : > { %632 = vmatpush1.bf16.msra.mxu0 %v1431_v12  ;;  %1406 = vmatpush1.bf16.msra.mxu1 %v1431_v12 }
  0x2c   : > { %633 = vmatprep.subr.bf16.mxu0 %v1521_v1  ;;  %1391 = vmatprep.subr.bf16.mxu1 %v1521_v1 }
  0x2f   : > { %634 = vmatpush1.bf16.msra.mxu0 %v1432_v13  ;;  %1407 = vmatpush1.bf16.msra.mxu1 %v1432_v13 }
  0x30   : > { %635 = vmatprep.subr.bf16.mxu0 %v1521_v1  ;;  %1392 = vmatprep.subr.bf16.mxu1 %v1521_v1 }
  0x33   : > { %636 = vmatpush1.bf16.msra.mxu0 %v1433_v14  ;;  %1408 = vmatpush1.bf16.msra.mxu1 %v1433_v14 }
  0x34   : > { %637 = vmatprep.subr.bf16.mxu0 %v1521_v1  ;;  %1393 = vmatprep.subr.bf16.mxu1 %v1521_v1 }
  0x37   : > { %638 = vmatpush1.bf16.msra.mxu0 %v1434_v15  ;;  %1409 = vmatpush1.bf16.msra.mxu1 %v1434_v15 }
  0x38   : > { %639 = vmatprep.subr.bf16.mxu0 %v1521_v1  ;;  %1394 = vmatprep.subr.bf16.mxu1 %v1521_v1 }
  0x3b   : > { %640 = vmatpush1.bf16.msra.mxu0 %v1435_v16  ;;  %1410 = vmatpush1.bf16.msra.mxu1 %v1435_v16 }
  0x3c   : > { %641 = vmatprep.subr.bf16.mxu0 %v1521_v1  ;;  %1395 = vmatprep.subr.bf16.mxu1 %v1521_v1 }
  0x3f   : > { %642 = vmatpush1.bf16.msra.mxu0 %v1436_v17  ;;  %1411 = vmatpush1.bf16.msra.mxu1 %v1436_v17 }
  0x40   : > { %643 = vmatprep.subr.bf16.mxu0 %v1521_v1  ;;  %1396 = vmatprep.subr.bf16.mxu1 %v1521_v1  ;;  %v1510_v1 = vld [vmem:[%s1579_s28 + $0xc4] ss:$8 sps:$4 sm:$0xff]  }
  0x43   : > { %644 = vmatpush1.bf16.msra.mxu0 %v1437_v18  ;;  %1412 = vmatpush1.bf16.msra.mxu1 %v1437_v18 }
  0x46   : > { %646 = vmatmul.mubr.bf16.vlgmr.msra.gmra.mrb[0].mxu0 %v1438_v19  ;;  %750 = vmatmul.mubr.bf16.vlgmr.msra.gmra.mrb[0].mxu1 %v1441_v20 }
  0x47   : > { %653 = vmatprep.mubr.bf16.mxu0 %v1444_v21  ;;  %757 = vmatprep.mubr.bf16.mxu1 %v1447_v22 }
  0x4e   : > { %654 = vmatmul.mubr.bf16.gmra.mrb[4].mxu0 %v1446_v23  ;;  %758 = vmatmul.mubr.bf16.gmra.mrb[4].mxu1 %v1449_v24 }
  0x4f   : > { %661 = vmatprep.mubr.bf16.mxu0 %v1450_v25  ;;  %765 = vmatprep.mubr.bf16.mxu1 %v1453_v26 }
  0x56   : > { %662 = vmatmul.mubr.bf16.gmra.mrb[8].mxu0 %v1452_v27  ;;  %766 = vmatmul.mubr.bf16.gmra.mrb[8].mxu1 %v1455_v28 }
  0x57   : > { %669 = vmatprep.mubr.bf16.mxu0 %v1456_v29  ;;  %773 = vmatprep.mubr.bf16.mxu1 %v1459_v30 }
  0x5e   : > { %670 = vmatmul.mubr.bf16.gmra.mrb[12].mxu0 %v1458_v31  ;;  %774 = vmatmul.mubr.bf16.gmra.mrb[12].mxu1 %v1461_v32 }
  0x5f   : > { %677 = vmatprep.mubr.bf16.mxu0 %v1462_v33  ;;  %781 = vmatprep.mubr.bf16.mxu1 %v1465_v34 }
  0x66   : > { %678 = vmatmul.mubr.bf16.gmra.mrb[16].mxu0 %v1464_v35  ;;  %782 = vmatmul.mubr.bf16.gmra.mrb[16].mxu1 %v1467_v36 }
  0x67   : > { %685 = vmatprep.mubr.bf16.mxu0 %v1468_v37  ;;  %789 = vmatprep.mubr.bf16.mxu1 %v1471_v38 }
  0x6e   : > { %686 = vmatmul.mubr.bf16.gmra.mrb[20].mxu0 %v1470_v39  ;;  %790 = vmatmul.mubr.bf16.gmra.mrb[20].mxu1 %v1473_v40 }
  0x6f   : > { %693 = vmatprep.mubr.bf16.mxu0 %v1474_v41  ;;  %797 = vmatprep.mubr.bf16.mxu1 %v1477_v42 }
  0x76   : > { %694 = vmatmul.mubr.bf16.gmra.mrb[24].mxu0 %v1476_v43  ;;  %798 = vmatmul.mubr.bf16.gmra.mrb[24].mxu1 %v1479_v44 }
  0x77   : > { %701 = vmatprep.mubr.bf16.mxu0 %v1480_v45  ;;  %805 = vmatprep.mubr.bf16.mxu1 %v1483_v46 }
  0x7e   : > { %702 = vmatmul.mubr.bf16.gmra.mrb[28].mxu0 %v1482_v47  ;;  %806 = vmatmul.mubr.bf16.gmra.mrb[28].mxu1 %v1485_v48 }
  0x7f   : > { %709 = vmatprep.mubr.bf16.mxu0 %v1486_v49  ;;  %813 = vmatprep.mubr.bf16.mxu1 %v1489_v50 }
  0x86   : > { %710 = vmatmul.mubr.bf16.gmra.mrb[32].mxu0 %v1488_v51  ;;  %814 = vmatmul.mubr.bf16.gmra.mrb[32].mxu1 %v1491_v52 }
  0x87   : > { %717 = vmatprep.mubr.bf16.mxu0 %v1492_v53  ;;  %821 = vmatprep.mubr.bf16.mxu1 %v1495_v54 }
  0x8e   : > { %718 = vmatmul.mubr.bf16.gmra.mrb[36].mxu0 %v1494_v55  ;;  %822 = vmatmul.mubr.bf16.gmra.mrb[36].mxu1 %v1497_v56 }
  0x8f   : > { %725 = vmatprep.mubr.bf16.mxu0 %v1498_v57  ;;  %829 = vmatprep.mubr.bf16.mxu1 %v1501_v58 }
  0x96   : > { %726 = vmatmul.mubr.bf16.gmra.mrb[40].mxu0 %v1500_v59  ;;  %830 = vmatmul.mubr.bf16.gmra.mrb[40].mxu1 %v1503_v60 }
  0x97   : > { %733 = vmatprep.mubr.bf16.mxu0 %v1504_v61  ;;  %837 = vmatprep.mubr.bf16.mxu1 %v1507_v62 }
  0x9e   : > { %734 = vmatmul.mubr.bf16.gmra.mrb[44].mxu0 %v1506_v63  ;;  %838 = vmatmul.mubr.bf16.gmra.mrb[44].mxu1 %v1509_v0 }
  0x9f   : > { %741 = vmatprep.mubr.bf16.mxu0 %v1510_v1 }
  0xa6   : > { %742 = vmatmul.mubr.bf16.gmra.mrb[48].mxu0 %v1512_v2 }
 0x119   : > { %v647_v4 = vpop.f32.mrb[0].mxu0  ;;  %v751_v5 = vpop.f32.mrb[0].mxu1 }
 0x11a   : > { %v648_v6 = vadd.f32 %v1691_v3, %v647_v4  ;;  %v649_v7 = vpop.f32.mrb[1].mxu0  ;;  %v752_v8 = vadd.f32 %v1691_v3, %v751_v5  ;;  %v753_v9 = vpop.f32.mrb[1].mxu1 }
 0x11b   : > { %v650_v10 = vpop.f32.mrb[2].mxu0  ;;  %v754_v11 = vpop.f32.mrb[2].mxu1 }
 0x11c   : > { %v846_v12 = vmax.f32 %v648_v6, 0.0  ;;  %v651_v13 = vadd.f32 %v1691_v3, %v650_v10  ;;  %v652_v14 = vpop.f32.mrb[3].mxu0  ;;  %v872_v15 = vmax.f32 %v752_v8, 0.0  ;;  %v755_v16 = vadd.f32 %v1691_v3, %v754_v11  ;;  %v756_v17 = vpop.f32.mrb[3].mxu1 }
 0x11e   : > { %v1331_v18 = vpack.c.bf16 %v846_v12, %v846_v12  ;;  %v847_v19 = vmax.f32 %v651_v13, 0.0  ;;  %v1357_v20 = vpack.c.bf16 %v872_v15, %v872_v15  ;;  %v873_v21 = vmax.f32 %v755_v16, 0.0 }
 0x120   : > { %1097 = vst.msk [vmem:[%s1701_s16] sm:$0xf] %vm1096_vm0, %v1331_v18  ;;  %v1332_v22 = vpack.c.bf16 %v847_v19, %v847_v19  ;;  %1123 = vst.msk [vmem:[%s1701_s16 + $0x68] sm:$0xf] %vm1096_vm0, %v1357_v20  ;;  %v1358_v23 = vpack.c.bf16 %v873_v21, %v873_v21 }
 0x121   : > { %v655_v24 = vpop.f32.mrb[4].mxu0  ;;  %v759_v25 = vpop.f32.mrb[4].mxu1 }
 0x122   : > { %1098 = vst.msk [vmem:[%s1701_s16 + $0x4] sm:$0xf] %vm1096_vm0, %v1332_v22  ;;  %1124 = vst.msk [vmem:[%s1701_s16 + $0x6c] sm:$0xf] %vm1096_vm0, %v1358_v23  ;;  %v656_v26 = vadd.f32 %v1691_v3, %v655_v24  ;;  %v657_v27 = vpop.f32.mrb[5].mxu0  ;;  %v760_v28 = vadd.f32 %v1691_v3, %v759_v25  ;;  %v761_v29 = vpop.f32.mrb[5].mxu1 }
 0x123   : > { %v658_v30 = vpop.f32.mrb[6].mxu0  ;;  %v762_v31 = vpop.f32.mrb[6].mxu1 }
 0x124   : > { %v848_v32 = vmax.f32 %v656_v26, 0.0  ;;  %v659_v33 = vadd.f32 %v1691_v3, %v658_v30  ;;  %v660_v34 = vpop.f32.mrb[7].mxu0  ;;  %v874_v35 = vmax.f32 %v760_v28, 0.0  ;;  %v763_v36 = vadd.f32 %v1691_v3, %v762_v31  ;;  %v764_v37 = vpop.f32.mrb[7].mxu1 }
 0x126   : > { %v1333_v38 = vpack.c.bf16 %v848_v32, %v848_v32  ;;  %v849_v39 = vmax.f32 %v659_v33, 0.0  ;;  %v1359_v40 = vpack.c.bf16 %v874_v35, %v874_v35  ;;  %v875_v41 = vmax.f32 %v763_v36, 0.0 }
 0x128   : > { %1099 = vst.msk [vmem:[%s1701_s16 + $0x8] sm:$0xf] %vm1096_vm0, %v1333_v38  ;;  %v1334_v42 = vpack.c.bf16 %v849_v39, %v849_v39  ;;  %1125 = vst.msk [vmem:[%s1701_s16 + $0x70] sm:$0xf] %vm1096_vm0, %v1359_v40  ;;  %v1360_v43 = vpack.c.bf16 %v875_v41, %v875_v41 }
 0x129   : > { %v663_v44 = vpop.f32.mrb[8].mxu0  ;;  %v767_v45 = vpop.f32.mrb[8].mxu1 }
 0x12a   : > { %1100 = vst.msk [vmem:[%s1701_s16 + $0xc] sm:$0xf] %vm1096_vm0, %v1334_v42  ;;  %1126 = vst.msk [vmem:[%s1701_s16 + $0x74] sm:$0xf] %vm1096_vm0, %v1360_v43  ;;  %v664_v46 = vadd.f32 %v1691_v3, %v663_v44  ;;  %v665_v47 = vpop.f32.mrb[9].mxu0  ;;  %v768_v48 = vadd.f32 %v1691_v3, %v767_v45  ;;  %v769_v49 = vpop.f32.mrb[9].mxu1 }
 0x12b   : > { %v666_v50 = vpop.f32.mrb[10].mxu0  ;;  %v770_v51 = vpop.f32.mrb[10].mxu1 }
 0x12c   : > { %v850_v52 = vmax.f32 %v664_v46, 0.0  ;;  %v667_v53 = vadd.f32 %v1691_v3, %v666_v50  ;;  %v668_v54 = vpop.f32.mrb[11].mxu0  ;;  %v876_v55 = vmax.f32 %v768_v48, 0.0  ;;  %v771_v56 = vadd.f32 %v1691_v3, %v770_v51  ;;  %v772_v57 = vpop.f32.mrb[11].mxu1 }
 0x12e   : > { %v1335_v58 = vpack.c.bf16 %v850_v52, %v850_v52  ;;  %v851_v59 = vmax.f32 %v667_v53, 0.0  ;;  %v1361_v60 = vpack.c.bf16 %v876_v55, %v876_v55  ;;  %v877_v61 = vmax.f32 %v771_v56, 0.0 }
 0x130   : > { %1101 = vst.msk [vmem:[%s1701_s16 + $0x10] sm:$0xf] %vm1096_vm0, %v1335_v58  ;;  %v1336_v62 = vpack.c.bf16 %v851_v59, %v851_v59  ;;  %1127 = vst.msk [vmem:[%s1701_s16 + $0x78] sm:$0xf] %vm1096_vm0, %v1361_v60  ;;  %v1362_v63 = vpack.c.bf16 %v877_v61, %v877_v61 }
 0x131   : > { %v671_v0 = vpop.f32.mrb[12].mxu0  ;;  %v775_v1 = vpop.f32.mrb[12].mxu1 }
 0x132   : > { %1102 = vst.msk [vmem:[%s1701_s16 + $0x14] sm:$0xf] %vm1096_vm0, %v1336_v62  ;;  %1128 = vst.msk [vmem:[%s1701_s16 + $0x7c] sm:$0xf] %vm1096_vm0, %v1362_v63  ;;  %v672_v2 = vadd.f32 %v1691_v3, %v671_v0  ;;  %v673_v4 = vpop.f32.mrb[13].mxu0  ;;  %v776_v5 = vadd.f32 %v1691_v3, %v775_v1  ;;  %v777_v6 = vpop.f32.mrb[13].mxu1 }
 0x133   : > { %v674_v7 = vpop.f32.mrb[14].mxu0  ;;  %v778_v8 = vpop.f32.mrb[14].mxu1 }
 0x134   : > { %v852_v9 = vmax.f32 %v672_v2, 0.0  ;;  %v675_v10 = vadd.f32 %v1691_v3, %v674_v7  ;;  %v676_v11 = vpop.f32.mrb[15].mxu0  ;;  %v878_v12 = vmax.f32 %v776_v5, 0.0  ;;  %v779_v13 = vadd.f32 %v1691_v3, %v778_v8  ;;  %v780_v14 = vpop.f32.mrb[15].mxu1 }
 0x136   : > { %v1337_v15 = vpack.c.bf16 %v852_v9, %v852_v9  ;;  %v853_v16 = vmax.f32 %v675_v10, 0.0  ;;  %v1363_v17 = vpack.c.bf16 %v878_v12, %v878_v12  ;;  %v879_v18 = vmax.f32 %v779_v13, 0.0 }
 0x138   : > { %1103 = vst.msk [vmem:[%s1701_s16 + $0x18] sm:$0xf] %vm1096_vm0, %v1337_v15  ;;  %v1338_v19 = vpack.c.bf16 %v853_v16, %v853_v16  ;;  %1129 = vst.msk [vmem:[%s1701_s16 + $0x80] sm:$0xf] %vm1096_vm0, %v1363_v17  ;;  %v1364_v20 = vpack.c.bf16 %v879_v18, %v879_v18 }
 0x139   : > { %v679_v21 = vpop.f32.mrb[16].mxu0  ;;  %v783_v22 = vpop.f32.mrb[16].mxu1 }
 0x13a   : > { %1104 = vst.msk [vmem:[%s1701_s16 + $0x1c] sm:$0xf] %vm1096_vm0, %v1338_v19  ;;  %1130 = vst.msk [vmem:[%s1701_s16 + $0x84] sm:$0xf] %vm1096_vm0, %v1364_v20  ;;  %v680_v23 = vadd.f32 %v1691_v3, %v679_v21  ;;  %v681_v24 = vpop.f32.mrb[17].mxu0  ;;  %v784_v25 = vadd.f32 %v1691_v3, %v783_v22  ;;  %v785_v26 = vpop.f32.mrb[17].mxu1 }
 0x13b   : > { %v682_v27 = vpop.f32.mrb[18].mxu0  ;;  %v786_v28 = vpop.f32.mrb[18].mxu1 }
 0x13c   : > { %v854_v29 = vmax.f32 %v680_v23, 0.0  ;;  %v683_v30 = vadd.f32 %v1691_v3, %v682_v27  ;;  %v684_v31 = vpop.f32.mrb[19].mxu0  ;;  %v880_v32 = vmax.f32 %v784_v25, 0.0  ;;  %v787_v33 = vadd.f32 %v1691_v3, %v786_v28  ;;  %v788_v34 = vpop.f32.mrb[19].mxu1 }
 0x13e   : > { %v1339_v35 = vpack.c.bf16 %v854_v29, %v854_v29  ;;  %v855_v36 = vmax.f32 %v683_v30, 0.0  ;;  %v1365_v37 = vpack.c.bf16 %v880_v32, %v880_v32  ;;  %v881_v38 = vmax.f32 %v787_v33, 0.0 }
 0x140   : > { %1105 = vst.msk [vmem:[%s1701_s16 + $0x20] sm:$0xf] %vm1096_vm0, %v1339_v35  ;;  %v1340_v39 = vpack.c.bf16 %v855_v36, %v855_v36  ;;  %1131 = vst.msk [vmem:[%s1701_s16 + $0x88] sm:$0xf] %vm1096_vm0, %v1365_v37  ;;  %v1366_v40 = vpack.c.bf16 %v881_v38, %v881_v38 }
 0x141   : > { %v687_v41 = vpop.f32.mrb[20].mxu0  ;;  %v791_v42 = vpop.f32.mrb[20].mxu1 }
 0x142   : > { %1106 = vst.msk [vmem:[%s1701_s16 + $0x24] sm:$0xf] %vm1096_vm0, %v1340_v39  ;;  %1132 = vst.msk [vmem:[%s1701_s16 + $0x8c] sm:$0xf] %vm1096_vm0, %v1366_v40  ;;  %v688_v43 = vadd.f32 %v1691_v3, %v687_v41  ;;  %v689_v44 = vpop.f32.mrb[21].mxu0  ;;  %v792_v45 = vadd.f32 %v1691_v3, %v791_v42  ;;  %v793_v46 = vpop.f32.mrb[21].mxu1 }
 0x143   : > { %v690_v47 = vpop.f32.mrb[22].mxu0  ;;  %v794_v48 = vpop.f32.mrb[22].mxu1 }
 0x144   : > { %v856_v49 = vmax.f32 %v688_v43, 0.0  ;;  %v691_v50 = vadd.f32 %v1691_v3, %v690_v47  ;;  %v692_v51 = vpop.f32.mrb[23].mxu0  ;;  %v882_v52 = vmax.f32 %v792_v45, 0.0  ;;  %v795_v53 = vadd.f32 %v1691_v3, %v794_v48  ;;  %v796_v54 = vpop.f32.mrb[23].mxu1 }
 0x146   : > { %v1341_v55 = vpack.c.bf16 %v856_v49, %v856_v49  ;;  %v857_v56 = vmax.f32 %v691_v50, 0.0  ;;  %v1367_v57 = vpack.c.bf16 %v882_v52, %v882_v52  ;;  %v883_v58 = vmax.f32 %v795_v53, 0.0 }
 0x148   : > { %1107 = vst.msk [vmem:[%s1701_s16 + $0x28] sm:$0xf] %vm1096_vm0, %v1341_v55  ;;  %v1342_v59 = vpack.c.bf16 %v857_v56, %v857_v56  ;;  %1133 = vst.msk [vmem:[%s1701_s16 + $0x90] sm:$0xf] %vm1096_vm0, %v1367_v57  ;;  %v1368_v60 = vpack.c.bf16 %v883_v58, %v883_v58 }
 0x149   : > { %v695_v61 = vpop.f32.mrb[24].mxu0  ;;  %v799_v62 = vpop.f32.mrb[24].mxu1 }
 0x14a   : > { %1108 = vst.msk [vmem:[%s1701_s16 + $0x2c] sm:$0xf] %vm1096_vm0, %v1342_v59  ;;  %1134 = vst.msk [vmem:[%s1701_s16 + $0x94] sm:$0xf] %vm1096_vm0, %v1368_v60  ;;  %v696_v63 = vadd.f32 %v1691_v3, %v695_v61  ;;  %v697_v0 = vpop.f32.mrb[25].mxu0  ;;  %v800_v1 = vadd.f32 %v1691_v3, %v799_v62  ;;  %v801_v2 = vpop.f32.mrb[25].mxu1 }
 0x14b   : > { %v698_v4 = vpop.f32.mrb[26].mxu0  ;;  %v802_v5 = vpop.f32.mrb[26].mxu1 }
 0x14c   : > { %v858_v6 = vmax.f32 %v696_v63, 0.0  ;;  %v699_v7 = vadd.f32 %v1691_v3, %v698_v4  ;;  %v700_v8 = vpop.f32.mrb[27].mxu0  ;;  %v884_v9 = vmax.f32 %v800_v1, 0.0  ;;  %v803_v10 = vadd.f32 %v1691_v3, %v802_v5  ;;  %v804_v11 = vpop.f32.mrb[27].mxu1 }
 0x14e   : > { %v1343_v12 = vpack.c.bf16 %v858_v6, %v858_v6  ;;  %v859_v13 = vmax.f32 %v699_v7, 0.0  ;;  %v1369_v14 = vpack.c.bf16 %v884_v9, %v884_v9  ;;  %v885_v15 = vmax.f32 %v803_v10, 0.0 }
 0x150   : > { %1109 = vst.msk [vmem:[%s1701_s16 + $0x30] sm:$0xf] %vm1096_vm0, %v1343_v12  ;;  %v1344_v16 = vpack.c.bf16 %v859_v13, %v859_v13  ;;  %1135 = vst.msk [vmem:[%s1701_s16 + $0x98] sm:$0xf] %vm1096_vm0, %v1369_v14  ;;  %v1370_v17 = vpack.c.bf16 %v885_v15, %v885_v15 }
 0x151   : > { %v703_v18 = vpop.f32.mrb[28].mxu0  ;;  %v807_v19 = vpop.f32.mrb[28].mxu1 }
 0x152   : > { %1110 = vst.msk [vmem:[%s1701_s16 + $0x34] sm:$0xf] %vm1096_vm0, %v1344_v16  ;;  %1136 = vst.msk [vmem:[%s1701_s16 + $0x9c] sm:$0xf] %vm1096_vm0, %v1370_v17  ;;  %v704_v20 = vadd.f32 %v1691_v3, %v703_v18  ;;  %v705_v21 = vpop.f32.mrb[29].mxu0  ;;  %v808_v22 = vadd.f32 %v1691_v3, %v807_v19  ;;  %v809_v23 = vpop.f32.mrb[29].mxu1 }
 0x153   : > { %v706_v24 = vpop.f32.mrb[30].mxu0  ;;  %v810_v25 = vpop.f32.mrb[30].mxu1 }
 0x154   : > { %v860_v26 = vmax.f32 %v704_v20, 0.0  ;;  %v707_v27 = vadd.f32 %v1691_v3, %v706_v24  ;;  %v708_v28 = vpop.f32.mrb[31].mxu0  ;;  %v886_v29 = vmax.f32 %v808_v22, 0.0  ;;  %v811_v30 = vadd.f32 %v1691_v3, %v810_v25  ;;  %v812_v31 = vpop.f32.mrb[31].mxu1 }
 0x156   : > { %v1345_v32 = vpack.c.bf16 %v860_v26, %v860_v26  ;;  %v861_v33 = vmax.f32 %v707_v27, 0.0  ;;  %v1371_v34 = vpack.c.bf16 %v886_v29, %v886_v29  ;;  %v887_v35 = vmax.f32 %v811_v30, 0.0 }
 0x158   : > { %1111 = vst.msk [vmem:[%s1701_s16 + $0x38] sm:$0xf] %vm1096_vm0, %v1345_v32  ;;  %v1346_v36 = vpack.c.bf16 %v861_v33, %v861_v33  ;;  %1137 = vst.msk [vmem:[%s1701_s16 + $0xa0] sm:$0xf] %vm1096_vm0, %v1371_v34  ;;  %v1372_v37 = vpack.c.bf16 %v887_v35, %v887_v35 }
 0x159   : > { %v711_v38 = vpop.f32.mrb[32].mxu0  ;;  %v815_v39 = vpop.f32.mrb[32].mxu1 }
 0x15a   : > { %1112 = vst.msk [vmem:[%s1701_s16 + $0x3c] sm:$0xf] %vm1096_vm0, %v1346_v36  ;;  %1138 = vst.msk [vmem:[%s1701_s16 + $0xa4] sm:$0xf] %vm1096_vm0, %v1372_v37  ;;  %v712_v40 = vadd.f32 %v1691_v3, %v711_v38  ;;  %v713_v41 = vpop.f32.mrb[33].mxu0  ;;  %v816_v42 = vadd.f32 %v1691_v3, %v815_v39  ;;  %v817_v43 = vpop.f32.mrb[33].mxu1 }
 0x15b   : > { %v714_v44 = vpop.f32.mrb[34].mxu0  ;;  %v818_v45 = vpop.f32.mrb[34].mxu1 }
 0x15c   : > { %v862_v46 = vmax.f32 %v712_v40, 0.0  ;;  %v715_v47 = vadd.f32 %v1691_v3, %v714_v44  ;;  %v716_v48 = vpop.f32.mrb[35].mxu0  ;;  %v888_v49 = vmax.f32 %v816_v42, 0.0  ;;  %v819_v50 = vadd.f32 %v1691_v3, %v818_v45  ;;  %v820_v51 = vpop.f32.mrb[35].mxu1 }
 0x15e   : > { %v1347_v52 = vpack.c.bf16 %v862_v46, %v862_v46  ;;  %v863_v53 = vmax.f32 %v715_v47, 0.0  ;;  %v1373_v54 = vpack.c.bf16 %v888_v49, %v888_v49  ;;  %v889_v55 = vmax.f32 %v819_v50, 0.0 }
 0x160   : > { %1113 = vst.msk [vmem:[%s1701_s16 + $0x40] sm:$0xf] %vm1096_vm0, %v1347_v52  ;;  %v1348_v56 = vpack.c.bf16 %v863_v53, %v863_v53  ;;  %1139 = vst.msk [vmem:[%s1701_s16 + $0xa8] sm:$0xf] %vm1096_vm0, %v1373_v54  ;;  %v1374_v57 = vpack.c.bf16 %v889_v55, %v889_v55 }
 0x161   : > { %v719_v58 = vpop.f32.mrb[36].mxu0  ;;  %v823_v59 = vpop.f32.mrb[36].mxu1 }
 0x162   : > { %1114 = vst.msk [vmem:[%s1701_s16 + $0x44] sm:$0xf] %vm1096_vm0, %v1348_v56  ;;  %1140 = vst.msk [vmem:[%s1701_s16 + $0xac] sm:$0xf] %vm1096_vm0, %v1374_v57  ;;  %v720_v60 = vadd.f32 %v1691_v3, %v719_v58  ;;  %v721_v61 = vpop.f32.mrb[37].mxu0  ;;  %v824_v62 = vadd.f32 %v1691_v3, %v823_v59  ;;  %v825_v63 = vpop.f32.mrb[37].mxu1 }
 0x163   : > { %v722_v0 = vpop.f32.mrb[38].mxu0  ;;  %v826_v1 = vpop.f32.mrb[38].mxu1 }
 0x164   : > { %v864_v2 = vmax.f32 %v720_v60, 0.0  ;;  %v723_v4 = vadd.f32 %v1691_v3, %v722_v0  ;;  %v724_v5 = vpop.f32.mrb[39].mxu0  ;;  %v890_v6 = vmax.f32 %v824_v62, 0.0  ;;  %v827_v7 = vadd.f32 %v1691_v3, %v826_v1  ;;  %v828_v8 = vpop.f32.mrb[39].mxu1 }
 0x166   : > { %v1349_v9 = vpack.c.bf16 %v864_v2, %v864_v2  ;;  %v865_v10 = vmax.f32 %v723_v4, 0.0  ;;  %v1375_v11 = vpack.c.bf16 %v890_v6, %v890_v6  ;;  %v891_v12 = vmax.f32 %v827_v7, 0.0 }
 0x168   : > { %1115 = vst.msk [vmem:[%s1701_s16 + $0x48] sm:$0xf] %vm1096_vm0, %v1349_v9  ;;  %v1350_v13 = vpack.c.bf16 %v865_v10, %v865_v10  ;;  %1141 = vst.msk [vmem:[%s1701_s16 + $0xb0] sm:$0xf] %vm1096_vm0, %v1375_v11  ;;  %v1376_v14 = vpack.c.bf16 %v891_v12, %v891_v12 }
 0x169   : > { %v727_v15 = vpop.f32.mrb[40].mxu0  ;;  %v831_v16 = vpop.f32.mrb[40].mxu1 }
 0x16a   : > { %1116 = vst.msk [vmem:[%s1701_s16 + $0x4c] sm:$0xf] %vm1096_vm0, %v1350_v13  ;;  %1142 = vst.msk [vmem:[%s1701_s16 + $0xb4] sm:$0xf] %vm1096_vm0, %v1376_v14  ;;  %v728_v17 = vadd.f32 %v1691_v3, %v727_v15  ;;  %v729_v18 = vpop.f32.mrb[41].mxu0  ;;  %v832_v19 = vadd.f32 %v1691_v3, %v831_v16  ;;  %v833_v20 = vpop.f32.mrb[41].mxu1 }
 0x16b   : > { %v730_v21 = vpop.f32.mrb[42].mxu0  ;;  %v834_v22 = vpop.f32.mrb[42].mxu1 }
 0x16c   : > { %v866_v23 = vmax.f32 %v728_v17, 0.0  ;;  %v731_v24 = vadd.f32 %v1691_v3, %v730_v21  ;;  %v732_v25 = vpop.f32.mrb[43].mxu0  ;;  %v892_v26 = vmax.f32 %v832_v19, 0.0  ;;  %v835_v27 = vadd.f32 %v1691_v3, %v834_v22  ;;  %v836_v28 = vpop.f32.mrb[43].mxu1 }
 0x16e   : > { %v1351_v29 = vpack.c.bf16 %v866_v23, %v866_v23  ;;  %v867_v30 = vmax.f32 %v731_v24, 0.0  ;;  %v1377_v31 = vpack.c.bf16 %v892_v26, %v892_v26  ;;  %v893_v32 = vmax.f32 %v835_v27, 0.0 }
 0x170   : > { %1117 = vst.msk [vmem:[%s1701_s16 + $0x50] sm:$0xf] %vm1096_vm0, %v1351_v29  ;;  %v1352_v33 = vpack.c.bf16 %v867_v30, %v867_v30  ;;  %1143 = vst.msk [vmem:[%s1701_s16 + $0xb8] sm:$0xf] %vm1096_vm0, %v1377_v31  ;;  %v1378_v34 = vpack.c.bf16 %v893_v32, %v893_v32 }
 0x171   : > { %v735_v35 = vpop.f32.mrb[44].mxu0  ;;  %v839_v36 = vpop.f32.mrb[44].mxu1 }
 0x172   : > { %1118 = vst.msk [vmem:[%s1701_s16 + $0x54] sm:$0xf] %vm1096_vm0, %v1352_v33  ;;  %1144 = vst.msk [vmem:[%s1701_s16 + $0xbc] sm:$0xf] %vm1096_vm0, %v1378_v34  ;;  %v736_v37 = vadd.f32 %v1691_v3, %v735_v35  ;;  %v737_v38 = vpop.f32.mrb[45].mxu0  ;;  %v840_v39 = vadd.f32 %v1691_v3, %v839_v36  ;;  %v841_v40 = vpop.f32.mrb[45].mxu1 }
 0x173   : > { %v738_v41 = vpop.f32.mrb[46].mxu0  ;;  %v842_v42 = vpop.f32.mrb[46].mxu1 }
 0x174   : > { %v868_v43 = vmax.f32 %v736_v37, 0.0  ;;  %v739_v44 = vadd.f32 %v1691_v3, %v738_v41  ;;  %v740_v45 = vpop.f32.mrb[47].mxu0  ;;  %v894_v46 = vmax.f32 %v840_v39, 0.0  ;;  %v843_v47 = vadd.f32 %v1691_v3, %v842_v42  ;;  %v844_v48 = vpop.f32.mrb[47].mxu1 }
 0x176   : > { %v1353_v49 = vpack.c.bf16 %v868_v43, %v868_v43  ;;  %v869_v50 = vmax.f32 %v739_v44, 0.0  ;;  %v1379_v51 = vpack.c.bf16 %v894_v46, %v894_v46  ;;  %v895_v52 = vmax.f32 %v843_v47, 0.0 }
 0x178   : > { %1119 = vst.msk [vmem:[%s1701_s16 + $0x58] sm:$0xf] %vm1096_vm0, %v1353_v49  ;;  %v1354_v53 = vpack.c.bf16 %v869_v50, %v869_v50  ;;  %1145 = vst.msk [vmem:[%s1701_s16 + $0xc0] sm:$0xf] %vm1096_vm0, %v1379_v51  ;;  %v1380_v54 = vpack.c.bf16 %v895_v52, %v895_v52 }
 0x179   : > { %v743_v55 = vpop.f32.mrb[48].mxu0 }
 0x17a   : > { %1120 = vst.msk [vmem:[%s1701_s16 + $0x5c] sm:$0xf] %vm1096_vm0, %v1354_v53  ;;  %1146 = vst.msk [vmem:[%s1701_s16 + $0xc4] sm:$0xf] %vm1096_vm0, %v1380_v54  ;;  %v744_v56 = vadd.f32 %v1691_v3, %v743_v55  ;;  %v745_v57 = vpop.f32.mrb[49].mxu0 }
 0x17b   : > { %v746_v58 = vpop.f32.mrb[50].mxu0 }
 0x17c   : > { %v870_v59 = vmax.f32 %v744_v56, 0.0  ;;  %v747_v60 = vadd.f32 %v1691_v3, %v746_v58  ;;  %v748_v61 = vpop.f32.mrb[51].mxu0 }
 0x17e   : > { %v1355_v62 = vpack.c.bf16 %v870_v59, %v870_v59  ;;  %v871_v63 = vmax.f32 %v747_v60, 0.0 }
 0x180   : > { %1121 = vst.msk [vmem:[%s1701_s16 + $0x60] sm:$0xf] %vm1096_vm0, %v1355_v62  ;;  %v1356_v0 = vpack.c.bf16 %v871_v63, %v871_v63 }
 0x182   : > { %1122 = vst.msk [vmem:[%s1701_s16 + $0x64] sm:$0xf] %vm1096_vm0, %v1356_v0 }
 0x183 PF: > { %s13_s12 = sadd.s32 1, %s1519_s12  }
 0x184   : > { %p10_p4 = scmp.ge.s32.totalorder %s13_s12, 4  }
 0x186   :  { %12 = sbr.rel (!%p10_p4) target bundleno = 1 (0x1), region = 62 }

// kernel: cnn_policy_forward.5
= control target key start
LH: loop header
LB: loop body
LE: loop exit
PB: predicated region body
PF: predicated region fallthrough
CT: control target
= control target key end

     0   :  { %vm880_vm0 = vcmask 519168   ;;  %s1637_s1 = inlined_call_operand.vmem [shape: bf16[512,64], index: 1, kind: input, shape index: {}]   ;;  %s1638_s0 = inlined_call_operand.vmem [shape: bf16[168,512], index: 0, kind: input, shape index: {}]   ;;  %s1639_s2 = inlined_call_operand.vmem [shape: f32[1,64], index: 2, kind: input, shape index: {}]   ;;  %s1640_s3 = inlined_call_operand.vmem [shape: bf16[168,64], index: 3, kind: output, shape index: {}]  }
   0x1   :  { %v1189_v0 = vld [vmem:[%s1637_s1 + $0x40] sm:$0xff]   ;;  %v1193_v4 = vld [vmem:[%s1637_s1 + $0x48] sm:$0xff]   ;;  %v1197_v8 = vld [vmem:[%s1637_s1 + $0x50] sm:$0xff]  }
   0x2   :  { %v1190_v1 = vld [vmem:[%s1637_s1 + $0xc0] sm:$0xff]   ;;  %1025 = vmatprep.subr.bf16.mxu0 %v1189_v0  ;;  %v1194_v5 = vld [vmem:[%s1637_s1 + $0xc8] sm:$0xff]   ;;  %v1198_v9 = vld [vmem:[%s1637_s1 + $0xd0] sm:$0xff]  }
   0x3   :  { %v1191_v2 = vld [vmem:[%s1637_s1] sm:$0xff]   ;;  %1107 = vmatprep.subr.bf16.mxu1 %v1190_v1  ;;  %v1195_v6 = vld [vmem:[%s1637_s1 + $0x8] sm:$0xff]   ;;  %v1199_v10 = vld [vmem:[%s1637_s1 + $0x10] sm:$0xff]  }
   0x4   :  { %v1192_v3 = vld [vmem:[%s1637_s1 + $0x80] sm:$0xff]   ;;  %1026 = vmatpush3.bf16.msra.mxu0 %v1191_v2  ;;  %v1196_v7 = vld [vmem:[%s1637_s1 + $0x88] sm:$0xff]   ;;  %v1200_v11 = vld [vmem:[%s1637_s1 + $0x90] sm:$0xff]  }
   0x5   :  { %1108 = vmatpush3.bf16.msra.mxu1 %v1192_v3  ;;  %1027 = vmatprep.subr.bf16.mxu0 %v1193_v4  ;;  %v1201_v12 = vld [vmem:[%s1637_s1 + $0x58] sm:$0xff]   ;;  %v1205_v16 = vld [vmem:[%s1637_s1 + $0x60] sm:$0xff]   ;;  %v1209_v20 = vld [vmem:[%s1637_s1 + $0x68] sm:$0xff]  }
   0x6   :  { %1109 = vmatprep.subr.bf16.mxu1 %v1194_v5  ;;  %v1202_v13 = vld [vmem:[%s1637_s1 + $0xd8] sm:$0xff]   ;;  %v1206_v17 = vld [vmem:[%s1637_s1 + $0xe0] sm:$0xff]   ;;  %v1210_v21 = vld [vmem:[%s1637_s1 + $0xe8] sm:$0xff]  }
   0x7   :  { %v1203_v14 = vld [vmem:[%s1637_s1 + $0x18] sm:$0xff]   ;;  %v1207_v18 = vld [vmem:[%s1637_s1 + $0x20] sm:$0xff]   ;;  %v1211_v22 = vld [vmem:[%s1637_s1 + $0x28] sm:$0xff]  }
   0x8   :  { %1028 = vmatpush3.bf16.msra.mxu0 %v1195_v6  ;;  %v1204_v15 = vld [vmem:[%s1637_s1 + $0x98] sm:$0xff]   ;;  %v1208_v19 = vld [vmem:[%s1637_s1 + $0xa0] sm:$0xff]   ;;  %v1212_v23 = vld [vmem:[%s1637_s1 + $0xa8] sm:$0xff]  }
   0x9   :  { %1110 = vmatpush3.bf16.msra.mxu1 %v1196_v7  ;;  %1029 = vmatprep.subr.bf16.mxu0 %v1197_v8  ;;  %v1213_v24 = vld [vmem:[%s1637_s1 + $0x70] sm:$0xff]   ;;  %v1217_v28 = vld [vmem:[%s1637_s1 + $0x78] sm:$0xff]   ;;  %v55_v6 = vld [vmem:[%s1638_s0 + $0x140] sm:$0xff] }
   0xa   :  { %1111 = vmatprep.subr.bf16.mxu1 %v1198_v9  ;;  %v1214_v25 = vld [vmem:[%s1637_s1 + $0xf0] sm:$0xff]   ;;  %v1218_v29 = vld [vmem:[%s1637_s1 + $0xf8] sm:$0xff]   ;;  %v56_v7 = vld [vmem:[%s1638_s0 + $0x148] sm:$0xff] }
   0xb   :  { %v1215_v26 = vld [vmem:[%s1637_s1 + $0x30] sm:$0xff]   ;;  %v1219_v30 = vld [vmem:[%s1637_s1 + $0x38] sm:$0xff]  }
   0xc   :  { %1030 = vmatpush3.bf16.msra.mxu0 %v1199_v10  ;;  %v1216_v27 = vld [vmem:[%s1637_s1 + $0xb0] sm:$0xff]   ;;  %v1220_v31 = vld [vmem:[%s1637_s1 + $0xb8] sm:$0xff]   ;;  %v948_v10 = vcombine.high %v55_v6, %v55_v6 }
   0xd   :  { %1112 = vmatpush3.bf16.msra.mxu1 %v1200_v11  ;;  %1031 = vmatprep.subr.bf16.mxu0 %v1201_v12  ;;  %v1221_v32 = vld [vmem:[%s1638_s0] ss:$16 sps:$4 sm:$0xff]   ;;  %v1223_v33 = vld [vmem:[%s1638_s0 + $0x4] ss:$16 sps:$4 sm:$0xff]   ;;  %v1224_v34 = vld [vmem:[%s1638_s0 + $0x8] ss:$16 sps:$4 sm:$0xff]   ;;  %v950_v11 = vcombine.high %v56_v7, %v56_v7  ;;  %v947_v12 = vcombine.low %v55_v6, %v55_v6 }
   0xe   :  { %1113 = vmatprep.subr.bf16.mxu1 %v1202_v13  ;;  %v1226_v35 = vld [vmem:[%s1638_s0 + $0xc] ss:$16 sps:$4 sm:$0xff]   ;;  %566 = vmatprep.mubr.bf16.mxu0 %v1223_v33  ;;  %v1227_v36 = vld [vmem:[%s1638_s0 + $0x24] ss:$16 sps:$4 sm:$0xff]   ;;  %v1231_v38 = vld [vmem:[%s1638_s0 + $0x20] ss:$16 sps:$4 sm:$0xff]   ;;  %v949_v13 = vcombine.low %v56_v7, %v56_v7 }
   0xf   :  { %686 = vmatprep.mubr.bf16.mxu1 %v1226_v35  ;;  %v1229_v37 = vld [vmem:[%s1638_s0 + $0x2c] ss:$16 sps:$4 sm:$0xff]   ;;  %v1232_v39 = vld [vmem:[%s1638_s0 + $0x28] ss:$16 sps:$4 sm:$0xff]   ;;  %v1233_v40 = vld [vmem:[%s1638_s0 + $0x44] ss:$16 sps:$4 sm:$0xff]  }
  0x10   :  { %1032 = vmatpush3.bf16.msra.mxu0 %v1203_v14  ;;  %v1235_v41 = vld [vmem:[%s1638_s0 + $0x4c] ss:$16 sps:$4 sm:$0xff]   ;;  %v1237_v42 = vld [vmem:[%s1638_s0 + $0x40] ss:$16 sps:$4 sm:$0xff]   ;;  %v1238_v43 = vld [vmem:[%s1638_s0 + $0x48] ss:$16 sps:$4 sm:$0xff]  }
  0x11   :  { %1114 = vmatpush3.bf16.msra.mxu1 %v1204_v15  ;;  %1033 = vmatprep.subr.bf16.mxu0 %v1205_v16  ;;  %v1239_v44 = vld [vmem:[%s1638_s0 + $0x64] ss:$16 sps:$4 sm:$0xff]   ;;  %v1241_v45 = vld [vmem:[%s1638_s0 + $0x6c] ss:$16 sps:$4 sm:$0xff]   ;;  %v1243_v46 = vld [vmem:[%s1638_s0 + $0x60] ss:$16 sps:$4 sm:$0xff]  }
  0x12   :  { %1115 = vmatprep.subr.bf16.mxu1 %v1206_v17  ;;  %v1244_v47 = vld [vmem:[%s1638_s0 + $0x68] ss:$16 sps:$4 sm:$0xff]   ;;  %v1245_v48 = vld [vmem:[%s1638_s0 + $0x84] ss:$16 sps:$4 sm:$0xff]   ;;  %v1247_v49 = vld [vmem:[%s1638_s0 + $0x8c] ss:$16 sps:$4 sm:$0xff]  }
  0x13   :  { %v1249_v50 = vld [vmem:[%s1638_s0 + $0x80] ss:$16 sps:$4 sm:$0xff]   ;;  %v1250_v51 = vld [vmem:[%s1638_s0 + $0x88] ss:$16 sps:$4 sm:$0xff]   ;;  %v1251_v52 = vld [vmem:[%s1638_s0 + $0xa4] ss:$16 sps:$4 sm:$0xff]  }
  0x14   :  { %1034 = vmatpush3.bf16.msra.mxu0 %v1207_v18  ;;  %v1253_v53 = vld [vmem:[%s1638_s0 + $0xac] ss:$16 sps:$4 sm:$0xff]   ;;  %v1255_v54 = vld [vmem:[%s1638_s0 + $0xa0] ss:$16 sps:$4 sm:$0xff]   ;;  %v1256_v55 = vld [vmem:[%s1638_s0 + $0xa8] ss:$16 sps:$4 sm:$0xff]  }
  0x15   :  { %1116 = vmatpush3.bf16.msra.mxu1 %v1208_v19  ;;  %1035 = vmatprep.subr.bf16.mxu0 %v1209_v20  ;;  %v1257_v56 = vld [vmem:[%s1638_s0 + $0xc4] ss:$16 sps:$4 sm:$0xff]   ;;  %v1259_v57 = vld [vmem:[%s1638_s0 + $0xcc] ss:$16 sps:$4 sm:$0xff]   ;;  %v1261_v58 = vld [vmem:[%s1638_s0 + $0xc0] ss:$16 sps:$4 sm:$0xff]  }
  0x16   :  { %1117 = vmatprep.subr.bf16.mxu1 %v1210_v21  ;;  %v1262_v59 = vld [vmem:[%s1638_s0 + $0xc8] ss:$16 sps:$4 sm:$0xff]   ;;  %v1263_v60 = vld [vmem:[%s1638_s0 + $0xe4] ss:$16 sps:$4 sm:$0xff]   ;;  %v1265_v61 = vld [vmem:[%s1638_s0 + $0xec] ss:$16 sps:$4 sm:$0xff]  }
  0x17   :  { %v1267_v62 = vld [vmem:[%s1638_s0 + $0xe0] ss:$16 sps:$4 sm:$0xff]   ;;  %v1268_v63 = vld [vmem:[%s1638_s0 + $0xe8] ss:$16 sps:$4 sm:$0xff]   ;;  %v1269_v0 = vld [vmem:[%s1638_s0 + $0x104] ss:$16 sps:$4 sm:$0xff]  }
  0x18   :  { %1036 = vmatpush3.bf16.msra.mxu0 %v1211_v22  ;;  %v1271_v1 = vld [vmem:[%s1638_s0 + $0x10c] ss:$16 sps:$4 sm:$0xff]   ;;  %v1273_v2 = vld [vmem:[%s1638_s0 + $0x100] ss:$16 sps:$4 sm:$0xff]   ;;  %v1274_v3 = vld [vmem:[%s1638_s0 + $0x108] ss:$16 sps:$4 sm:$0xff]  }
  0x19   :  { %1118 = vmatpush3.bf16.msra.mxu1 %v1212_v23  ;;  %1037 = vmatprep.subr.bf16.mxu0 %v1213_v24  ;;  %v1275_v4 = vld [vmem:[%s1638_s0 + $0x124] ss:$16 sps:$4 sm:$0xff]   ;;  %v1277_v5 = vld [vmem:[%s1638_s0 + $0x12c] ss:$16 sps:$4 sm:$0xff]   ;;  %v1279_v8 = vld [vmem:[%s1638_s0 + $0x120] ss:$16 sps:$4 sm:$0xff]  }
  0x1a   :  { %1119 = vmatprep.subr.bf16.mxu1 %v1214_v25  ;;  %v1280_v9 = vld [vmem:[%s1638_s0 + $0x128] ss:$16 sps:$4 sm:$0xff]   ;;  %v1530_v16 = vld [vmem:[%s1639_s2] ss:$0 sm:$0xff] }
  0x1c   :  { %1038 = vmatpush3.bf16.msra.mxu0 %v1215_v26 }
  0x1d   :  { %1120 = vmatpush3.bf16.msra.mxu1 %v1216_v27  ;;  %1039 = vmatprep.subr.bf16.mxu0 %v1217_v28 }
  0x1e   :  { %1121 = vmatprep.subr.bf16.mxu1 %v1218_v29 }
  0x20   :  { %1040 = vmatpush3.bf16.msra.mxu0 %v1219_v30 }
  0x21   :  { %1122 = vmatpush3.bf16.msra.mxu1 %v1220_v31 }
  0x23   :  { %567 = vmatmul.mubr.bf16.vlgmr.msra.gmra.mrb[0].mxu0 %v1221_v32 }
  0x24   :  { %687 = vmatmul.mubr.bf16.vlgmr.msra.gmra.mrb[0].mxu1 %v1224_v34  ;;  %574 = vmatprep.mubr.bf16.mxu0 %v1227_v36 }
  0x25   :  { %694 = vmatprep.mubr.bf16.mxu1 %v1229_v37 }
  0x2b   :  { %575 = vmatmul.mubr.bf16.gmra.mrb[4].mxu0 %v1231_v38 }
  0x2c   :  { %695 = vmatmul.mubr.bf16.gmra.mrb[4].mxu1 %v1232_v39  ;;  %582 = vmatprep.mubr.bf16.mxu0 %v1233_v40 }
  0x2d   :  { %702 = vmatprep.mubr.bf16.mxu1 %v1235_v41 }
  0x33   :  { %583 = vmatmul.mubr.bf16.gmra.mrb[8].mxu0 %v1237_v42 }
  0x34   :  { %703 = vmatmul.mubr.bf16.gmra.mrb[8].mxu1 %v1238_v43  ;;  %590 = vmatprep.mubr.bf16.mxu0 %v1239_v44 }
  0x35   :  { %710 = vmatprep.mubr.bf16.mxu1 %v1241_v45 }
  0x3b   :  { %591 = vmatmul.mubr.bf16.gmra.mrb[12].mxu0 %v1243_v46 }
  0x3c   :  { %711 = vmatmul.mubr.bf16.gmra.mrb[12].mxu1 %v1244_v47  ;;  %598 = vmatprep.mubr.bf16.mxu0 %v1245_v48 }
  0x3d   :  { %718 = vmatprep.mubr.bf16.mxu1 %v1247_v49 }
  0x43   :  { %599 = vmatmul.mubr.bf16.gmra.mrb[16].mxu0 %v1249_v50 }
  0x44   :  { %719 = vmatmul.mubr.bf16.gmra.mrb[16].mxu1 %v1250_v51  ;;  %606 = vmatprep.mubr.bf16.mxu0 %v1251_v52 }
  0x45   :  { %726 = vmatprep.mubr.bf16.mxu1 %v1253_v53 }
  0x4b   :  { %607 = vmatmul.mubr.bf16.gmra.mrb[20].mxu0 %v1255_v54 }
  0x4c   :  { %727 = vmatmul.mubr.bf16.gmra.mrb[20].mxu1 %v1256_v55  ;;  %614 = vmatprep.mubr.bf16.mxu0 %v1257_v56 }
  0x4d   :  { %734 = vmatprep.mubr.bf16.mxu1 %v1259_v57 }
  0x53   :  { %615 = vmatmul.mubr.bf16.gmra.mrb[24].mxu0 %v1261_v58 }
  0x54   :  { %735 = vmatmul.mubr.bf16.gmra.mrb[24].mxu1 %v1262_v59  ;;  %622 = vmatprep.mubr.bf16.mxu0 %v1263_v60 }
  0x55   :  { %742 = vmatprep.mubr.bf16.mxu1 %v1265_v61 }
  0x5b   :  { %623 = vmatmul.mubr.bf16.gmra.mrb[28].mxu0 %v1267_v62 }
  0x5c   :  { %743 = vmatmul.mubr.bf16.gmra.mrb[28].mxu1 %v1268_v63  ;;  %630 = vmatprep.mubr.bf16.mxu0 %v1269_v0 }
  0x5d   :  { %750 = vmatprep.mubr.bf16.mxu1 %v1271_v1 }
  0x63   :  { %631 = vmatmul.mubr.bf16.gmra.mrb[32].mxu0 %v1273_v2 }
  0x64   :  { %751 = vmatmul.mubr.bf16.gmra.mrb[32].mxu1 %v1274_v3  ;;  %638 = vmatprep.mubr.bf16.mxu0 %v1275_v4 }
  0x65   :  { %758 = vmatprep.mubr.bf16.mxu1 %v1277_v5 }
  0x6b   :  { %639 = vmatmul.mubr.bf16.gmra.mrb[36].mxu0 %v1279_v8 }
  0x6c   :  { %759 = vmatmul.mubr.bf16.gmra.mrb[36].mxu1 %v1280_v9  ;;  %646 = vmatprep.mubr.bf16.mxu0 %v948_v10 }
  0x6d   :  { %766 = vmatprep.mubr.bf16.mxu1 %v950_v11 }
  0x73   :  { %647 = vmatmul.mubr.bf16.gmra.mrb[40].mxu0 %v947_v12 }
  0x74   :  { %767 = vmatmul.mubr.bf16.gmra.mrb[40].mxu1 %v949_v13 }
  0xf6   :  { %v1041_v14 = vpop.f32.mrb[0].mxu0 }
  0xf7   :  { %v1123_v15 = vpop.f32.mrb[0].mxu1  ;;  %v1042_v17 = vpop.f32.mrb[1].mxu0 }
  0xf8   :  { %v1043_v18 = vadd.f32 %v1042_v17, %v1041_v14  ;;  %v1124_v19 = vpop.f32.mrb[1].mxu1  ;;  %v1044_v20 = vpop.f32.mrb[2].mxu0 }
  0xf9   :  { %v1125_v21 = vadd.f32 %v1124_v19, %v1123_v15  ;;  %v1126_v22 = vpop.f32.mrb[2].mxu1  ;;  %v1045_v23 = vpop.f32.mrb[3].mxu0 }
  0xfa   :  { %v569_v24 = vadd.f32 %v1043_v18, %v1530_v16  ;;  %v1046_v25 = vadd.f32 %v1045_v23, %v1044_v20  ;;  %v1127_v26 = vpop.f32.mrb[3].mxu1 }
  0xfb   :  { %v1128_v27 = vadd.f32 %v1127_v26, %v1126_v22 }
  0xfc   :  { %v689_v28 = vadd.f32 %v1125_v21, %v569_v24  ;;  %v572_v29 = vadd.f32 %v1046_v25, %v1530_v16 }
  0xfe   :  { %v774_v30 = vmax.f32 %v689_v28, 0.0  ;;  %v692_v31 = vadd.f32 %v1128_v27, %v572_v29  ;;  %v1047_v32 = vpop.f32.mrb[4].mxu0 }
  0xff   :  { %v1129_v33 = vpop.f32.mrb[4].mxu1  ;;  %v1048_v34 = vpop.f32.mrb[5].mxu0 }
 0x100   :  { %v1004_v35 = vpack.c.bf16 %v774_v30, %v774_v30  ;;  %v775_v36 = vmax.f32 %v692_v31, 0.0  ;;  %v1049_v37 = vadd.f32 %v1048_v34, %v1047_v32  ;;  %v1130_v38 = vpop.f32.mrb[5].mxu1  ;;  %v1050_v39 = vpop.f32.mrb[6].mxu0 }
 0x101   :  { %v1131_v40 = vadd.f32 %v1130_v38, %v1129_v33  ;;  %v1132_v41 = vpop.f32.mrb[6].mxu1  ;;  %v1051_v42 = vpop.f32.mrb[7].mxu0 }
 0x102   :  { %881 = vst.msk [vmem:[%s1640_s3] sm:$0xf] %vm880_vm0, %v1004_v35  ;;  %v1005_v43 = vpack.c.bf16 %v775_v36, %v775_v36  ;;  %v577_v44 = vadd.f32 %v1049_v37, %v1530_v16  ;;  %v1052_v45 = vadd.f32 %v1051_v42, %v1050_v39  ;;  %v1133_v46 = vpop.f32.mrb[7].mxu1 }
 0x103   :  { %v1134_v47 = vadd.f32 %v1133_v46, %v1132_v41 }
 0x104   :  { %882 = vst.msk [vmem:[%s1640_s3 + $0x4] sm:$0xf] %vm880_vm0, %v1005_v43  ;;  %v697_v48 = vadd.f32 %v1131_v40, %v577_v44  ;;  %v580_v49 = vadd.f32 %v1052_v45, %v1530_v16 }
 0x106   :  { %v776_v50 = vmax.f32 %v697_v48, 0.0  ;;  %v700_v51 = vadd.f32 %v1134_v47, %v580_v49  ;;  %v1053_v52 = vpop.f32.mrb[8].mxu0 }
 0x107   :  { %v1135_v53 = vpop.f32.mrb[8].mxu1  ;;  %v1054_v54 = vpop.f32.mrb[9].mxu0 }
 0x108   :  { %v1006_v55 = vpack.c.bf16 %v776_v50, %v776_v50  ;;  %v777_v56 = vmax.f32 %v700_v51, 0.0  ;;  %v1055_v57 = vadd.f32 %v1054_v54, %v1053_v52  ;;  %v1136_v58 = vpop.f32.mrb[9].mxu1  ;;  %v1056_v59 = vpop.f32.mrb[10].mxu0 }
 0x109   :  { %v1137_v60 = vadd.f32 %v1136_v58, %v1135_v53  ;;  %v1138_v61 = vpop.f32.mrb[10].mxu1  ;;  %v1057_v62 = vpop.f32.mrb[11].mxu0 }
 0x10a   :  { %883 = vst.msk [vmem:[%s1640_s3 + $0x8] sm:$0xf] %vm880_vm0, %v1006_v55  ;;  %v1007_v63 = vpack.c.bf16 %v777_v56, %v777_v56  ;;  %v585_v0 = vadd.f32 %v1055_v57, %v1530_v16  ;;  %v1058_v1 = vadd.f32 %v1057_v62, %v1056_v59  ;;  %v1139_v2 = vpop.f32.mrb[11].mxu1 }
 0x10b   :  { %v1140_v3 = vadd.f32 %v1139_v2, %v1138_v61 }
 0x10c   :  { %884 = vst.msk [vmem:[%s1640_s3 + $0xc] sm:$0xf] %vm880_vm0, %v1007_v63  ;;  %v705_v4 = vadd.f32 %v1137_v60, %v585_v0  ;;  %v588_v5 = vadd.f32 %v1058_v1, %v1530_v16 }
 0x10e   :  { %v778_v6 = vmax.f32 %v705_v4, 0.0  ;;  %v708_v7 = vadd.f32 %v1140_v3, %v588_v5  ;;  %v1059_v8 = vpop.f32.mrb[12].mxu0 }
 0x10f   :  { %v1141_v9 = vpop.f32.mrb[12].mxu1  ;;  %v1060_v10 = vpop.f32.mrb[13].mxu0 }
 0x110   :  { %v1008_v11 = vpack.c.bf16 %v778_v6, %v778_v6  ;;  %v779_v12 = vmax.f32 %v708_v7, 0.0  ;;  %v1061_v13 = vadd.f32 %v1060_v10, %v1059_v8  ;;  %v1142_v14 = vpop.f32.mrb[13].mxu1  ;;  %v1062_v15 = vpop.f32.mrb[14].mxu0 }
 0x111   :  { %v1143_v17 = vadd.f32 %v1142_v14, %v1141_v9  ;;  %v1144_v18 = vpop.f32.mrb[14].mxu1  ;;  %v1063_v19 = vpop.f32.mrb[15].mxu0 }
 0x112   :  { %885 = vst.msk [vmem:[%s1640_s3 + $0x10] sm:$0xf] %vm880_vm0, %v1008_v11  ;;  %v1009_v20 = vpack.c.bf16 %v779_v12, %v779_v12  ;;  %v593_v21 = vadd.f32 %v1061_v13, %v1530_v16  ;;  %v1064_v22 = vadd.f32 %v1063_v19, %v1062_v15  ;;  %v1145_v23 = vpop.f32.mrb[15].mxu1 }
 0x113   :  { %v1146_v24 = vadd.f32 %v1145_v23, %v1144_v18 }
 0x114   :  { %886 = vst.msk [vmem:[%s1640_s3 + $0x14] sm:$0xf] %vm880_vm0, %v1009_v20  ;;  %v713_v25 = vadd.f32 %v1143_v17, %v593_v21  ;;  %v596_v26 = vadd.f32 %v1064_v22, %v1530_v16 }
 0x116   :  { %v780_v27 = vmax.f32 %v713_v25, 0.0  ;;  %v716_v28 = vadd.f32 %v1146_v24, %v596_v26  ;;  %v1065_v29 = vpop.f32.mrb[16].mxu0 }
 0x117   :  { %v1147_v30 = vpop.f32.mrb[16].mxu1  ;;  %v1066_v31 = vpop.f32.mrb[17].mxu0 }
 0x118   :  { %v1010_v32 = vpack.c.bf16 %v780_v27, %v780_v27  ;;  %v781_v33 = vmax.f32 %v716_v28, 0.0  ;;  %v1067_v34 = vadd.f32 %v1066_v31, %v1065_v29  ;;  %v1148_v35 = vpop.f32.mrb[17].mxu1  ;;  %v1068_v36 = vpop.f32.mrb[18].mxu0 }
 0x119   :  { %v1149_v37 = vadd.f32 %v1148_v35, %v1147_v30  ;;  %v1150_v38 = vpop.f32.mrb[18].mxu1  ;;  %v1069_v39 = vpop.f32.mrb[19].mxu0 }
 0x11a   :  { %887 = vst.msk [vmem:[%s1640_s3 + $0x18] sm:$0xf] %vm880_vm0, %v1010_v32  ;;  %v1011_v40 = vpack.c.bf16 %v781_v33, %v781_v33  ;;  %v601_v41 = vadd.f32 %v1067_v34, %v1530_v16  ;;  %v1070_v42 = vadd.f32 %v1069_v39, %v1068_v36  ;;  %v1151_v43 = vpop.f32.mrb[19].mxu1 }
 0x11b   :  { %v1152_v44 = vadd.f32 %v1151_v43, %v1150_v38 }
 0x11c   :  { %888 = vst.msk [vmem:[%s1640_s3 + $0x1c] sm:$0xf] %vm880_vm0, %v1011_v40  ;;  %v721_v45 = vadd.f32 %v1149_v37, %v601_v41  ;;  %v604_v46 = vadd.f32 %v1070_v42, %v1530_v16 }
 0x11e   :  { %v782_v47 = vmax.f32 %v721_v45, 0.0  ;;  %v724_v48 = vadd.f32 %v1152_v44, %v604_v46  ;;  %v1071_v49 = vpop.f32.mrb[20].mxu0 }
 0x11f   :  { %v1153_v50 = vpop.f32.mrb[20].mxu1  ;;  %v1072_v51 = vpop.f32.mrb[21].mxu0 }
 0x120   :  { %v1012_v52 = vpack.c.bf16 %v782_v47, %v782_v47  ;;  %v783_v53 = vmax.f32 %v724_v48, 0.0  ;;  %v1073_v54 = vadd.f32 %v1072_v51, %v1071_v49  ;;  %v1154_v55 = vpop.f32.mrb[21].mxu1  ;;  %v1074_v56 = vpop.f32.mrb[22].mxu0 }
 0x121   :  { %v1155_v57 = vadd.f32 %v1154_v55, %v1153_v50  ;;  %v1156_v58 = vpop.f32.mrb[22].mxu1  ;;  %v1075_v59 = vpop.f32.mrb[23].mxu0 }
 0x122   :  { %889 = vst.msk [vmem:[%s1640_s3 + $0x20] sm:$0xf] %vm880_vm0, %v1012_v52  ;;  %v1013_v60 = vpack.c.bf16 %v783_v53, %v783_v53  ;;  %v609_v61 = vadd.f32 %v1073_v54, %v1530_v16  ;;  %v1076_v62 = vadd.f32 %v1075_v59, %v1074_v56  ;;  %v1157_v63 = vpop.f32.mrb[23].mxu1 }
 0x123   :  { %v1158_v0 = vadd.f32 %v1157_v63, %v1156_v58 }
 0x124   :  { %890 = vst.msk [vmem:[%s1640_s3 + $0x24] sm:$0xf] %vm880_vm0, %v1013_v60  ;;  %v729_v1 = vadd.f32 %v1155_v57, %v609_v61  ;;  %v612_v2 = vadd.f32 %v1076_v62, %v1530_v16 }
 0x126   :  { %v784_v3 = vmax.f32 %v729_v1, 0.0  ;;  %v732_v4 = vadd.f32 %v1158_v0, %v612_v2  ;;  %v1077_v5 = vpop.f32.mrb[24].mxu0 }
 0x127   :  { %v1159_v6 = vpop.f32.mrb[24].mxu1  ;;  %v1078_v7 = vpop.f32.mrb[25].mxu0 }
 0x128   :  { %v1014_v8 = vpack.c.bf16 %v784_v3, %v784_v3  ;;  %v785_v9 = vmax.f32 %v732_v4, 0.0  ;;  %v1079_v10 = vadd.f32 %v1078_v7, %v1077_v5  ;;  %v1160_v11 = vpop.f32.mrb[25].mxu1  ;;  %v1080_v12 = vpop.f32.mrb[26].mxu0 }
 0x129   :  { %v1161_v13 = vadd.f32 %v1160_v11, %v1159_v6  ;;  %v1162_v14 = vpop.f32.mrb[26].mxu1  ;;  %v1081_v15 = vpop.f32.mrb[27].mxu0 }
 0x12a   :  { %891 = vst.msk [vmem:[%s1640_s3 + $0x28] sm:$0xf] %vm880_vm0, %v1014_v8  ;;  %v1015_v17 = vpack.c.bf16 %v785_v9, %v785_v9  ;;  %v617_v18 = vadd.f32 %v1079_v10, %v1530_v16  ;;  %v1082_v19 = vadd.f32 %v1081_v15, %v1080_v12  ;;  %v1163_v20 = vpop.f32.mrb[27].mxu1 }
 0x12b   :  { %v1164_v21 = vadd.f32 %v1163_v20, %v1162_v14 }
 0x12c   :  { %892 = vst.msk [vmem:[%s1640_s3 + $0x2c] sm:$0xf] %vm880_vm0, %v1015_v17  ;;  %v737_v22 = vadd.f32 %v1161_v13, %v617_v18  ;;  %v620_v23 = vadd.f32 %v1082_v19, %v1530_v16 }
 0x12e   :  { %v786_v24 = vmax.f32 %v737_v22, 0.0  ;;  %v740_v25 = vadd.f32 %v1164_v21, %v620_v23  ;;  %v1083_v26 = vpop.f32.mrb[28].mxu0 }
 0x12f   :  { %v1165_v27 = vpop.f32.mrb[28].mxu1  ;;  %v1084_v28 = vpop.f32.mrb[29].mxu0 }
 0x130   :  { %v1016_v29 = vpack.c.bf16 %v786_v24, %v786_v24  ;;  %v787_v30 = vmax.f32 %v740_v25, 0.0  ;;  %v1085_v31 = vadd.f32 %v1084_v28, %v1083_v26  ;;  %v1166_v32 = vpop.f32.mrb[29].mxu1  ;;  %v1086_v33 = vpop.f32.mrb[30].mxu0 }
 0x131   :  { %v1167_v34 = vadd.f32 %v1166_v32, %v1165_v27  ;;  %v1168_v35 = vpop.f32.mrb[30].mxu1  ;;  %v1087_v36 = vpop.f32.mrb[31].mxu0 }
 0x132   :  { %893 = vst.msk [vmem:[%s1640_s3 + $0x30] sm:$0xf] %vm880_vm0, %v1016_v29  ;;  %v1017_v37 = vpack.c.bf16 %v787_v30, %v787_v30  ;;  %v625_v38 = vadd.f32 %v1085_v31, %v1530_v16  ;;  %v1088_v39 = vadd.f32 %v1087_v36, %v1086_v33  ;;  %v1169_v40 = vpop.f32.mrb[31].mxu1 }
 0x133   :  { %v1170_v41 = vadd.f32 %v1169_v40, %v1168_v35 }
 0x134   :  { %894 = vst.msk [vmem:[%s1640_s3 + $0x34] sm:$0xf] %vm880_vm0, %v1017_v37  ;;  %v745_v42 = vadd.f32 %v1167_v34, %v625_v38  ;;  %v628_v43 = vadd.f32 %v1088_v39, %v1530_v16 }
 0x136   :  { %v788_v44 = vmax.f32 %v745_v42, 0.0  ;;  %v748_v45 = vadd.f32 %v1170_v41, %v628_v43  ;;  %v1089_v46 = vpop.f32.mrb[32].mxu0 }
 0x137   :  { %v1171_v47 = vpop.f32.mrb[32].mxu1  ;;  %v1090_v48 = vpop.f32.mrb[33].mxu0 }
 0x138   :  { %v1018_v49 = vpack.c.bf16 %v788_v44, %v788_v44  ;;  %v789_v50 = vmax.f32 %v748_v45, 0.0  ;;  %v1091_v51 = vadd.f32 %v1090_v48, %v1089_v46  ;;  %v1172_v52 = vpop.f32.mrb[33].mxu1  ;;  %v1092_v53 = vpop.f32.mrb[34].mxu0 }
 0x139   :  { %v1173_v54 = vadd.f32 %v1172_v52, %v1171_v47  ;;  %v1174_v55 = vpop.f32.mrb[34].mxu1  ;;  %v1093_v56 = vpop.f32.mrb[35].mxu0 }
 0x13a   :  { %895 = vst.msk [vmem:[%s1640_s3 + $0x38] sm:$0xf] %vm880_vm0, %v1018_v49  ;;  %v1019_v57 = vpack.c.bf16 %v789_v50, %v789_v50  ;;  %v633_v58 = vadd.f32 %v1091_v51, %v1530_v16  ;;  %v1094_v59 = vadd.f32 %v1093_v56, %v1092_v53  ;;  %v1175_v60 = vpop.f32.mrb[35].mxu1 }
 0x13b   :  { %v1176_v61 = vadd.f32 %v1175_v60, %v1174_v55 }
 0x13c   :  { %896 = vst.msk [vmem:[%s1640_s3 + $0x3c] sm:$0xf] %vm880_vm0, %v1019_v57  ;;  %v753_v62 = vadd.f32 %v1173_v54, %v633_v58  ;;  %v636_v63 = vadd.f32 %v1094_v59, %v1530_v16 }
 0x13e   :  { %v790_v0 = vmax.f32 %v753_v62, 0.0  ;;  %v756_v1 = vadd.f32 %v1176_v61, %v636_v63  ;;  %v1095_v2 = vpop.f32.mrb[36].mxu0 }
 0x13f   :  { %v1177_v3 = vpop.f32.mrb[36].mxu1  ;;  %v1096_v4 = vpop.f32.mrb[37].mxu0 }
 0x140   :  { %v1020_v5 = vpack.c.bf16 %v790_v0, %v790_v0  ;;  %v791_v6 = vmax.f32 %v756_v1, 0.0  ;;  %v1097_v7 = vadd.f32 %v1096_v4, %v1095_v2  ;;  %v1178_v8 = vpop.f32.mrb[37].mxu1  ;;  %v1098_v9 = vpop.f32.mrb[38].mxu0 }
 0x141   :  { %v1179_v10 = vadd.f32 %v1178_v8, %v1177_v3  ;;  %v1180_v11 = vpop.f32.mrb[38].mxu1  ;;  %v1099_v12 = vpop.f32.mrb[39].mxu0 }
 0x142   :  { %897 = vst.msk [vmem:[%s1640_s3 + $0x40] sm:$0xf] %vm880_vm0, %v1020_v5  ;;  %v1021_v13 = vpack.c.bf16 %v791_v6, %v791_v6  ;;  %v641_v14 = vadd.f32 %v1097_v7, %v1530_v16  ;;  %v1100_v15 = vadd.f32 %v1099_v12, %v1098_v9  ;;  %v1181_v17 = vpop.f32.mrb[39].mxu1 }
 0x143   :  { %v1182_v18 = vadd.f32 %v1181_v17, %v1180_v11 }
 0x144   :  { %898 = vst.msk [vmem:[%s1640_s3 + $0x44] sm:$0xf] %vm880_vm0, %v1021_v13  ;;  %v761_v19 = vadd.f32 %v1179_v10, %v641_v14  ;;  %v644_v20 = vadd.f32 %v1100_v15, %v1530_v16 }
 0x146   :  { %v792_v21 = vmax.f32 %v761_v19, 0.0  ;;  %v764_v22 = vadd.f32 %v1182_v18, %v644_v20  ;;  %v1101_v23 = vpop.f32.mrb[40].mxu0 }
 0x147   :  { %v1183_v24 = vpop.f32.mrb[40].mxu1  ;;  %v1102_v25 = vpop.f32.mrb[41].mxu0 }
 0x148   :  { %v1022_v26 = vpack.c.bf16 %v792_v21, %v792_v21  ;;  %v793_v27 = vmax.f32 %v764_v22, 0.0  ;;  %v1103_v28 = vadd.f32 %v1102_v25, %v1101_v23  ;;  %v1184_v29 = vpop.f32.mrb[41].mxu1  ;;  %v1104_v30 = vpop.f32.mrb[42].mxu0 }
 0x149   :  { %v1185_v31 = vadd.f32 %v1184_v29, %v1183_v24  ;;  %v1186_v32 = vpop.f32.mrb[42].mxu1  ;;  %v1105_v33 = vpop.f32.mrb[43].mxu0 }
 0x14a   :  { %899 = vst.msk [vmem:[%s1640_s3 + $0x48] sm:$0xf] %vm880_vm0, %v1022_v26  ;;  %v1023_v34 = vpack.c.bf16 %v793_v27, %v793_v27  ;;  %v649_v35 = vadd.f32 %v1103_v28, %v1530_v16  ;;  %v1187_v36 = vpop.f32.mrb[43].mxu1 }
 0x14c   :  { %900 = vst.msk [vmem:[%s1640_s3 + $0x4c] sm:$0xf] %vm880_vm0, %v1023_v34  ;;  %v769_v37 = vadd.f32 %v1185_v31, %v649_v35 }
 0x14e   :  { %v794_v38 = vmax.f32 %v769_v37, 0.0 }
 0x150   :  { %v1024_v39 = vpack.c.bf16 %v794_v38, %v794_v38 }
 0x152   :  { %901 = vst.msk [vmem:[%s1640_s3 + $0x50] sm:$0xf] %vm880_vm0, %v1024_v39 }

// kernel: cnn_policy_forward.6
= control target key start
LH: loop header
LB: loop body
LE: loop exit
PB: predicated region body
PF: predicated region fallthrough
CT: control target
= control target key end

     0   :  { %v1247_v34 = vmov 0.0   ;;  %vm1248_vm0 = vmmov 0   ;;  %vm516_vm1 = vcmask 523264   ;;  %vm868_vm2 = vcmask 519168   ;;  %s1599_s1 = inlined_call_operand.vmem [shape: bf16[576,64], index: 1, kind: input, shape index: {}]   ;;  %s1600_s0 = inlined_call_operand.vmem [shape: bf16[104,576], index: 0, kind: input, shape index: {}]   ;;  %s1601_s2 = inlined_call_operand.vmem [shape: f32[1,64], index: 2, kind: input, shape index: {}]   ;;  %s1602_s3 = inlined_call_operand.vmem [shape: bf16[104,64], index: 3, kind: output, shape index: {}]  }
   0x1   :  { %v1164_v0 = vld [vmem:[%s1599_s1 + $0x40] sm:$0xff]   ;;  %v1168_v4 = vld [vmem:[%s1599_s1 + $0x48] sm:$0xff]   ;;  %v1172_v8 = vld [vmem:[%s1599_s1 + $0x50] sm:$0xff]  }
   0x2   :  { %v1165_v1 = vld [vmem:[%s1599_s1 + $0xc0] sm:$0xff]   ;;  %991 = vmatprep.subr.bf16.mxu0 %v1164_v0  ;;  %v1169_v5 = vld [vmem:[%s1599_s1 + $0xc8] sm:$0xff]   ;;  %v1173_v9 = vld [vmem:[%s1599_s1 + $0xd0] sm:$0xff]  }
   0x3   :  { %v1166_v2 = vld [vmem:[%s1599_s1] sm:$0xff]   ;;  %1049 = vmatprep.subr.bf16.mxu1 %v1165_v1  ;;  %v1170_v6 = vld [vmem:[%s1599_s1 + $0x8] sm:$0xff]   ;;  %v1174_v10 = vld [vmem:[%s1599_s1 + $0x10] sm:$0xff]  }
   0x4   :  { %v1167_v3 = vld [vmem:[%s1599_s1 + $0x80] sm:$0xff]   ;;  %992 = vmatpush3.bf16.msra.mxu0 %v1166_v2  ;;  %v1171_v7 = vld [vmem:[%s1599_s1 + $0x88] sm:$0xff]   ;;  %v1175_v11 = vld [vmem:[%s1599_s1 + $0x90] sm:$0xff]  }
   0x5   :  { %1050 = vmatpush3.bf16.msra.mxu1 %v1167_v3  ;;  %993 = vmatprep.subr.bf16.mxu0 %v1168_v4  ;;  %v1176_v12 = vld [vmem:[%s1599_s1 + $0x58] sm:$0xff]   ;;  %v1180_v16 = vld [vmem:[%s1599_s1 + $0x60] sm:$0xff]   ;;  %v1184_v20 = vld [vmem:[%s1599_s1 + $0x68] sm:$0xff]  }
   0x6   :  { %1051 = vmatprep.subr.bf16.mxu1 %v1169_v5  ;;  %v1177_v13 = vld [vmem:[%s1599_s1 + $0xd8] sm:$0xff]   ;;  %v1181_v17 = vld [vmem:[%s1599_s1 + $0xe0] sm:$0xff]   ;;  %v1185_v21 = vld [vmem:[%s1599_s1 + $0xe8] sm:$0xff]  }
   0x7   :  { %v1178_v14 = vld [vmem:[%s1599_s1 + $0x18] sm:$0xff]   ;;  %v1182_v18 = vld [vmem:[%s1599_s1 + $0x20] sm:$0xff]   ;;  %v1186_v22 = vld [vmem:[%s1599_s1 + $0x28] sm:$0xff]  }
   0x8   :  { %994 = vmatpush3.bf16.msra.mxu0 %v1170_v6  ;;  %v1179_v15 = vld [vmem:[%s1599_s1 + $0x98] sm:$0xff]   ;;  %v1183_v19 = vld [vmem:[%s1599_s1 + $0xa0] sm:$0xff]   ;;  %v1187_v23 = vld [vmem:[%s1599_s1 + $0xa8] sm:$0xff]  }
   0x9   :  { %1052 = vmatpush3.bf16.msra.mxu1 %v1171_v7  ;;  %995 = vmatprep.subr.bf16.mxu0 %v1172_v8  ;;  %v1188_v24 = vld [vmem:[%s1599_s1 + $0x70] sm:$0xff]   ;;  %v1192_v28 = vld [vmem:[%s1599_s1 + $0x78] sm:$0xff]   ;;  %v1201_v36 = vld [vmem:[%s1600_s0 + $0xc] ss:$20 sps:$4 sm:$0xff]  }
   0xa   :  { %1053 = vmatprep.subr.bf16.mxu1 %v1173_v9  ;;  %v1189_v25 = vld [vmem:[%s1599_s1 + $0xf0] sm:$0xff]   ;;  %v1193_v29 = vld [vmem:[%s1599_s1 + $0xf8] sm:$0xff]   ;;  %v1202_v37 = vld [vmem:[%s1599_s1 + $0x100] sm:$0xff]   ;;  %658 = vmatprep.mubr.bf16.mxu1 %v1201_v36 }
   0xb   :  { %v1190_v26 = vld [vmem:[%s1599_s1 + $0x30] sm:$0xff]   ;;  %v1194_v30 = vld [vmem:[%s1599_s1 + $0x38] sm:$0xff]   ;;  %v1203_v38 = vld [vmem:[%s1600_s0 + $0x2c] ss:$20 sps:$4 sm:$0xff]  }
   0xc   :  { %996 = vmatpush3.bf16.msra.mxu0 %v1174_v10  ;;  %v1191_v27 = vld [vmem:[%s1599_s1 + $0xb0] sm:$0xff]   ;;  %v1195_v31 = vld [vmem:[%s1599_s1 + $0xb8] sm:$0xff]   ;;  %v1213_v43 = vld [vmem:[%s1599_s1 + $0x108] sm:$0xff]  }
   0xd   :  { %1054 = vmatpush3.bf16.msra.mxu1 %v1175_v11  ;;  %997 = vmatprep.subr.bf16.mxu0 %v1176_v12  ;;  %v1196_v32 = vld [vmem:[%s1600_s0] ss:$20 sps:$4 sm:$0xff]   ;;  %v1198_v33 = vld [vmem:[%s1600_s0 + $0x4] ss:$20 sps:$4 sm:$0xff]   ;;  %v1199_v35 = vld [vmem:[%s1600_s0 + $0x8] ss:$20 sps:$4 sm:$0xff]  }
   0xe   :  { %1055 = vmatprep.subr.bf16.mxu1 %v1177_v13  ;;  %570 = vmatprep.mubr.bf16.mxu0 %v1198_v33  ;;  %v1205_v39 = vld [vmem:[%s1600_s0 + $0x34] ss:$20 sps:$4 sm:$0xff]   ;;  %v1208_v41 = vld [vmem:[%s1600_s0 + $0x30] ss:$20 sps:$4 sm:$0xff]   ;;  %v1215_v47 = vld [vmem:[%s1600_s0 + $0x58] ss:$20 sps:$4 sm:$0xff]  }
   0xf   :  { %v1207_v40 = vld [vmem:[%s1600_s0 + $0x28] ss:$20 sps:$4 sm:$0xff]   ;;  %v1222_v45 = vld [vmem:[%s1599_s1 + $0x110] sm:$0xff]   ;;  %v1218_v49 = vld [vmem:[%s1600_s0 + $0x84] ss:$20 sps:$4 sm:$0xff]  }
  0x10   :  { %998 = vmatpush3.bf16.msra.mxu0 %v1178_v14  ;;  %v1209_v42 = vld [vmem:[%s1600_s0 + $0x54] ss:$20 sps:$4 sm:$0xff]   ;;  %v1211_v44 = vld [vmem:[%s1600_s0 + $0x5c] ss:$20 sps:$4 sm:$0xff]   ;;  %v1220_v51 = vld [vmem:[%s1600_s0 + $0x78] ss:$20 sps:$4 sm:$0xff]  }
  0x11   :  { %1056 = vmatpush3.bf16.msra.mxu1 %v1179_v15  ;;  %999 = vmatprep.subr.bf16.mxu0 %v1180_v16  ;;  %v1214_v46 = vld [vmem:[%s1600_s0 + $0x50] ss:$20 sps:$4 sm:$0xff]   ;;  %v1235_v50 = vld [vmem:[%s1599_s1 + $0x118] sm:$0xff]   ;;  %v1221_v52 = vld [vmem:[%s1600_s0 + $0x80] ss:$20 sps:$4 sm:$0xff]  }
  0x12   :  { %1057 = vmatprep.subr.bf16.mxu1 %v1181_v17  ;;  %v1216_v48 = vld [vmem:[%s1600_s0 + $0x7c] ss:$20 sps:$4 sm:$0xff]   ;;  %v1223_v53 = vld [vmem:[%s1600_s0 + $0xa4] ss:$20 sps:$4 sm:$0xff]   ;;  %v1225_v54 = vld [vmem:[%s1600_s0 + $0xac] ss:$20 sps:$4 sm:$0xff]  }
  0x13   :  { %v1227_v55 = vld [vmem:[%s1600_s0 + $0xa0] ss:$20 sps:$4 sm:$0xff]   ;;  %v1228_v56 = vld [vmem:[%s1600_s0 + $0xa8] ss:$20 sps:$4 sm:$0xff]   ;;  %v1234_v62 = vld [vmem:[%s1600_s0 + $0xd0] ss:$20 sps:$4 sm:$0xff]  }
  0x14   :  { %1000 = vmatpush3.bf16.msra.mxu0 %v1182_v18  ;;  %v1229_v57 = vld [vmem:[%s1600_s0 + $0xcc] ss:$20 sps:$4 sm:$0xff]   ;;  %v1231_v58 = vld [vmem:[%s1600_s0 + $0xd4] ss:$20 sps:$4 sm:$0xff]   ;;  %v52_v60 = vld [vmem:[%s1600_s0 + $0xf8] sm:$0xff] }
  0x15   :  { %1058 = vmatpush3.bf16.msra.mxu1 %v1183_v19  ;;  %1001 = vmatprep.subr.bf16.mxu0 %v1184_v20  ;;  %v51_v59 = vld [vmem:[%s1600_s0 + $0xf0] sm:$0xff]  ;;  %v1233_v61 = vld [vmem:[%s1600_s0 + $0xc8] ss:$20 sps:$4 sm:$0xff]   ;;  %v920_v0 = vcombine.high %v52_v60, %v52_v60  ;;  %v919_v2 = vcombine.low %v52_v60, %v52_v60  ;;  %v1242_v5 = vld [vmem:[%s1600_s0 + $0x38] ss:$20 sps:$4 sm:$0xff]  }
  0x16   :  { %1059 = vmatprep.subr.bf16.mxu1 %v1185_v21  ;;  %v918_v63 = vcombine.high %v51_v59, %v51_v59  ;;  %v917_v1 = vcombine.low %v51_v59, %v51_v59  ;;  %v1240_v3 = vld [vmem:[%s1600_s0 + $0x10] ss:$20 sps:$4 sm:$0xff]   ;;  %v1243_v6 = vld [vmem:[%s1600_s0 + $0xd8] ss:$20 sps:$4 sm:$0xff]   ;;  %v1244_v7 = vld [vmem:[%s1600_s0 + $0x60] ss:$20 sps:$4 sm:$0xff]  }
  0x17   :  { %v1241_v4 = vld [vmem:[%s1600_s0 + $0xb0] ss:$20 sps:$4 sm:$0xff]   ;;  %v1245_v8 = vld [vmem:[%s1600_s0 + $0x100] ss:$0 sps:$4 sm:$0xff]   ;;  %v1246_v9 = vld [vmem:[%s1600_s0 + $0x88] ss:$20 sps:$4 sm:$0xff]  }
  0x18   :  { %1002 = vmatpush3.bf16.msra.mxu0 %v1186_v22  ;;  %v1508_v11 = vld [vmem:[%s1601_s2] ss:$0 sm:$0xff] }
  0x19   :  { %1060 = vmatpush3.bf16.msra.mxu1 %v1187_v23  ;;  %1003 = vmatprep.subr.bf16.mxu0 %v1188_v24 }
  0x1a   :  { %1061 = vmatprep.subr.bf16.mxu1 %v1189_v25 }
  0x1c   :  { %1004 = vmatpush3.bf16.msra.mxu0 %v1190_v26 }
  0x1d   :  { %1062 = vmatpush3.bf16.msra.mxu1 %v1191_v27  ;;  %1005 = vmatprep.subr.bf16.mxu0 %v1192_v28 }
  0x1e   :  { %1063 = vmatprep.subr.bf16.mxu1 %v1193_v29 }
  0x20   :  { %1006 = vmatpush3.bf16.msra.mxu0 %v1194_v30 }
  0x21   :  { %1064 = vmatpush3.bf16.msra.mxu1 %v1195_v31  ;;  %1118 = vmatprep.subr.bf16.mxu0 %v1247_v34 }
  0x22   :  { %1154 = vmatprep.subr.bf16.mxu1 %v1247_v34 }
  0x23   :  { %571 = vmatmul.mubr.bf16.vlgmr.msra.gmra.mrb[0].mxu0 %v1196_v32 }
  0x24   :  { %659 = vmatmul.mubr.bf16.vlgmr.msra.gmra.mrb[0].mxu1 %v1199_v35  ;;  %1119 = vmatpush3.bf16.msra.mxu0 %v1202_v37 }
  0x25   :  { %578 = vmatprep.mubr.bf16.mxu0 %v1203_v38  ;;  %1158 = vmatpush3.bf16.msra.mxu1 %v1202_v37 }
  0x26   :  { %666 = vmatprep.mubr.bf16.mxu1 %v1205_v39  ;;  %1120 = vmatprep.subr.bf16.mxu0 %v1247_v34 }
  0x27   :  { %1155 = vmatprep.subr.bf16.mxu1 %v1247_v34 }
  0x28   :  { %1121 = vmatpush3.bf16.msra.mxu0 %v1213_v43 }
  0x29   :  { %1159 = vmatpush3.bf16.msra.mxu1 %v1213_v43  ;;  %1122 = vmatprep.subr.bf16.mxu0 %v1247_v34 }
  0x2a   :  { %1156 = vmatprep.subr.bf16.mxu1 %v1247_v34 }
  0x2b   :  { %579 = vmatmul.mubr.bf16.gmra.mrb[4].mxu0 %v1207_v40 }
  0x2c   :  { %667 = vmatmul.mubr.bf16.gmra.mrb[4].mxu1 %v1208_v41  ;;  %586 = vmatprep.mubr.bf16.mxu0 %v1209_v42 }
  0x2d   :  { %674 = vmatprep.mubr.bf16.mxu1 %v1211_v44  ;;  %1123 = vmatpush3.bf16.msra.mxu0 %v1222_v45 }
  0x2e   :  { %1160 = vmatpush3.bf16.msra.mxu1 %v1222_v45  ;;  %1124 = vmatprep.subr.bf16.mxu0 %v1247_v34 }
  0x2f   :  { %1157 = vmatprep.subr.bf16.mxu1 %v1247_v34 }
  0x31   :  { %1125 = vmatpush3.bf16.msra.mxu0 %v1235_v50 }
  0x32   :  { %1161 = vmatpush3.bf16.msra.mxu1 %v1235_v50 }
  0x33   :  { %587 = vmatmul.mubr.bf16.gmra.mrb[8].mxu0 %v1214_v46 }
  0x34   :  { %675 = vmatmul.mubr.bf16.gmra.mrb[8].mxu1 %v1215_v47  ;;  %594 = vmatprep.mubr.bf16.mxu0 %v1216_v48 }
  0x35   :  { %682 = vmatprep.mubr.bf16.mxu1 %v1218_v49 }
  0x3b   :  { %595 = vmatmul.mubr.bf16.gmra.mrb[12].mxu0 %v1220_v51 }
  0x3c   :  { %683 = vmatmul.mubr.bf16.gmra.mrb[12].mxu1 %v1221_v52  ;;  %602 = vmatprep.mubr.bf16.mxu0 %v1223_v53 }
  0x3d   :  { %690 = vmatprep.mubr.bf16.mxu1 %v1225_v54 }
  0x43   :  { %603 = vmatmul.mubr.bf16.gmra.mrb[16].mxu0 %v1227_v55 }
  0x44   :  { %691 = vmatmul.mubr.bf16.gmra.mrb[16].mxu1 %v1228_v56  ;;  %610 = vmatprep.mubr.bf16.mxu0 %v1229_v57 }
  0x45   :  { %698 = vmatprep.mubr.bf16.mxu1 %v1231_v58 }
  0x4b   :  { %611 = vmatmul.mubr.bf16.gmra.mrb[20].mxu0 %v1233_v61 }
  0x4c   :  { %699 = vmatmul.mubr.bf16.gmra.mrb[20].mxu1 %v1234_v62  ;;  %618 = vmatprep.mubr.bf16.mxu0 %v918_v63 }
  0x4d   :  { %706 = vmatprep.mubr.bf16.mxu1 %v920_v0 }
  0x53   :  { %619 = vmatmul.mubr.bf16.gmra.mrb[24].mxu0 %v917_v1 }
  0x54   :  { %707 = vmatmul.mubr.bf16.gmra.mrb[24].mxu1 %v919_v2  ;;  %1126 = vmatprep.mubr.msk.bf16.mxu0 %vm1248_vm0, %v1247_v34 }
  0x55   :  { %1142 = vmatprep.mubr.msk.bf16.mxu1 %vm1248_vm0, %v1247_v34 }
  0x5b   :  { %1127 = vmatmul.mubr.msk.bf16.vlgmr.msra.gmra.mrb[28].mxu0 %vm516_vm1, %v1240_v3 }
  0x5c   :  { %1143 = vmatmul.mubr.msk.bf16.vlgmr.msra.gmra.mrb[28].mxu1 %vm516_vm1, %v1241_v4  ;;  %1130 = vmatprep.mubr.msk.bf16.mxu0 %vm1248_vm0, %v1247_v34 }
  0x5d   :  { %1146 = vmatprep.mubr.msk.bf16.mxu1 %vm1248_vm0, %v1247_v34 }
  0x63   :  { %1131 = vmatmul.mubr.msk.bf16.gmra.mrb[32].mxu0 %vm516_vm1, %v1242_v5 }
  0x64   :  { %1147 = vmatmul.mubr.msk.bf16.gmra.mrb[32].mxu1 %vm516_vm1, %v1243_v6  ;;  %1134 = vmatprep.mubr.msk.bf16.mxu0 %vm1248_vm0, %v1247_v34 }
  0x65   :  { %1150 = vmatprep.mubr.msk.bf16.mxu1 %vm1248_vm0, %v1247_v34 }
  0x6b   :  { %1135 = vmatmul.mubr.msk.bf16.gmra.mrb[36].mxu0 %vm516_vm1, %v1244_v7 }
  0x6c   :  { %1151 = vmatmul.mubr.msk.bf16.gmra.mrb[36].mxu1 %vm516_vm1, %v1245_v8  ;;  %1138 = vmatprep.mubr.msk.bf16.mxu0 %vm1248_vm0, %v1247_v34 }
  0x73   :  { %1139 = vmatmul.mubr.msk.bf16.gmra.mrb[40].mxu0 %vm516_vm1, %v1246_v9 }
  0xf6   :  { %v1007_v10 = vpop.f32.mrb[0].mxu0 }
  0xf7   :  { %v1008_v12 = vpop.f32.mrb[1].mxu0  ;;  %v1065_v13 = vpop.f32.mrb[0].mxu1 }
  0xf8   :  { %v1009_v14 = vadd.f32 %v1008_v12, %v1007_v10  ;;  %v1010_v15 = vpop.f32.mrb[2].mxu0  ;;  %v1066_v16 = vpop.f32.mrb[1].mxu1 }
  0xf9   :  { %v1011_v17 = vpop.f32.mrb[3].mxu0  ;;  %v1067_v18 = vadd.f32 %v1066_v16, %v1065_v13  ;;  %v1068_v19 = vpop.f32.mrb[2].mxu1 }
  0xfa   :  { %v573_v20 = vadd.f32 %v1009_v14, %v1508_v11  ;;  %v1012_v21 = vadd.f32 %v1011_v17, %v1010_v15  ;;  %v1069_v22 = vpop.f32.mrb[3].mxu1 }
  0xfb   :  { %v1070_v23 = vadd.f32 %v1069_v22, %v1068_v19 }
  0xfc   :  { %v576_v24 = vadd.f32 %v1012_v21, %v1508_v11  ;;  %v1512_v25 = vadd.f32 %v1067_v18, %v573_v20 }
  0xfe   :  { %v1013_v26 = vpop.f32.mrb[4].mxu0  ;;  %v1514_v27 = vadd.f32 %v1070_v23, %v576_v24 }
  0xff   :  { %v1014_v28 = vpop.f32.mrb[5].mxu0  ;;  %v1071_v29 = vpop.f32.mrb[4].mxu1 }
 0x100   :  { %v1015_v30 = vadd.f32 %v1014_v28, %v1013_v26  ;;  %v1016_v31 = vpop.f32.mrb[6].mxu0  ;;  %v1072_v32 = vpop.f32.mrb[5].mxu1 }
 0x101   :  { %v1017_v33 = vpop.f32.mrb[7].mxu0  ;;  %v1073_v34 = vadd.f32 %v1072_v32, %v1071_v29  ;;  %v1074_v35 = vpop.f32.mrb[6].mxu1 }
 0x102   :  { %v581_v36 = vadd.f32 %v1015_v30, %v1508_v11  ;;  %v1018_v37 = vadd.f32 %v1017_v33, %v1016_v31  ;;  %v1075_v38 = vpop.f32.mrb[7].mxu1 }
 0x103   :  { %v1076_v39 = vadd.f32 %v1075_v38, %v1074_v35 }
 0x104   :  { %v584_v40 = vadd.f32 %v1018_v37, %v1508_v11  ;;  %v1518_v41 = vadd.f32 %v1073_v34, %v581_v36 }
 0x106   :  { %v1019_v42 = vpop.f32.mrb[8].mxu0  ;;  %v1520_v43 = vadd.f32 %v1076_v39, %v584_v40 }
 0x107   :  { %v1020_v44 = vpop.f32.mrb[9].mxu0  ;;  %v1077_v45 = vpop.f32.mrb[8].mxu1 }
 0x108   :  { %v1021_v46 = vadd.f32 %v1020_v44, %v1019_v42  ;;  %v1022_v47 = vpop.f32.mrb[10].mxu0  ;;  %v1078_v48 = vpop.f32.mrb[9].mxu1 }
 0x109   :  { %v1023_v49 = vpop.f32.mrb[11].mxu0  ;;  %v1079_v50 = vadd.f32 %v1078_v48, %v1077_v45  ;;  %v1080_v51 = vpop.f32.mrb[10].mxu1 }
 0x10a   :  { %v589_v52 = vadd.f32 %v1021_v46, %v1508_v11  ;;  %v1024_v53 = vadd.f32 %v1023_v49, %v1022_v47  ;;  %v1081_v54 = vpop.f32.mrb[11].mxu1 }
 0x10b   :  { %v1082_v55 = vadd.f32 %v1081_v54, %v1080_v51 }
 0x10c   :  { %v592_v56 = vadd.f32 %v1024_v53, %v1508_v11  ;;  %v1524_v57 = vadd.f32 %v1079_v50, %v589_v52 }
 0x10e   :  { %v1025_v58 = vpop.f32.mrb[12].mxu0  ;;  %v1526_v59 = vadd.f32 %v1082_v55, %v592_v56 }
 0x10f   :  { %v1026_v60 = vpop.f32.mrb[13].mxu0  ;;  %v1083_v61 = vpop.f32.mrb[12].mxu1 }
 0x110   :  { %v1027_v62 = vadd.f32 %v1026_v60, %v1025_v58  ;;  %v1028_v63 = vpop.f32.mrb[14].mxu0  ;;  %v1084_v0 = vpop.f32.mrb[13].mxu1 }
 0x111   :  { %v1029_v1 = vpop.f32.mrb[15].mxu0  ;;  %v1085_v2 = vadd.f32 %v1084_v0, %v1083_v61  ;;  %v1086_v3 = vpop.f32.mrb[14].mxu1 }
 0x112   :  { %v597_v4 = vadd.f32 %v1027_v62, %v1508_v11  ;;  %v1030_v5 = vadd.f32 %v1029_v1, %v1028_v63  ;;  %v1087_v6 = vpop.f32.mrb[15].mxu1 }
 0x113   :  { %v1088_v7 = vadd.f32 %v1087_v6, %v1086_v3 }
 0x114   :  { %v600_v8 = vadd.f32 %v1030_v5, %v1508_v11  ;;  %v1530_v9 = vadd.f32 %v1085_v2, %v597_v4 }
 0x116   :  { %v1031_v10 = vpop.f32.mrb[16].mxu0  ;;  %v1532_v12 = vadd.f32 %v1088_v7, %v600_v8 }
 0x117   :  { %v1032_v13 = vpop.f32.mrb[17].mxu0  ;;  %v1089_v14 = vpop.f32.mrb[16].mxu1 }
 0x118   :  { %v1033_v15 = vadd.f32 %v1032_v13, %v1031_v10  ;;  %v1034_v16 = vpop.f32.mrb[18].mxu0  ;;  %v1090_v17 = vpop.f32.mrb[17].mxu1 }
 0x119   :  { %v1035_v18 = vpop.f32.mrb[19].mxu0  ;;  %v1091_v19 = vadd.f32 %v1090_v17, %v1089_v14  ;;  %v1092_v20 = vpop.f32.mrb[18].mxu1 }
 0x11a   :  { %v605_v21 = vadd.f32 %v1033_v15, %v1508_v11  ;;  %v1036_v22 = vadd.f32 %v1035_v18, %v1034_v16  ;;  %v1093_v23 = vpop.f32.mrb[19].mxu1 }
 0x11b   :  { %v1094_v24 = vadd.f32 %v1093_v23, %v1092_v20 }
 0x11c   :  { %v608_v26 = vadd.f32 %v1036_v22, %v1508_v11  ;;  %v693_v28 = vadd.f32 %v1091_v19, %v605_v21 }
 0x11e   :  { %v1037_v29 = vpop.f32.mrb[20].mxu0  ;;  %v696_v30 = vadd.f32 %v1094_v24, %v608_v26 }
 0x11f   :  { %v1038_v31 = vpop.f32.mrb[21].mxu0  ;;  %v1095_v32 = vpop.f32.mrb[20].mxu1 }
 0x120   :  { %v1039_v33 = vadd.f32 %v1038_v31, %v1037_v29  ;;  %v1040_v34 = vpop.f32.mrb[22].mxu0  ;;  %v1096_v35 = vpop.f32.mrb[21].mxu1 }
 0x121   :  { %v1041_v36 = vpop.f32.mrb[23].mxu0  ;;  %v1097_v37 = vadd.f32 %v1096_v35, %v1095_v32  ;;  %v1098_v38 = vpop.f32.mrb[22].mxu1 }
 0x122   :  { %v613_v39 = vadd.f32 %v1039_v33, %v1508_v11  ;;  %v1042_v40 = vadd.f32 %v1041_v36, %v1040_v34  ;;  %v1099_v42 = vpop.f32.mrb[23].mxu1 }
 0x123   :  { %v1100_v44 = vadd.f32 %v1099_v42, %v1098_v38 }
 0x124   :  { %v616_v45 = vadd.f32 %v1042_v40, %v1508_v11  ;;  %v701_v46 = vadd.f32 %v1097_v37, %v613_v39 }
 0x126   :  { %v1043_v47 = vpop.f32.mrb[24].mxu0  ;;  %v704_v48 = vadd.f32 %v1100_v44, %v616_v45 }
 0x127   :  { %v1044_v49 = vpop.f32.mrb[25].mxu0  ;;  %v1101_v50 = vpop.f32.mrb[24].mxu1 }
 0x128   :  { %v1045_v51 = vadd.f32 %v1044_v49, %v1043_v47  ;;  %v1046_v52 = vpop.f32.mrb[26].mxu0  ;;  %v1102_v53 = vpop.f32.mrb[25].mxu1 }
 0x129   :  { %v1047_v54 = vpop.f32.mrb[27].mxu0  ;;  %v1103_v55 = vadd.f32 %v1102_v53, %v1101_v50  ;;  %v1104_v56 = vpop.f32.mrb[26].mxu1 }
 0x12a   :  { %v621_v58 = vadd.f32 %v1045_v51, %v1508_v11  ;;  %v1105_v60 = vpop.f32.mrb[27].mxu1 }
 0x12c   :  { %v709_v61 = vadd.f32 %v1103_v55, %v621_v58 }
 0x12e   :  { %v748_v62 = vpop.f32.mrb[28].mxu0 }
 0x12f   :  { %v749_v63 = vadd.f32 %v748_v62, %v1512_v25  ;;  %v780_v0 = vpop.f32.mrb[28].mxu1  ;;  %v1128_v1 = vpop.f32.mrb[29].mxu0 }
 0x130   :  { %v781_v2 = vadd.f32 %v780_v0, %v693_v28  ;;  %v1144_v3 = vpop.f32.mrb[29].mxu1  ;;  %v751_v4 = vpop.f32.mrb[30].mxu0 }
 0x131   :  { %v802_v5 = vmax.f32 %v749_v63, 0.0  ;;  %v752_v6 = vadd.f32 %v751_v4, %v1514_v27  ;;  %v783_v7 = vpop.f32.mrb[30].mxu1  ;;  %v1129_v8 = vpop.f32.mrb[31].mxu0 }
 0x132   :  { %v810_v10 = vmax.f32 %v781_v2, 0.0  ;;  %v784_v13 = vadd.f32 %v783_v7, %v696_v30  ;;  %v1145_v14 = vpop.f32.mrb[31].mxu1 }
 0x133   :  { %v978_v11 = vpack.c.bf16 %v802_v5, %v802_v5  ;;  %v803_v15 = vmax.f32 %v752_v6, 0.0 }
 0x134   :  { %v986_v16 = vpack.c.bf16 %v810_v10, %v810_v10  ;;  %v811_v17 = vmax.f32 %v784_v13, 0.0 }
 0x135   :  { %869 = vst.msk [vmem:[%s1602_s3] sm:$0xf] %vm868_vm2, %v978_v11  ;;  %v979_v25 = vpack.c.bf16 %v803_v15, %v803_v15 }
 0x136   :  { %877 = vst.msk [vmem:[%s1602_s3 + $0x20] sm:$0xf] %vm868_vm2, %v986_v16  ;;  %v987_v27 = vpack.c.bf16 %v811_v17, %v811_v17  ;;  %v756_v18 = vpop.f32.mrb[32].mxu0 }
 0x137   :  { %870 = vst.msk [vmem:[%s1602_s3 + $0x4] sm:$0xf] %vm868_vm2, %v979_v25  ;;  %v757_v19 = vadd.f32 %v756_v18, %v1518_v41  ;;  %v788_v20 = vpop.f32.mrb[32].mxu1  ;;  %v1132_v21 = vpop.f32.mrb[33].mxu0 }
 0x138   :  { %878 = vst.msk [vmem:[%s1602_s3 + $0x24] sm:$0xf] %vm868_vm2, %v987_v27  ;;  %v789_v22 = vadd.f32 %v788_v20, %v701_v46  ;;  %v1148_v23 = vpop.f32.mrb[33].mxu1  ;;  %v759_v24 = vpop.f32.mrb[34].mxu0 }
 0x139   :  { %v804_v26 = vmax.f32 %v757_v19, 0.0  ;;  %v760_v28 = vadd.f32 %v759_v24, %v1520_v43  ;;  %v791_v29 = vpop.f32.mrb[34].mxu1  ;;  %v1133_v30 = vpop.f32.mrb[35].mxu0 }
 0x13a   :  { %v812_v31 = vmax.f32 %v789_v22, 0.0  ;;  %v792_v32 = vadd.f32 %v791_v29, %v704_v48  ;;  %v1149_v33 = vpop.f32.mrb[35].mxu1 }
 0x13b   :  { %v980_v34 = vpack.c.bf16 %v804_v26, %v804_v26  ;;  %v805_v41 = vmax.f32 %v760_v28, 0.0 }
 0x13c   :  { %v988_v35 = vpack.c.bf16 %v812_v31, %v812_v31  ;;  %v813_v36 = vmax.f32 %v792_v32, 0.0 }
 0x13d   :  { %871 = vst.msk [vmem:[%s1602_s3 + $0x8] sm:$0xf] %vm868_vm2, %v980_v34  ;;  %v981_v37 = vpack.c.bf16 %v805_v41, %v805_v41 }
 0x13e   :  { %879 = vst.msk [vmem:[%s1602_s3 + $0x28] sm:$0xf] %vm868_vm2, %v988_v35  ;;  %v989_v43 = vpack.c.bf16 %v813_v36, %v813_v36  ;;  %v764_v38 = vpop.f32.mrb[36].mxu0 }
 0x13f   :  { %872 = vst.msk [vmem:[%s1602_s3 + $0xc] sm:$0xf] %vm868_vm2, %v981_v37  ;;  %v765_v39 = vadd.f32 %v764_v38, %v1524_v57  ;;  %v796_v40 = vpop.f32.mrb[36].mxu1  ;;  %v1136_v42 = vpop.f32.mrb[37].mxu0 }
 0x140   :  { %880 = vst.msk [vmem:[%s1602_s3 + $0x2c] sm:$0xf] %vm868_vm2, %v989_v43  ;;  %v797_v44 = vadd.f32 %v796_v40, %v709_v61  ;;  %v767_v45 = vpop.f32.mrb[38].mxu0  ;;  %v1152_v46 = vpop.f32.mrb[37].mxu1 }
 0x141   :  { %v806_v47 = vmax.f32 %v765_v39, 0.0  ;;  %v768_v48 = vadd.f32 %v767_v45, %v1526_v59  ;;  %v1137_v49 = vpop.f32.mrb[39].mxu0  ;;  %v799_v50 = vpop.f32.mrb[38].mxu1 }
 0x142   :  { %v814_v51 = vmax.f32 %v797_v44, 0.0  ;;  %v1153_v52 = vpop.f32.mrb[39].mxu1 }
 0x143   :  { %v982_v53 = vpack.c.bf16 %v806_v47, %v806_v47  ;;  %v807_v54 = vmax.f32 %v768_v48, 0.0 }
 0x144   :  { %v990_v57 = vpack.c.bf16 %v814_v51, %v814_v51 }
 0x145   :  { %873 = vst.msk [vmem:[%s1602_s3 + $0x10] sm:$0xf] %vm868_vm2, %v982_v53  ;;  %v983_v55 = vpack.c.bf16 %v807_v54, %v807_v54 }
 0x146   :  { %881 = vst.msk [vmem:[%s1602_s3 + $0x30] sm:$0xf] %vm868_vm2, %v990_v57  ;;  %v772_v56 = vpop.f32.mrb[40].mxu0 }
 0x147   :  { %874 = vst.msk [vmem:[%s1602_s3 + $0x14] sm:$0xf] %vm868_vm2, %v983_v55  ;;  %v773_v59 = vadd.f32 %v772_v56, %v1530_v9  ;;  %v1140_v58 = vpop.f32.mrb[41].mxu0 }
 0x148   :  { %v775_v60 = vpop.f32.mrb[42].mxu0 }
 0x149   :  { %v808_v61 = vmax.f32 %v773_v59, 0.0  ;;  %v776_v62 = vadd.f32 %v775_v60, %v1532_v12  ;;  %v1141_v63 = vpop.f32.mrb[43].mxu0 }
 0x14b   :  { %v984_v0 = vpack.c.bf16 %v808_v61, %v808_v61  ;;  %v809_v1 = vmax.f32 %v776_v62, 0.0 }
 0x14d   :  { %875 = vst.msk [vmem:[%s1602_s3 + $0x18] sm:$0xf] %vm868_vm2, %v984_v0  ;;  %v985_v2 = vpack.c.bf16 %v809_v1, %v809_v1 }
 0x14f   :  { %876 = vst.msk [vmem:[%s1602_s3 + $0x1c] sm:$0xf] %vm868_vm2, %v985_v2 }

// kernel: cnn_policy_forward.7
= control target key start
LH: loop header
LB: loop body
LE: loop exit
PB: predicated region body
PF: predicated region fallthrough
CT: control target
= control target key end

     0   :  { %vm4847_vm0 = vcmask 523264   ;;  %s11088_s1 = inlined_call_operand.vmem [shape: bf16[3136,512], index: 1, kind: input, shape index: {}]   ;;  %s11089_s0 = inlined_call_operand.vmem [shape: bf16[8,3136], index: 0, kind: input, shape index: {}]   ;;  %s11090_s3 = inlined_call_operand.vmem [shape: bf16[512,128], index: 3, kind: input, shape index: {}]   ;;  %s11091_s2 = inlined_call_operand.vmem [shape: f32[1,512], index: 2, kind: input, shape index: {}]   ;;  %s11092_s4 = inlined_call_operand.vmem [shape: f32[1,128], index: 4, kind: input, shape index: {}]   ;;  %s11093_s5 = inlined_call_operand.vmem [shape: f32[8,128], index: 5, kind: output, shape index: {}]  }
   0x1   :  { %v7262_v0 = vld [vmem:[%s11088_s1 + $0x4] ss:$16 sps:$4 sm:$0xff]   ;;  %v7264_v1 = vld [vmem:[%s11088_s1 + $0xc] ss:$16 sps:$4 sm:$0xff]   ;;  %v7266_v2 = vld [vmem:[%s11088_s1] ss:$16 sps:$4 sm:$0xff]  }
   0x2   :  { %4851 = vmatprep.subr.bf16.mxu0 %v7262_v0  ;;  %v7267_v3 = vld [vmem:[%s11088_s1 + $0x8] ss:$16 sps:$4 sm:$0xff]   ;;  %5384 = vmatprep.subr.bf16.mxu1 %v7264_v1  ;;  %v7268_v4 = vld [vmem:[%s11088_s1 + $0x24] ss:$16 sps:$4 sm:$0xff]   ;;  %v7270_v5 = vld [vmem:[%s11088_s1 + $0x2c] ss:$16 sps:$4 sm:$0xff]  }
   0x3   :  { %4852 = vmatpush1.bf16.msra.mxu0 %v7266_v2  ;;  %5385 = vmatpush1.bf16.msra.mxu1 %v7267_v3  ;;  %v7272_v6 = vld [vmem:[%s11088_s1 + $0x20] ss:$16 sps:$4 sm:$0xff]   ;;  %v7273_v7 = vld [vmem:[%s11088_s1 + $0x28] ss:$16 sps:$4 sm:$0xff]   ;;  %v7274_v8 = vld [vmem:[%s11088_s1 + $0x44] ss:$16 sps:$4 sm:$0xff]  }
   0x4   :  { %4853 = vmatprep.subr.bf16.mxu0 %v7268_v4  ;;  %5386 = vmatprep.subr.bf16.mxu1 %v7270_v5  ;;  %v7276_v9 = vld [vmem:[%s11088_s1 + $0x4c] ss:$16 sps:$4 sm:$0xff]   ;;  %v7278_v10 = vld [vmem:[%s11088_s1 + $0x40] ss:$16 sps:$4 sm:$0xff]   ;;  %v7279_v11 = vld [vmem:[%s11088_s1 + $0x48] ss:$16 sps:$4 sm:$0xff]  }
   0x5   :  { %v7280_v12 = vld [vmem:[%s11088_s1 + $0x64] ss:$16 sps:$4 sm:$0xff]   ;;  %v7282_v13 = vld [vmem:[%s11088_s1 + $0x6c] ss:$16 sps:$4 sm:$0xff]   ;;  %v7284_v14 = vld [vmem:[%s11088_s1 + $0x60] ss:$16 sps:$4 sm:$0xff]  }
   0x6   :  { %v7285_v15 = vld [vmem:[%s11088_s1 + $0x68] ss:$16 sps:$4 sm:$0xff]   ;;  %v7286_v16 = vld [vmem:[%s11088_s1 + $0x84] ss:$16 sps:$4 sm:$0xff]   ;;  %v7288_v17 = vld [vmem:[%s11088_s1 + $0x8c] ss:$16 sps:$4 sm:$0xff]  }
   0x7   :  { %4854 = vmatpush1.bf16.msra.mxu0 %v7272_v6  ;;  %5387 = vmatpush1.bf16.msra.mxu1 %v7273_v7  ;;  %v7290_v18 = vld [vmem:[%s11088_s1 + $0x80] ss:$16 sps:$4 sm:$0xff]   ;;  %v7291_v19 = vld [vmem:[%s11088_s1 + $0x88] ss:$16 sps:$4 sm:$0xff]   ;;  %v7292_v20 = vld [vmem:[%s11088_s1 + $0xa4] ss:$16 sps:$4 sm:$0xff]  }
   0x8   :  { %4855 = vmatprep.subr.bf16.mxu0 %v7274_v8  ;;  %5388 = vmatprep.subr.bf16.mxu1 %v7276_v9  ;;  %v7294_v21 = vld [vmem:[%s11088_s1 + $0xac] ss:$16 sps:$4 sm:$0xff]   ;;  %v7296_v22 = vld [vmem:[%s11088_s1 + $0xa0] ss:$16 sps:$4 sm:$0xff]   ;;  %v7297_v23 = vld [vmem:[%s11088_s1 + $0xa8] ss:$16 sps:$4 sm:$0xff]  }
   0x9   :  { %v7298_v24 = vld [vmem:[%s11088_s1 + $0xc4] ss:$16 sps:$4 sm:$0xff]   ;;  %v7300_v25 = vld [vmem:[%s11088_s1 + $0xcc] ss:$16 sps:$4 sm:$0xff]   ;;  %v7302_v26 = vld [vmem:[%s11088_s1 + $0xc0] ss:$16 sps:$4 sm:$0xff]  }
   0xa   :  { %v7303_v27 = vld [vmem:[%s11088_s1 + $0xc8] ss:$16 sps:$4 sm:$0xff]   ;;  %v7304_v28 = vld [vmem:[%s11088_s1 + $0xe4] ss:$16 sps:$4 sm:$0xff]   ;;  %v7306_v29 = vld [vmem:[%s11088_s1 + $0xec] ss:$16 sps:$4 sm:$0xff]  }
   0xb   :  { %4856 = vmatpush1.bf16.msra.mxu0 %v7278_v10  ;;  %5389 = vmatpush1.bf16.msra.mxu1 %v7279_v11  ;;  %v7308_v30 = vld [vmem:[%s11088_s1 + $0xe0] ss:$16 sps:$4 sm:$0xff]   ;;  %v7309_v31 = vld [vmem:[%s11088_s1 + $0xe8] ss:$16 sps:$4 sm:$0xff]   ;;  %v7310_v32 = vld [vmem:[%s11088_s1 + $0x104] ss:$16 sps:$4 sm:$0xff]  }
   0xc   :  { %4857 = vmatprep.subr.bf16.mxu0 %v7280_v12  ;;  %5390 = vmatprep.subr.bf16.mxu1 %v7282_v13  ;;  %v7312_v33 = vld [vmem:[%s11088_s1 + $0x10c] ss:$16 sps:$4 sm:$0xff]   ;;  %v7314_v34 = vld [vmem:[%s11088_s1 + $0x100] ss:$16 sps:$4 sm:$0xff]   ;;  %v7315_v35 = vld [vmem:[%s11088_s1 + $0x108] ss:$16 sps:$4 sm:$0xff]  }
   0xd   :  { %v7316_v36 = vld [vmem:[%s11088_s1 + $0x124] ss:$16 sps:$4 sm:$0xff]   ;;  %v7318_v37 = vld [vmem:[%s11088_s1 + $0x12c] ss:$16 sps:$4 sm:$0xff]   ;;  %v7320_v38 = vld [vmem:[%s11088_s1 + $0x120] ss:$16 sps:$4 sm:$0xff]  }
   0xe   :  { %v7321_v39 = vld [vmem:[%s11088_s1 + $0x128] ss:$16 sps:$4 sm:$0xff]   ;;  %v7322_v40 = vld [vmem:[%s11088_s1 + $0x144] ss:$16 sps:$4 sm:$0xff]   ;;  %v7324_v41 = vld [vmem:[%s11088_s1 + $0x14c] ss:$16 sps:$4 sm:$0xff]  }
   0xf   :  { %4858 = vmatpush1.bf16.msra.mxu0 %v7284_v14  ;;  %5391 = vmatpush1.bf16.msra.mxu1 %v7285_v15  ;;  %v7326_v42 = vld [vmem:[%s11088_s1 + $0x140] ss:$16 sps:$4 sm:$0xff]   ;;  %v7327_v43 = vld [vmem:[%s11088_s1 + $0x148] ss:$16 sps:$4 sm:$0xff]   ;;  %v7328_v44 = vld [vmem:[%s11088_s1 + $0x164] ss:$16 sps:$4 sm:$0xff]  }
  0x10   :  { %4859 = vmatprep.subr.bf16.mxu0 %v7286_v16  ;;  %5392 = vmatprep.subr.bf16.mxu1 %v7288_v17  ;;  %v7330_v45 = vld [vmem:[%s11088_s1 + $0x16c] ss:$16 sps:$4 sm:$0xff]   ;;  %v21_v46 = vld [vmem:[%s11089_s0] sm:$0xff]  ;;  %v7333_v49 = vld [vmem:[%s11088_s1 + $0x168] ss:$16 sps:$4 sm:$0xff]  }
  0x11   :  { %v7332_v47 = vld [vmem:[%s11088_s1 + $0x160] ss:$16 sps:$4 sm:$0xff]   ;;  %v6274_v48 = vcombine.high %v21_v46, %v21_v46  ;;  %v7334_v50 = vld [vmem:[%s11088_s1 + $0x184] ss:$16 sps:$4 sm:$0xff]   ;;  %v7336_v51 = vld [vmem:[%s11088_s1 + $0x18c] ss:$16 sps:$4 sm:$0xff]   ;;  %v6273_v4 = vcombine.low %v21_v46, %v21_v46 }
  0x12   :  { %v7338_v52 = vld [vmem:[%s11088_s1 + $0x180] ss:$16 sps:$4 sm:$0xff]   ;;  %v7339_v53 = vld [vmem:[%s11088_s1 + $0x188] ss:$16 sps:$4 sm:$0xff]   ;;  %v7340_v54 = vld [vmem:[%s11088_s1 + $0x1a4] ss:$16 sps:$4 sm:$0xff]  }
  0x13   :  { %4860 = vmatpush1.bf16.msra.mxu0 %v7290_v18  ;;  %5393 = vmatpush1.bf16.msra.mxu1 %v7291_v19  ;;  %v7342_v55 = vld [vmem:[%s11088_s1 + $0x1ac] ss:$16 sps:$4 sm:$0xff]   ;;  %v7344_v56 = vld [vmem:[%s11088_s1 + $0x1a0] ss:$16 sps:$4 sm:$0xff]   ;;  %v7345_v57 = vld [vmem:[%s11088_s1 + $0x1a8] ss:$16 sps:$4 sm:$0xff]  }
  0x14   :  { %4861 = vmatprep.subr.bf16.mxu0 %v7292_v20  ;;  %5394 = vmatprep.subr.bf16.mxu1 %v7294_v21  ;;  %v7346_v58 = vld [vmem:[%s11088_s1 + $0x1c4] ss:$16 sps:$4 sm:$0xff]   ;;  %v7348_v59 = vld [vmem:[%s11088_s1 + $0x1cc] ss:$16 sps:$4 sm:$0xff]   ;;  %v7350_v60 = vld [vmem:[%s11088_s1 + $0x1c0] ss:$16 sps:$4 sm:$0xff]  }
  0x15   :  { %4883 = vmatprep.mubr.bf16.mxu0 %v6274_v48  ;;  %5416 = vmatprep.mubr.bf16.mxu1 %v6274_v48  ;;  %v7351_v61 = vld [vmem:[%s11088_s1 + $0x1c8] ss:$16 sps:$4 sm:$0xff]   ;;  %v7352_v62 = vld [vmem:[%s11088_s1 + $0x1e4] ss:$16 sps:$4 sm:$0xff]   ;;  %v7354_v63 = vld [vmem:[%s11088_s1 + $0x1ec] ss:$16 sps:$4 sm:$0xff]  }
  0x16   :  { %v7356_v0 = vld [vmem:[%s11088_s1 + $0x1e0] ss:$16 sps:$4 sm:$0xff]   ;;  %v7357_v1 = vld [vmem:[%s11088_s1 + $0x1e8] ss:$16 sps:$4 sm:$0xff]   ;;  %v7362_v2 = vld [vmem:[%s11088_s1 + $0x204] ss:$16 sps:$4 sm:$0xff]  }
  0x17   :  { %4862 = vmatpush1.bf16.msra.mxu0 %v7296_v22  ;;  %5395 = vmatpush1.bf16.msra.mxu1 %v7297_v23  ;;  %v7365_v3 = vld [vmem:[%s11088_s1 + $0x20c] ss:$16 sps:$4 sm:$0xff]   ;;  %v7360_v5 = vld [vmem:[%s11088_s1 + $0x200] ss:$16 sps:$4 sm:$0xff]   ;;  %v7363_v6 = vld [vmem:[%s11088_s1 + $0x208] ss:$16 sps:$4 sm:$0xff]  }
  0x18   :  { %4863 = vmatprep.subr.bf16.mxu0 %v7298_v24  ;;  %5396 = vmatprep.subr.bf16.mxu1 %v7300_v25  ;;  %v7368_v7 = vld [vmem:[%s11088_s1 + $0x224] ss:$16 sps:$4 sm:$0xff]   ;;  %v7371_v8 = vld [vmem:[%s11088_s1 + $0x22c] ss:$16 sps:$4 sm:$0xff]   ;;  %v7366_v9 = vld [vmem:[%s11088_s1 + $0x220] ss:$16 sps:$4 sm:$0xff]  }
  0x19   :  { %v7369_v10 = vld [vmem:[%s11088_s1 + $0x228] ss:$16 sps:$4 sm:$0xff]   ;;  %v7374_v11 = vld [vmem:[%s11088_s1 + $0x244] ss:$16 sps:$4 sm:$0xff]   ;;  %v7377_v12 = vld [vmem:[%s11088_s1 + $0x24c] ss:$16 sps:$4 sm:$0xff]  }
  0x1a   :  { %v7372_v13 = vld [vmem:[%s11088_s1 + $0x240] ss:$16 sps:$4 sm:$0xff]   ;;  %v7375_v14 = vld [vmem:[%s11088_s1 + $0x248] ss:$16 sps:$4 sm:$0xff]   ;;  %v7380_v15 = vld [vmem:[%s11088_s1 + $0x264] ss:$16 sps:$4 sm:$0xff]  }
  0x1b   :  { %4864 = vmatpush1.bf16.msra.mxu0 %v7302_v26  ;;  %5397 = vmatpush1.bf16.msra.mxu1 %v7303_v27  ;;  %v7383_v16 = vld [vmem:[%s11088_s1 + $0x26c] ss:$16 sps:$4 sm:$0xff]   ;;  %v7378_v17 = vld [vmem:[%s11088_s1 + $0x260] ss:$16 sps:$4 sm:$0xff]   ;;  %v7381_v18 = vld [vmem:[%s11088_s1 + $0x268] ss:$16 sps:$4 sm:$0xff]  }
  0x1c   :  { %4865 = vmatprep.subr.bf16.mxu0 %v7304_v28  ;;  %5398 = vmatprep.subr.bf16.mxu1 %v7306_v29  ;;  %v7386_v19 = vld [vmem:[%s11088_s1 + $0x284] ss:$16 sps:$4 sm:$0xff]   ;;  %v7389_v20 = vld [vmem:[%s11088_s1 + $0x28c] ss:$16 sps:$4 sm:$0xff]   ;;  %v7384_v21 = vld [vmem:[%s11088_s1 + $0x280] ss:$16 sps:$4 sm:$0xff]  }
  0x1d   :  { %v7387_v22 = vld [vmem:[%s11088_s1 + $0x288] ss:$16 sps:$4 sm:$0xff]   ;;  %v7392_v23 = vld [vmem:[%s11088_s1 + $0x2a4] ss:$16 sps:$4 sm:$0xff]   ;;  %v7395_v24 = vld [vmem:[%s11088_s1 + $0x2ac] ss:$16 sps:$4 sm:$0xff]  }
  0x1e   :  { %v7390_v25 = vld [vmem:[%s11088_s1 + $0x2a0] ss:$16 sps:$4 sm:$0xff]   ;;  %v7393_v26 = vld [vmem:[%s11088_s1 + $0x2a8] ss:$16 sps:$4 sm:$0xff]   ;;  %v7398_v27 = vld [vmem:[%s11088_s1 + $0x2c4] ss:$16 sps:$4 sm:$0xff]  }
  0x1f   :  { %4866 = vmatpush1.bf16.msra.mxu0 %v7308_v30  ;;  %5399 = vmatpush1.bf16.msra.mxu1 %v7309_v31  ;;  %v7401_v28 = vld [vmem:[%s11088_s1 + $0x2cc] ss:$16 sps:$4 sm:$0xff]   ;;  %v7396_v31 = vld [vmem:[%s11088_s1 + $0x2c0] ss:$16 sps:$4 sm:$0xff]   ;;  %v7423_v48 = vld [vmem:[%s11088_s1 + $0x348] ss:$16 sps:$4 sm:$0xff]  }
  0x20   :  { %4867 = vmatprep.subr.bf16.mxu0 %v7310_v32  ;;  %5400 = vmatprep.subr.bf16.mxu1 %v7312_v33  ;;  %v8802_v29 = vld [vmem:[%s11089_s0 + $0x8] sm:$0xff]  ;;  %v7404_v33 = vld [vmem:[%s11088_s1 + $0x2e4] ss:$16 sps:$4 sm:$0xff]  }
  0x21   :  { %v6276_v30 = vcombine.high %v8802_v29, %v8802_v29  ;;  %v7399_v32 = vld [vmem:[%s11088_s1 + $0x2c8] ss:$16 sps:$4 sm:$0xff]   ;;  %v7425_v46 = vld [vmem:[%s11088_s1 + $0x34c] ss:$16 sps:$4 sm:$0xff]  }
  0x23   :  { %4868 = vmatpush1.bf16.msra.mxu0 %v7314_v34  ;;  %5401 = vmatpush1.bf16.msra.mxu1 %v7315_v35  ;;  %v7407_v34 = vld [vmem:[%s11088_s1 + $0x2ec] ss:$16 sps:$4 sm:$0xff]   ;;  %v7402_v35 = vld [vmem:[%s11088_s1 + $0x2e0] ss:$16 sps:$4 sm:$0xff]  }
  0x24   :  { %4869 = vmatprep.subr.bf16.mxu0 %v7316_v36  ;;  %5402 = vmatprep.subr.bf16.mxu1 %v7318_v37  ;;  %v7405_v36 = vld [vmem:[%s11088_s1 + $0x2e8] ss:$16 sps:$4 sm:$0xff]   ;;  %v7410_v37 = vld [vmem:[%s11088_s1 + $0x304] ss:$16 sps:$4 sm:$0xff]  }
  0x27   :  { %4870 = vmatpush1.bf16.msra.mxu0 %v7320_v38  ;;  %5403 = vmatpush1.bf16.msra.mxu1 %v7321_v39  ;;  %v7413_v38 = vld [vmem:[%s11088_s1 + $0x30c] ss:$16 sps:$4 sm:$0xff]   ;;  %v7408_v39 = vld [vmem:[%s11088_s1 + $0x300] ss:$16 sps:$4 sm:$0xff]  }
  0x28   :  { %4871 = vmatprep.subr.bf16.mxu0 %v7322_v40  ;;  %5404 = vmatprep.subr.bf16.mxu1 %v7324_v41  ;;  %v7411_v40 = vld [vmem:[%s11088_s1 + $0x308] ss:$16 sps:$4 sm:$0xff]   ;;  %v7416_v41 = vld [vmem:[%s11088_s1 + $0x324] ss:$16 sps:$4 sm:$0xff]  }
  0x2b   :  { %4872 = vmatpush1.bf16.msra.mxu0 %v7326_v42  ;;  %5405 = vmatpush1.bf16.msra.mxu1 %v7327_v43  ;;  %v7419_v42 = vld [vmem:[%s11088_s1 + $0x32c] ss:$16 sps:$4 sm:$0xff]   ;;  %v7414_v43 = vld [vmem:[%s11088_s1 + $0x320] ss:$16 sps:$4 sm:$0xff]  }
  0x2c   :  { %4873 = vmatprep.subr.bf16.mxu0 %v7328_v44  ;;  %5406 = vmatprep.subr.bf16.mxu1 %v7330_v45  ;;  %v7417_v44 = vld [vmem:[%s11088_s1 + $0x328] ss:$16 sps:$4 sm:$0xff]   ;;  %v7422_v45 = vld [vmem:[%s11088_s1 + $0x344] ss:$16 sps:$4 sm:$0xff]  }
  0x2f   :  { %4874 = vmatpush1.bf16.msra.mxu0 %v7332_v47  ;;  %5407 = vmatpush1.bf16.msra.mxu1 %v7333_v49  ;;  %v7420_v47 = vld [vmem:[%s11088_s1 + $0x340] ss:$16 sps:$4 sm:$0xff]   ;;  %v7428_v49 = vld [vmem:[%s11088_s1 + $0x364] ss:$16 sps:$4 sm:$0xff]  }
  0x30   :  { %4875 = vmatprep.subr.bf16.mxu0 %v7334_v50  ;;  %5408 = vmatprep.subr.bf16.mxu1 %v7336_v51  ;;  %v7431_v50 = vld [vmem:[%s11088_s1 + $0x36c] ss:$16 sps:$4 sm:$0xff]   ;;  %v7426_v51 = vld [vmem:[%s11088_s1 + $0x360] ss:$16 sps:$4 sm:$0xff]  }
  0x33   :  { %4876 = vmatpush1.bf16.msra.mxu0 %v7338_v52  ;;  %5409 = vmatpush1.bf16.msra.mxu1 %v7339_v53  ;;  %v7429_v52 = vld [vmem:[%s11088_s1 + $0x368] ss:$16 sps:$4 sm:$0xff]   ;;  %v7434_v53 = vld [vmem:[%s11088_s1 + $0x384] ss:$16 sps:$4 sm:$0xff]  }
  0x34   :  { %4877 = vmatprep.subr.bf16.mxu0 %v7340_v54  ;;  %5410 = vmatprep.subr.bf16.mxu1 %v7342_v55  ;;  %v7437_v54 = vld [vmem:[%s11088_s1 + $0x38c] ss:$16 sps:$4 sm:$0xff]   ;;  %v7432_v55 = vld [vmem:[%s11088_s1 + $0x380] ss:$16 sps:$4 sm:$0xff]  }
  0x37   :  { %4878 = vmatpush1.bf16.msra.mxu0 %v7344_v56  ;;  %5411 = vmatpush1.bf16.msra.mxu1 %v7345_v57  ;;  %v7435_v56 = vld [vmem:[%s11088_s1 + $0x388] ss:$16 sps:$4 sm:$0xff]   ;;  %v7440_v57 = vld [vmem:[%s11088_s1 + $0x3a4] ss:$16 sps:$4 sm:$0xff]  }
  0x38   :  { %4879 = vmatprep.subr.bf16.mxu0 %v7346_v58  ;;  %5412 = vmatprep.subr.bf16.mxu1 %v7348_v59  ;;  %v7443_v58 = vld [vmem:[%s11088_s1 + $0x3ac] ss:$16 sps:$4 sm:$0xff]   ;;  %v7438_v59 = vld [vmem:[%s11088_s1 + $0x3a0] ss:$16 sps:$4 sm:$0xff]  }
  0x3b   :  { %4880 = vmatpush1.bf16.msra.mxu0 %v7350_v60  ;;  %5413 = vmatpush1.bf16.msra.mxu1 %v7351_v61  ;;  %v7441_v60 = vld [vmem:[%s11088_s1 + $0x3a8] ss:$16 sps:$4 sm:$0xff]   ;;  %v7446_v61 = vld [vmem:[%s11088_s1 + $0x3c4] ss:$16 sps:$4 sm:$0xff]  }
  0x3c   :  { %4881 = vmatprep.subr.bf16.mxu0 %v7352_v62  ;;  %5414 = vmatprep.subr.bf16.mxu1 %v7354_v63  ;;  %v7449_v62 = vld [vmem:[%s11088_s1 + $0x3cc] ss:$16 sps:$4 sm:$0xff]   ;;  %v7444_v63 = vld [vmem:[%s11088_s1 + $0x3c0] ss:$16 sps:$4 sm:$0xff]  }
  0x3f   :  { %4882 = vmatpush1.bf16.msra.mxu0 %v7356_v0  ;;  %5415 = vmatpush1.bf16.msra.mxu1 %v7357_v1  ;;  %v7447_v0 = vld [vmem:[%s11088_s1 + $0x3c8] ss:$16 sps:$4 sm:$0xff]   ;;  %v7452_v1 = vld [vmem:[%s11088_s1 + $0x3e4] ss:$16 sps:$4 sm:$0xff]  }
  0x40   :  { %4892 = vmatprep.subr.bf16.mxu0 %v7362_v2  ;;  %5425 = vmatprep.subr.bf16.mxu1 %v7365_v3  ;;  %v7455_v2 = vld [vmem:[%s11088_s1 + $0x3ec] ss:$16 sps:$4 sm:$0xff]   ;;  %v7450_v3 = vld [vmem:[%s11088_s1 + $0x3e0] ss:$16 sps:$4 sm:$0xff]  }
  0x42   :  { %4884 = vmatmul.mubr.bf16.vlgmr.msra.gmra.mrb[0].mxu0 %v6273_v4  ;;  %5417 = vmatmul.mubr.bf16.vlgmr.msra.gmra.mrb[0].mxu1 %v6273_v4  ;;  %v7453_v4 = vld [vmem:[%s11088_s1 + $0x3e8] ss:$16 sps:$4 sm:$0xff]  }
  0x43   :  { %4893 = vmatpush1.bf16.msra.mxu0 %v7360_v5  ;;  %5426 = vmatpush1.bf16.msra.mxu1 %v7363_v6  ;;  %v7460_v5 = vld [vmem:[%s11088_s1 + $0x404] ss:$16 sps:$4 sm:$0xff]   ;;  %v7463_v6 = vld [vmem:[%s11088_s1 + $0x40c] ss:$16 sps:$4 sm:$0xff]  }
  0x44   :  { %4894 = vmatprep.subr.bf16.mxu0 %v7368_v7  ;;  %5427 = vmatprep.subr.bf16.mxu1 %v7371_v8  ;;  %v6275_v7 = vcombine.low %v8802_v29, %v8802_v29  ;;  %v7458_v8 = vld [vmem:[%s11088_s1 + $0x400] ss:$16 sps:$4 sm:$0xff]   ;;  %v7493_v29 = vld [vmem:[%s11088_s1 + $0x4ac] ss:$16 sps:$4 sm:$0xff]  }
  0x45   :  { %4924 = vmatprep.mubr.bf16.mxu0 %v6276_v30  ;;  %5457 = vmatprep.mubr.bf16.mxu1 %v6276_v30  ;;  %v7488_v30 = vld [vmem:[%s11088_s1 + $0x4a0] ss:$16 sps:$4 sm:$0xff]  }
  0x47   :  { %4895 = vmatpush1.bf16.msra.mxu0 %v7366_v9  ;;  %5428 = vmatpush1.bf16.msra.mxu1 %v7369_v10  ;;  %v7461_v9 = vld [vmem:[%s11088_s1 + $0x408] ss:$16 sps:$4 sm:$0xff]   ;;  %v7466_v10 = vld [vmem:[%s11088_s1 + $0x424] ss:$16 sps:$4 sm:$0xff]  }
  0x48   :  { %4896 = vmatprep.subr.bf16.mxu0 %v7374_v11  ;;  %5429 = vmatprep.subr.bf16.mxu1 %v7377_v12  ;;  %v8940_v11 = vld [vmem:[%s11089_s0 + $0x10] sm:$0xff]  ;;  %v7469_v12 = vld [vmem:[%s11088_s1 + $0x42c] ss:$16 sps:$4 sm:$0xff]  }
  0x4b   :  { %4897 = vmatpush1.bf16.msra.mxu0 %v7372_v13  ;;  %5430 = vmatpush1.bf16.msra.mxu1 %v7375_v14  ;;  %v6278_v13 = vcombine.high %v8940_v11, %v8940_v11  ;;  %v7464_v14 = vld [vmem:[%s11088_s1 + $0x420] ss:$16 sps:$4 sm:$0xff]  }
  0x4c   :  { %4898 = vmatprep.subr.bf16.mxu0 %v7380_v15  ;;  %5431 = vmatprep.subr.bf16.mxu1 %v7383_v16  ;;  %v7467_v15 = vld [vmem:[%s11088_s1 + $0x428] ss:$16 sps:$4 sm:$0xff]   ;;  %v7472_v16 = vld [vmem:[%s11088_s1 + $0x444] ss:$16 sps:$4 sm:$0xff]  }
  0x4f   :  { %4899 = vmatpush1.bf16.msra.mxu0 %v7378_v17  ;;  %5432 = vmatpush1.bf16.msra.mxu1 %v7381_v18  ;;  %v7475_v17 = vld [vmem:[%s11088_s1 + $0x44c] ss:$16 sps:$4 sm:$0xff]   ;;  %v7470_v18 = vld [vmem:[%s11088_s1 + $0x440] ss:$16 sps:$4 sm:$0xff]  }
  0x50   :  { %4900 = vmatprep.subr.bf16.mxu0 %v7386_v19  ;;  %5433 = vmatprep.subr.bf16.mxu1 %v7389_v20  ;;  %v7473_v19 = vld [vmem:[%s11088_s1 + $0x448] ss:$16 sps:$4 sm:$0xff]   ;;  %v7478_v20 = vld [vmem:[%s11088_s1 + $0x464] ss:$16 sps:$4 sm:$0xff]  }
  0x53   :  { %4901 = vmatpush1.bf16.msra.mxu0 %v7384_v21  ;;  %5434 = vmatpush1.bf16.msra.mxu1 %v7387_v22  ;;  %v7481_v21 = vld [vmem:[%s11088_s1 + $0x46c] ss:$16 sps:$4 sm:$0xff]   ;;  %v7476_v22 = vld [vmem:[%s11088_s1 + $0x460] ss:$16 sps:$4 sm:$0xff]  }
  0x54   :  { %4902 = vmatprep.subr.bf16.mxu0 %v7392_v23  ;;  %5435 = vmatprep.subr.bf16.mxu1 %v7395_v24  ;;  %v7479_v23 = vld [vmem:[%s11088_s1 + $0x468] ss:$16 sps:$4 sm:$0xff]   ;;  %v7484_v24 = vld [vmem:[%s11088_s1 + $0x484] ss:$16 sps:$4 sm:$0xff]  }
  0x57   :  { %4903 = vmatpush1.bf16.msra.mxu0 %v7390_v25  ;;  %5436 = vmatpush1.bf16.msra.mxu1 %v7393_v26  ;;  %v7487_v25 = vld [vmem:[%s11088_s1 + $0x48c] ss:$16 sps:$4 sm:$0xff]   ;;  %v7482_v26 = vld [vmem:[%s11088_s1 + $0x480] ss:$16 sps:$4 sm:$0xff]  }
  0x58   :  { %4904 = vmatprep.subr.bf16.mxu0 %v7398_v27  ;;  %5437 = vmatprep.subr.bf16.mxu1 %v7401_v28  ;;  %v7485_v27 = vld [vmem:[%s11088_s1 + $0x488] ss:$16 sps:$4 sm:$0xff]   ;;  %v7490_v28 = vld [vmem:[%s11088_s1 + $0x4a4] ss:$16 sps:$4 sm:$0xff]  }
  0x5b   :  { %4905 = vmatpush1.bf16.msra.mxu0 %v7396_v31  ;;  %5438 = vmatpush1.bf16.msra.mxu1 %v7399_v32  ;;  %v7491_v31 = vld [vmem:[%s11088_s1 + $0x4a8] ss:$16 sps:$4 sm:$0xff]   ;;  %v7496_v32 = vld [vmem:[%s11088_s1 + $0x4c4] ss:$16 sps:$4 sm:$0xff]  }
  0x5c   :  { %4906 = vmatprep.subr.bf16.mxu0 %v7404_v33  ;;  %5439 = vmatprep.subr.bf16.mxu1 %v7407_v34  ;;  %v7499_v33 = vld [vmem:[%s11088_s1 + $0x4cc] ss:$16 sps:$4 sm:$0xff]   ;;  %v7494_v34 = vld [vmem:[%s11088_s1 + $0x4c0] ss:$16 sps:$4 sm:$0xff]  }
  0x5f   :  { %4907 = vmatpush1.bf16.msra.mxu0 %v7402_v35  ;;  %5440 = vmatpush1.bf16.msra.mxu1 %v7405_v36  ;;  %v7497_v35 = vld [vmem:[%s11088_s1 + $0x4c8] ss:$16 sps:$4 sm:$0xff]   ;;  %v7502_v36 = vld [vmem:[%s11088_s1 + $0x4e4] ss:$16 sps:$4 sm:$0xff]  }
  0x60   :  { %4908 = vmatprep.subr.bf16.mxu0 %v7410_v37  ;;  %5441 = vmatprep.subr.bf16.mxu1 %v7413_v38  ;;  %v7505_v37 = vld [vmem:[%s11088_s1 + $0x4ec] ss:$16 sps:$4 sm:$0xff]   ;;  %v7500_v38 = vld [vmem:[%s11088_s1 + $0x4e0] ss:$16 sps:$4 sm:$0xff]  }
  0x63   :  { %4909 = vmatpush1.bf16.msra.mxu0 %v7408_v39  ;;  %5442 = vmatpush1.bf16.msra.mxu1 %v7411_v40  ;;  %v7503_v39 = vld [vmem:[%s11088_s1 + $0x4e8] ss:$16 sps:$4 sm:$0xff]   ;;  %v7508_v40 = vld [vmem:[%s11088_s1 + $0x504] ss:$16 sps:$4 sm:$0xff]  }
  0x64   :  { %4910 = vmatprep.subr.bf16.mxu0 %v7416_v41  ;;  %5443 = vmatprep.subr.bf16.mxu1 %v7419_v42  ;;  %v7511_v41 = vld [vmem:[%s11088_s1 + $0x50c] ss:$16 sps:$4 sm:$0xff]   ;;  %v7506_v42 = vld [vmem:[%s11088_s1 + $0x500] ss:$16 sps:$4 sm:$0xff]  }
  0x67   :  { %4911 = vmatpush1.bf16.msra.mxu0 %v7414_v43  ;;  %5444 = vmatpush1.bf16.msra.mxu1 %v7417_v44  ;;  %v7509_v43 = vld [vmem:[%s11088_s1 + $0x508] ss:$16 sps:$4 sm:$0xff]   ;;  %v7514_v44 = vld [vmem:[%s11088_s1 + $0x524] ss:$16 sps:$4 sm:$0xff]  }
  0x68   :  { %4912 = vmatprep.subr.bf16.mxu0 %v7422_v45  ;;  %5445 = vmatprep.subr.bf16.mxu1 %v7425_v46  ;;  %v7517_v45 = vld [vmem:[%s11088_s1 + $0x52c] ss:$16 sps:$4 sm:$0xff]   ;;  %v7512_v46 = vld [vmem:[%s11088_s1 + $0x520] ss:$16 sps:$4 sm:$0xff]  }
  0x6b   :  { %4913 = vmatpush1.bf16.msra.mxu0 %v7420_v47  ;;  %5446 = vmatpush1.bf16.msra.mxu1 %v7423_v48  ;;  %v7515_v47 = vld [vmem:[%s11088_s1 + $0x528] ss:$16 sps:$4 sm:$0xff]   ;;  %v7520_v48 = vld [vmem:[%s11088_s1 + $0x544] ss:$16 sps:$4 sm:$0xff]  }
  0x6c   :  { %4914 = vmatprep.subr.bf16.mxu0 %v7428_v49  ;;  %5447 = vmatprep.subr.bf16.mxu1 %v7431_v50  ;;  %v7523_v49 = vld [vmem:[%s11088_s1 + $0x54c] ss:$16 sps:$4 sm:$0xff]   ;;  %v7518_v50 = vld [vmem:[%s11088_s1 + $0x540] ss:$16 sps:$4 sm:$0xff]  }
  0x6f   :  { %4915 = vmatpush1.bf16.msra.mxu0 %v7426_v51  ;;  %5448 = vmatpush1.bf16.msra.mxu1 %v7429_v52  ;;  %v7521_v51 = vld [vmem:[%s11088_s1 + $0x548] ss:$16 sps:$4 sm:$0xff]   ;;  %v7526_v52 = vld [vmem:[%s11088_s1 + $0x564] ss:$16 sps:$4 sm:$0xff]  }
  0x70   :  { %4916 = vmatprep.subr.bf16.mxu0 %v7434_v53  ;;  %5449 = vmatprep.subr.bf16.mxu1 %v7437_v54  ;;  %v7529_v53 = vld [vmem:[%s11088_s1 + $0x56c] ss:$16 sps:$4 sm:$0xff]   ;;  %v7524_v54 = vld [vmem:[%s11088_s1 + $0x560] ss:$16 sps:$4 sm:$0xff]  }
  0x73   :  { %4917 = vmatpush1.bf16.msra.mxu0 %v7432_v55  ;;  %5450 = vmatpush1.bf16.msra.mxu1 %v7435_v56  ;;  %v7527_v55 = vld [vmem:[%s11088_s1 + $0x568] ss:$16 sps:$4 sm:$0xff]   ;;  %v7532_v56 = vld [vmem:[%s11088_s1 + $0x584] ss:$16 sps:$4 sm:$0xff]  }
  0x74   :  { %4918 = vmatprep.subr.bf16.mxu0 %v7440_v57  ;;  %5451 = vmatprep.subr.bf16.mxu1 %v7443_v58  ;;  %v7535_v57 = vld [vmem:[%s11088_s1 + $0x58c] ss:$16 sps:$4 sm:$0xff]   ;;  %v7530_v58 = vld [vmem:[%s11088_s1 + $0x580] ss:$16 sps:$4 sm:$0xff]  }
  0x77   :  { %4919 = vmatpush1.bf16.msra.mxu0 %v7438_v59  ;;  %5452 = vmatpush1.bf16.msra.mxu1 %v7441_v60  ;;  %v7533_v59 = vld [vmem:[%s11088_s1 + $0x588] ss:$16 sps:$4 sm:$0xff]   ;;  %v7538_v60 = vld [vmem:[%s11088_s1 + $0x5a4] ss:$16 sps:$4 sm:$0xff]  }
  0x78   :  { %4920 = vmatprep.subr.bf16.mxu0 %v7446_v61  ;;  %5453 = vmatprep.subr.bf16.mxu1 %v7449_v62  ;;  %v7541_v61 = vld [vmem:[%s11088_s1 + $0x5ac] ss:$16 sps:$4 sm:$0xff]   ;;  %v7536_v62 = vld [vmem:[%s11088_s1 + $0x5a0] ss:$16 sps:$4 sm:$0xff]  }
  0x7b   :  { %4921 = vmatpush1.bf16.msra.mxu0 %v7444_v63  ;;  %5454 = vmatpush1.bf16.msra.mxu1 %v7447_v0  ;;  %v7539_v63 = vld [vmem:[%s11088_s1 + $0x5a8] ss:$16 sps:$4 sm:$0xff]   ;;  %v7544_v0 = vld [vmem:[%s11088_s1 + $0x5c4] ss:$16 sps:$4 sm:$0xff]  }
  0x7c   :  { %4922 = vmatprep.subr.bf16.mxu0 %v7452_v1  ;;  %5455 = vmatprep.subr.bf16.mxu1 %v7455_v2  ;;  %v7547_v1 = vld [vmem:[%s11088_s1 + $0x5cc] ss:$16 sps:$4 sm:$0xff]   ;;  %v7542_v2 = vld [vmem:[%s11088_s1 + $0x5c0] ss:$16 sps:$4 sm:$0xff]  }
  0x7f   :  { %4923 = vmatpush1.bf16.msra.mxu0 %v7450_v3  ;;  %5456 = vmatpush1.bf16.msra.mxu1 %v7453_v4  ;;  %v7545_v3 = vld [vmem:[%s11088_s1 + $0x5c8] ss:$16 sps:$4 sm:$0xff]   ;;  %v7550_v4 = vld [vmem:[%s11088_s1 + $0x5e4] ss:$16 sps:$4 sm:$0xff]  }
  0x80   :  { %4933 = vmatprep.subr.bf16.mxu0 %v7460_v5  ;;  %5466 = vmatprep.subr.bf16.mxu1 %v7463_v6  ;;  %v7553_v5 = vld [vmem:[%s11088_s1 + $0x5ec] ss:$16 sps:$4 sm:$0xff]   ;;  %v7548_v6 = vld [vmem:[%s11088_s1 + $0x5e0] ss:$16 sps:$4 sm:$0xff]  }
  0x82   :  { %4925 = vmatmul.mubr.bf16.vlgmr.msra.gmra.mrb[0].mxu0 %v6275_v7  ;;  %5458 = vmatmul.mubr.bf16.vlgmr.msra.gmra.mrb[0].mxu1 %v6275_v7  ;;  %v7551_v7 = vld [vmem:[%s11088_s1 + $0x5e8] ss:$16 sps:$4 sm:$0xff]  }
  0x83   :  { %4934 = vmatpush1.bf16.msra.mxu0 %v7458_v8  ;;  %5467 = vmatpush1.bf16.msra.mxu1 %v7461_v9  ;;  %v7558_v8 = vld [vmem:[%s11088_s1 + $0x604] ss:$16 sps:$4 sm:$0xff]   ;;  %v7561_v9 = vld [vmem:[%s11088_s1 + $0x60c] ss:$16 sps:$4 sm:$0xff]  }
  0x84   :  { %4935 = vmatprep.subr.bf16.mxu0 %v7466_v10  ;;  %5468 = vmatprep.subr.bf16.mxu1 %v7469_v12  ;;  %v7556_v10 = vld [vmem:[%s11088_s1 + $0x600] ss:$16 sps:$4 sm:$0xff]   ;;  %v6277_v12 = vcombine.low %v8940_v11, %v8940_v11  ;;  %v7567_v11 = vld [vmem:[%s11088_s1 + $0x62c] ss:$16 sps:$4 sm:$0xff]  }
  0x85   :  { %4965 = vmatprep.mubr.bf16.mxu0 %v6278_v13  ;;  %5498 = vmatprep.mubr.bf16.mxu1 %v6278_v13  ;;  %v7559_v13 = vld [vmem:[%s11088_s1 + $0x608] ss:$16 sps:$4 sm:$0xff]  }
  0x87   :  { %4936 = vmatpush1.bf16.msra.mxu0 %v7464_v14  ;;  %5469 = vmatpush1.bf16.msra.mxu1 %v7467_v15  ;;  %v9138_v14 = vld [vmem:[%s11089_s0 + $0x18] sm:$0xff]  ;;  %v7564_v15 = vld [vmem:[%s11088_s1 + $0x624] ss:$16 sps:$4 sm:$0xff]  }
  0x88   :  { %4937 = vmatprep.subr.bf16.mxu0 %v7472_v16  ;;  %5470 = vmatprep.subr.bf16.mxu1 %v7475_v17  ;;  %v6280_v16 = vcombine.high %v9138_v14, %v9138_v14  ;;  %v7562_v17 = vld [vmem:[%s11088_s1 + $0x620] ss:$16 sps:$4 sm:$0xff]  }
  0x8b   :  { %4938 = vmatpush1.bf16.msra.mxu0 %v7470_v18  ;;  %5471 = vmatpush1.bf16.msra.mxu1 %v7473_v19  ;;  %v7565_v18 = vld [vmem:[%s11088_s1 + $0x628] ss:$16 sps:$4 sm:$0xff]   ;;  %v7570_v19 = vld [vmem:[%s11088_s1 + $0x644] ss:$16 sps:$4 sm:$0xff]  }
  0x8c   :  { %4939 = vmatprep.subr.bf16.mxu0 %v7478_v20  ;;  %5472 = vmatprep.subr.bf16.mxu1 %v7481_v21  ;;  %v7573_v20 = vld [vmem:[%s11088_s1 + $0x64c] ss:$16 sps:$4 sm:$0xff]   ;;  %v7568_v21 = vld [vmem:[%s11088_s1 + $0x640] ss:$16 sps:$4 sm:$0xff]  }
  0x8f   :  { %4940 = vmatpush1.bf16.msra.mxu0 %v7476_v22  ;;  %5473 = vmatpush1.bf16.msra.mxu1 %v7479_v23  ;;  %v7571_v22 = vld [vmem:[%s11088_s1 + $0x648] ss:$16 sps:$4 sm:$0xff]   ;;  %v7576_v23 = vld [vmem:[%s11088_s1 + $0x664] ss:$16 sps:$4 sm:$0xff]  }
  0x90   :  { %4941 = vmatprep.subr.bf16.mxu0 %v7484_v24  ;;  %5474 = vmatprep.subr.bf16.mxu1 %v7487_v25  ;;  %v7579_v24 = vld [vmem:[%s11088_s1 + $0x66c] ss:$16 sps:$4 sm:$0xff]   ;;  %v7574_v25 = vld [vmem:[%s11088_s1 + $0x660] ss:$16 sps:$4 sm:$0xff]  }
  0x93   :  { %4942 = vmatpush1.bf16.msra.mxu0 %v7482_v26  ;;  %5475 = vmatpush1.bf16.msra.mxu1 %v7485_v27  ;;  %v7577_v26 = vld [vmem:[%s11088_s1 + $0x668] ss:$16 sps:$4 sm:$0xff]   ;;  %v7582_v27 = vld [vmem:[%s11088_s1 + $0x684] ss:$16 sps:$4 sm:$0xff]  }
  0x94   :  { %4943 = vmatprep.subr.bf16.mxu0 %v7490_v28  ;;  %5476 = vmatprep.subr.bf16.mxu1 %v7493_v29  ;;  %v7585_v28 = vld [vmem:[%s11088_s1 + $0x68c] ss:$16 sps:$4 sm:$0xff]   ;;  %v7580_v29 = vld [vmem:[%s11088_s1 + $0x680] ss:$16 sps:$4 sm:$0xff]  }
  0x97   :  { %4944 = vmatpush1.bf16.msra.mxu0 %v7488_v30  ;;  %5477 = vmatpush1.bf16.msra.mxu1 %v7491_v31  ;;  %v7583_v30 = vld [vmem:[%s11088_s1 + $0x688] ss:$16 sps:$4 sm:$0xff]   ;;  %v7588_v31 = vld [vmem:[%s11088_s1 + $0x6a4] ss:$16 sps:$4 sm:$0xff]  }
  0x98   :  { %4945 = vmatprep.subr.bf16.mxu0 %v7496_v32  ;;  %5478 = vmatprep.subr.bf16.mxu1 %v7499_v33  ;;  %v7591_v32 = vld [vmem:[%s11088_s1 + $0x6ac] ss:$16 sps:$4 sm:$0xff]   ;;  %v7586_v33 = vld [vmem:[%s11088_s1 + $0x6a0] ss:$16 sps:$4 sm:$0xff]  }
  0x9b   :  { %4946 = vmatpush1.bf16.msra.mxu0 %v7494_v34  ;;  %5479 = vmatpush1.bf16.msra.mxu1 %v7497_v35  ;;  %v7589_v34 = vld [vmem:[%s11088_s1 + $0x6a8] ss:$16 sps:$4 sm:$0xff]   ;;  %v7594_v35 = vld [vmem:[%s11088_s1 + $0x6c4] ss:$16 sps:$4 sm:$0xff]  }
  0x9c   :  { %4947 = vmatprep.subr.bf16.mxu0 %v7502_v36  ;;  %5480 = vmatprep.subr.bf16.mxu1 %v7505_v37  ;;  %v7597_v36 = vld [vmem:[%s11088_s1 + $0x6cc] ss:$16 sps:$4 sm:$0xff]   ;;  %v7592_v37 = vld [vmem:[%s11088_s1 + $0x6c0] ss:$16 sps:$4 sm:$0xff]  }
  0x9f   :  { %4948 = vmatpush1.bf16.msra.mxu0 %v7500_v38  ;;  %5481 = vmatpush1.bf16.msra.mxu1 %v7503_v39  ;;  %v7595_v38 = vld [vmem:[%s11088_s1 + $0x6c8] ss:$16 sps:$4 sm:$0xff]   ;;  %v7600_v39 = vld [vmem:[%s11088_s1 + $0x6e4] ss:$16 sps:$4 sm:$0xff]  }
  0xa0   :  { %4949 = vmatprep.subr.bf16.mxu0 %v7508_v40  ;;  %5482 = vmatprep.subr.bf16.mxu1 %v7511_v41  ;;  %v7603_v40 = vld [vmem:[%s11088_s1 + $0x6ec] ss:$16 sps:$4 sm:$0xff]   ;;  %v7598_v41 = vld [vmem:[%s11088_s1 + $0x6e0] ss:$16 sps:$4 sm:$0xff]  }
  0xa3   :  { %4950 = vmatpush1.bf16.msra.mxu0 %v7506_v42  ;;  %5483 = vmatpush1.bf16.msra.mxu1 %v7509_v43  ;;  %v7601_v42 = vld [vmem:[%s11088_s1 + $0x6e8] ss:$16 sps:$4 sm:$0xff]   ;;  %v7606_v43 = vld [vmem:[%s11088_s1 + $0x704] ss:$16 sps:$4 sm:$0xff]  }
  0xa4   :  { %4951 = vmatprep.subr.bf16.mxu0 %v7514_v44  ;;  %5484 = vmatprep.subr.bf16.mxu1 %v7517_v45  ;;  %v7609_v44 = vld [vmem:[%s11088_s1 + $0x70c] ss:$16 sps:$4 sm:$0xff]   ;;  %v7604_v45 = vld [vmem:[%s11088_s1 + $0x700] ss:$16 sps:$4 sm:$0xff]  }
  0xa7   :  { %4952 = vmatpush1.bf16.msra.mxu0 %v7512_v46  ;;  %5485 = vmatpush1.bf16.msra.mxu1 %v7515_v47  ;;  %v7607_v46 = vld [vmem:[%s11088_s1 + $0x708] ss:$16 sps:$4 sm:$0xff]   ;;  %v7612_v47 = vld [vmem:[%s11088_s1 + $0x724] ss:$16 sps:$4 sm:$0xff]  }
  0xa8   :  { %4953 = vmatprep.subr.bf16.mxu0 %v7520_v48  ;;  %5486 = vmatprep.subr.bf16.mxu1 %v7523_v49  ;;  %v7615_v48 = vld [vmem:[%s11088_s1 + $0x72c] ss:$16 sps:$4 sm:$0xff]   ;;  %v7610_v49 = vld [vmem:[%s11088_s1 + $0x720] ss:$16 sps:$4 sm:$0xff]  }
  0xab   :  { %4954 = vmatpush1.bf16.msra.mxu0 %v7518_v50  ;;  %5487 = vmatpush1.bf16.msra.mxu1 %v7521_v51  ;;  %v7613_v50 = vld [vmem:[%s11088_s1 + $0x728] ss:$16 sps:$4 sm:$0xff]   ;;  %v7618_v51 = vld [vmem:[%s11088_s1 + $0x744] ss:$16 sps:$4 sm:$0xff]  }
  0xac   :  { %4955 = vmatprep.subr.bf16.mxu0 %v7526_v52  ;;  %5488 = vmatprep.subr.bf16.mxu1 %v7529_v53  ;;  %v7621_v52 = vld [vmem:[%s11088_s1 + $0x74c] ss:$16 sps:$4 sm:$0xff]   ;;  %v7616_v53 = vld [vmem:[%s11088_s1 + $0x740] ss:$16 sps:$4 sm:$0xff]  }
  0xaf   :  { %4956 = vmatpush1.bf16.msra.mxu0 %v7524_v54  ;;  %5489 = vmatpush1.bf16.msra.mxu1 %v7527_v55  ;;  %v7619_v54 = vld [vmem:[%s11088_s1 + $0x748] ss:$16 sps:$4 sm:$0xff]   ;;  %v7624_v55 = vld [vmem:[%s11088_s1 + $0x764] ss:$16 sps:$4 sm:$0xff]  }
  0xb0   :  { %4957 = vmatprep.subr.bf16.mxu0 %v7532_v56  ;;  %5490 = vmatprep.subr.bf16.mxu1 %v7535_v57  ;;  %v7627_v56 = vld [vmem:[%s11088_s1 + $0x76c] ss:$16 sps:$4 sm:$0xff]   ;;  %v7622_v57 = vld [vmem:[%s11088_s1 + $0x760] ss:$16 sps:$4 sm:$0xff]  }
  0xb3   :  { %4958 = vmatpush1.bf16.msra.mxu0 %v7530_v58  ;;  %5491 = vmatpush1.bf16.msra.mxu1 %v7533_v59  ;;  %v7625_v58 = vld [vmem:[%s11088_s1 + $0x768] ss:$16 sps:$4 sm:$0xff]   ;;  %v7630_v59 = vld [vmem:[%s11088_s1 + $0x784] ss:$16 sps:$4 sm:$0xff]  }
  0xb4   :  { %4959 = vmatprep.subr.bf16.mxu0 %v7538_v60  ;;  %5492 = vmatprep.subr.bf16.mxu1 %v7541_v61  ;;  %v7633_v60 = vld [vmem:[%s11088_s1 + $0x78c] ss:$16 sps:$4 sm:$0xff]   ;;  %v7628_v61 = vld [vmem:[%s11088_s1 + $0x780] ss:$16 sps:$4 sm:$0xff]  }
  0xb7   :  { %4960 = vmatpush1.bf16.msra.mxu0 %v7536_v62  ;;  %5493 = vmatpush1.bf16.msra.mxu1 %v7539_v63  ;;  %v7631_v62 = vld [vmem:[%s11088_s1 + $0x788] ss:$16 sps:$4 sm:$0xff]   ;;  %v7636_v63 = vld [vmem:[%s11088_s1 + $0x7a4] ss:$16 sps:$4 sm:$0xff]  }
  0xb8   :  { %4961 = vmatprep.subr.bf16.mxu0 %v7544_v0  ;;  %5494 = vmatprep.subr.bf16.mxu1 %v7547_v1  ;;  %v7639_v0 = vld [vmem:[%s11088_s1 + $0x7ac] ss:$16 sps:$4 sm:$0xff]   ;;  %v7634_v1 = vld [vmem:[%s11088_s1 + $0x7a0] ss:$16 sps:$4 sm:$0xff]  }
  0xbb   :  { %4962 = vmatpush1.bf16.msra.mxu0 %v7542_v2  ;;  %5495 = vmatpush1.bf16.msra.mxu1 %v7545_v3  ;;  %v7637_v2 = vld [vmem:[%s11088_s1 + $0x7a8] ss:$16 sps:$4 sm:$0xff]   ;;  %v7642_v3 = vld [vmem:[%s11088_s1 + $0x7c4] ss:$16 sps:$4 sm:$0xff]  }
  0xbc   :  { %4963 = vmatprep.subr.bf16.mxu0 %v7550_v4  ;;  %5496 = vmatprep.subr.bf16.mxu1 %v7553_v5  ;;  %v7645_v4 = vld [vmem:[%s11088_s1 + $0x7cc] ss:$16 sps:$4 sm:$0xff]   ;;  %v7640_v5 = vld [vmem:[%s11088_s1 + $0x7c0] ss:$16 sps:$4 sm:$0xff]  }
  0xbf   :  { %4964 = vmatpush1.bf16.msra.mxu0 %v7548_v6  ;;  %5497 = vmatpush1.bf16.msra.mxu1 %v7551_v7  ;;  %v7643_v6 = vld [vmem:[%s11088_s1 + $0x7c8] ss:$16 sps:$4 sm:$0xff]   ;;  %v7648_v7 = vld [vmem:[%s11088_s1 + $0x7e4] ss:$16 sps:$4 sm:$0xff]  }
  0xc0   :  { %4974 = vmatprep.subr.bf16.mxu0 %v7558_v8  ;;  %5507 = vmatprep.subr.bf16.mxu1 %v7561_v9  ;;  %v7651_v8 = vld [vmem:[%s11088_s1 + $0x7ec] ss:$16 sps:$4 sm:$0xff]   ;;  %v7646_v9 = vld [vmem:[%s11088_s1 + $0x7e0] ss:$16 sps:$4 sm:$0xff]  }
  0xc2   :  { %4966 = vmatmul.mubr.bf16.vlgmr.msra.gmra.mrb[0].mxu0 %v6277_v12  ;;  %5499 = vmatmul.mubr.bf16.vlgmr.msra.gmra.mrb[0].mxu1 %v6277_v12  ;;  %v7656_v12 = vld [vmem:[%s11088_s1 + $0x804] ss:$16 sps:$4 sm:$0xff]  }
  0xc3   :  { %4975 = vmatpush1.bf16.msra.mxu0 %v7556_v10  ;;  %5508 = vmatpush1.bf16.msra.mxu1 %v7559_v13  ;;  %v7649_v10 = vld [vmem:[%s11088_s1 + $0x7e8] ss:$16 sps:$4 sm:$0xff]   ;;  %v7659_v13 = vld [vmem:[%s11088_s1 + $0x80c] ss:$16 sps:$4 sm:$0xff]  }
  0xc4   :  { %4976 = vmatprep.subr.bf16.mxu0 %v7564_v15  ;;  %5509 = vmatprep.subr.bf16.mxu1 %v7567_v11  ;;  %v7654_v15 = vld [vmem:[%s11088_s1 + $0x800] ss:$16 sps:$4 sm:$0xff]   ;;  %v6279_v11 = vcombine.low %v9138_v14, %v9138_v14  ;;  %v7665_v14 = vld [vmem:[%s11088_s1 + $0x82c] ss:$16 sps:$4 sm:$0xff]  }
  0xc5   :  { %5006 = vmatprep.mubr.bf16.mxu0 %v6280_v16  ;;  %5539 = vmatprep.mubr.bf16.mxu1 %v6280_v16  ;;  %v9336_v16 = vld [vmem:[%s11089_s0 + $0x20] sm:$0xff] }
  0xc7   :  { %4977 = vmatpush1.bf16.msra.mxu0 %v7562_v17  ;;  %5510 = vmatpush1.bf16.msra.mxu1 %v7565_v18  ;;  %v7657_v17 = vld [vmem:[%s11088_s1 + $0x808] ss:$16 sps:$4 sm:$0xff]   ;;  %v7662_v18 = vld [vmem:[%s11088_s1 + $0x824] ss:$16 sps:$4 sm:$0xff]  }
  0xc8   :  { %4978 = vmatprep.subr.bf16.mxu0 %v7570_v19  ;;  %5511 = vmatprep.subr.bf16.mxu1 %v7573_v20  ;;  %v6282_v19 = vcombine.high %v9336_v16, %v9336_v16  ;;  %v7660_v20 = vld [vmem:[%s11088_s1 + $0x820] ss:$16 sps:$4 sm:$0xff]  }
  0xcb   :  { %4979 = vmatpush1.bf16.msra.mxu0 %v7568_v21  ;;  %5512 = vmatpush1.bf16.msra.mxu1 %v7571_v22  ;;  %v7663_v21 = vld [vmem:[%s11088_s1 + $0x828] ss:$16 sps:$4 sm:$0xff]   ;;  %v7668_v22 = vld [vmem:[%s11088_s1 + $0x844] ss:$16 sps:$4 sm:$0xff]  }
  0xcc   :  { %4980 = vmatprep.subr.bf16.mxu0 %v7576_v23  ;;  %5513 = vmatprep.subr.bf16.mxu1 %v7579_v24  ;;  %v7671_v23 = vld [vmem:[%s11088_s1 + $0x84c] ss:$16 sps:$4 sm:$0xff]   ;;  %v7666_v24 = vld [vmem:[%s11088_s1 + $0x840] ss:$16 sps:$4 sm:$0xff]  }
  0xcf   :  { %4981 = vmatpush1.bf16.msra.mxu0 %v7574_v25  ;;  %5514 = vmatpush1.bf16.msra.mxu1 %v7577_v26  ;;  %v7669_v25 = vld [vmem:[%s11088_s1 + $0x848] ss:$16 sps:$4 sm:$0xff]   ;;  %v7674_v26 = vld [vmem:[%s11088_s1 + $0x864] ss:$16 sps:$4 sm:$0xff]  }
  0xd0   :  { %4982 = vmatprep.subr.bf16.mxu0 %v7582_v27  ;;  %5515 = vmatprep.subr.bf16.mxu1 %v7585_v28  ;;  %v7677_v27 = vld [vmem:[%s11088_s1 + $0x86c] ss:$16 sps:$4 sm:$0xff]   ;;  %v7672_v28 = vld [vmem:[%s11088_s1 + $0x860] ss:$16 sps:$4 sm:$0xff]  }
  0xd3   :  { %4983 = vmatpush1.bf16.msra.mxu0 %v7580_v29  ;;  %5516 = vmatpush1.bf16.msra.mxu1 %v7583_v30  ;;  %v7675_v29 = vld [vmem:[%s11088_s1 + $0x868] ss:$16 sps:$4 sm:$0xff]   ;;  %v7680_v30 = vld [vmem:[%s11088_s1 + $0x884] ss:$16 sps:$4 sm:$0xff]  }
  0xd4   :  { %4984 = vmatprep.subr.bf16.mxu0 %v7588_v31  ;;  %5517 = vmatprep.subr.bf16.mxu1 %v7591_v32  ;;  %v7683_v31 = vld [vmem:[%s11088_s1 + $0x88c] ss:$16 sps:$4 sm:$0xff]   ;;  %v7678_v32 = vld [vmem:[%s11088_s1 + $0x880] ss:$16 sps:$4 sm:$0xff]  }
  0xd7   :  { %4985 = vmatpush1.bf16.msra.mxu0 %v7586_v33  ;;  %5518 = vmatpush1.bf16.msra.mxu1 %v7589_v34  ;;  %v7681_v33 = vld [vmem:[%s11088_s1 + $0x888] ss:$16 sps:$4 sm:$0xff]   ;;  %v7686_v34 = vld [vmem:[%s11088_s1 + $0x8a4] ss:$16 sps:$4 sm:$0xff]  }
  0xd8   :  { %4986 = vmatprep.subr.bf16.mxu0 %v7594_v35  ;;  %5519 = vmatprep.subr.bf16.mxu1 %v7597_v36  ;;  %v7689_v35 = vld [vmem:[%s11088_s1 + $0x8ac] ss:$16 sps:$4 sm:$0xff]   ;;  %v7684_v36 = vld [vmem:[%s11088_s1 + $0x8a0] ss:$16 sps:$4 sm:$0xff]  }
  0xdb   :  { %4987 = vmatpush1.bf16.msra.mxu0 %v7592_v37  ;;  %5520 = vmatpush1.bf16.msra.mxu1 %v7595_v38  ;;  %v7687_v37 = vld [vmem:[%s11088_s1 + $0x8a8] ss:$16 sps:$4 sm:$0xff]   ;;  %v7692_v38 = vld [vmem:[%s11088_s1 + $0x8c4] ss:$16 sps:$4 sm:$0xff]  }
  0xdc   :  { %4988 = vmatprep.subr.bf16.mxu0 %v7600_v39  ;;  %5521 = vmatprep.subr.bf16.mxu1 %v7603_v40  ;;  %v7695_v39 = vld [vmem:[%s11088_s1 + $0x8cc] ss:$16 sps:$4 sm:$0xff]   ;;  %v7690_v40 = vld [vmem:[%s11088_s1 + $0x8c0] ss:$16 sps:$4 sm:$0xff]  }
  0xdf   :  { %4989 = vmatpush1.bf16.msra.mxu0 %v7598_v41  ;;  %5522 = vmatpush1.bf16.msra.mxu1 %v7601_v42  ;;  %v7693_v41 = vld [vmem:[%s11088_s1 + $0x8c8] ss:$16 sps:$4 sm:$0xff]   ;;  %v7698_v42 = vld [vmem:[%s11088_s1 + $0x8e4] ss:$16 sps:$4 sm:$0xff]  }
  0xe0   :  { %4990 = vmatprep.subr.bf16.mxu0 %v7606_v43  ;;  %5523 = vmatprep.subr.bf16.mxu1 %v7609_v44  ;;  %v7701_v43 = vld [vmem:[%s11088_s1 + $0x8ec] ss:$16 sps:$4 sm:$0xff]   ;;  %v7696_v44 = vld [vmem:[%s11088_s1 + $0x8e0] ss:$16 sps:$4 sm:$0xff]  }
  0xe3   :  { %4991 = vmatpush1.bf16.msra.mxu0 %v7604_v45  ;;  %5524 = vmatpush1.bf16.msra.mxu1 %v7607_v46  ;;  %v7699_v45 = vld [vmem:[%s11088_s1 + $0x8e8] ss:$16 sps:$4 sm:$0xff]   ;;  %v7704_v46 = vld [vmem:[%s11088_s1 + $0x904] ss:$16 sps:$4 sm:$0xff]  }
  0xe4   :  { %4992 = vmatprep.subr.bf16.mxu0 %v7612_v47  ;;  %5525 = vmatprep.subr.bf16.mxu1 %v7615_v48  ;;  %v7707_v47 = vld [vmem:[%s11088_s1 + $0x90c] ss:$16 sps:$4 sm:$0xff]   ;;  %v7702_v48 = vld [vmem:[%s11088_s1 + $0x900] ss:$16 sps:$4 sm:$0xff]  }
  0xe7   :  { %4993 = vmatpush1.bf16.msra.mxu0 %v7610_v49  ;;  %5526 = vmatpush1.bf16.msra.mxu1 %v7613_v50  ;;  %v7705_v49 = vld [vmem:[%s11088_s1 + $0x908] ss:$16 sps:$4 sm:$0xff]   ;;  %v7710_v50 = vld [vmem:[%s11088_s1 + $0x924] ss:$16 sps:$4 sm:$0xff]  }
  0xe8   :  { %4994 = vmatprep.subr.bf16.mxu0 %v7618_v51  ;;  %5527 = vmatprep.subr.bf16.mxu1 %v7621_v52  ;;  %v7713_v51 = vld [vmem:[%s11088_s1 + $0x92c] ss:$16 sps:$4 sm:$0xff]   ;;  %v7708_v52 = vld [vmem:[%s11088_s1 + $0x920] ss:$16 sps:$4 sm:$0xff]  }
  0xeb   :  { %4995 = vmatpush1.bf16.msra.mxu0 %v7616_v53  ;;  %5528 = vmatpush1.bf16.msra.mxu1 %v7619_v54  ;;  %v7711_v53 = vld [vmem:[%s11088_s1 + $0x928] ss:$16 sps:$4 sm:$0xff]   ;;  %v7716_v54 = vld [vmem:[%s11088_s1 + $0x944] ss:$16 sps:$4 sm:$0xff]  }
  0xec   :  { %4996 = vmatprep.subr.bf16.mxu0 %v7624_v55  ;;  %5529 = vmatprep.subr.bf16.mxu1 %v7627_v56  ;;  %v7719_v55 = vld [vmem:[%s11088_s1 + $0x94c] ss:$16 sps:$4 sm:$0xff]   ;;  %v7714_v56 = vld [vmem:[%s11088_s1 + $0x940] ss:$16 sps:$4 sm:$0xff]  }
  0xef   :  { %4997 = vmatpush1.bf16.msra.mxu0 %v7622_v57  ;;  %5530 = vmatpush1.bf16.msra.mxu1 %v7625_v58  ;;  %v7717_v57 = vld [vmem:[%s11088_s1 + $0x948] ss:$16 sps:$4 sm:$0xff]   ;;  %v7722_v58 = vld [vmem:[%s11088_s1 + $0x964] ss:$16 sps:$4 sm:$0xff]  }
  0xf0   :  { %4998 = vmatprep.subr.bf16.mxu0 %v7630_v59  ;;  %5531 = vmatprep.subr.bf16.mxu1 %v7633_v60  ;;  %v7725_v59 = vld [vmem:[%s11088_s1 + $0x96c] ss:$16 sps:$4 sm:$0xff]   ;;  %v7720_v60 = vld [vmem:[%s11088_s1 + $0x960] ss:$16 sps:$4 sm:$0xff]  }
  0xf3   :  { %4999 = vmatpush1.bf16.msra.mxu0 %v7628_v61  ;;  %5532 = vmatpush1.bf16.msra.mxu1 %v7631_v62  ;;  %v7723_v61 = vld [vmem:[%s11088_s1 + $0x968] ss:$16 sps:$4 sm:$0xff]   ;;  %v7728_v62 = vld [vmem:[%s11088_s1 + $0x984] ss:$16 sps:$4 sm:$0xff]  }
  0xf4   :  { %5000 = vmatprep.subr.bf16.mxu0 %v7636_v63  ;;  %5533 = vmatprep.subr.bf16.mxu1 %v7639_v0  ;;  %v7731_v63 = vld [vmem:[%s11088_s1 + $0x98c] ss:$16 sps:$4 sm:$0xff]   ;;  %v7726_v0 = vld [vmem:[%s11088_s1 + $0x980] ss:$16 sps:$4 sm:$0xff]  }
  0xf7   :  { %5001 = vmatpush1.bf16.msra.mxu0 %v7634_v1  ;;  %5534 = vmatpush1.bf16.msra.mxu1 %v7637_v2  ;;  %v7729_v1 = vld [vmem:[%s11088_s1 + $0x988] ss:$16 sps:$4 sm:$0xff]   ;;  %v7734_v2 = vld [vmem:[%s11088_s1 + $0x9a4] ss:$16 sps:$4 sm:$0xff]  }
  0xf8   :  { %5002 = vmatprep.subr.bf16.mxu0 %v7642_v3  ;;  %5535 = vmatprep.subr.bf16.mxu1 %v7645_v4  ;;  %v7737_v3 = vld [vmem:[%s11088_s1 + $0x9ac] ss:$16 sps:$4 sm:$0xff]   ;;  %v7732_v4 = vld [vmem:[%s11088_s1 + $0x9a0] ss:$16 sps:$4 sm:$0xff]  }
  0xfb   :  { %5003 = vmatpush1.bf16.msra.mxu0 %v7640_v5  ;;  %5536 = vmatpush1.bf16.msra.mxu1 %v7643_v6  ;;  %v7735_v5 = vld [vmem:[%s11088_s1 + $0x9a8] ss:$16 sps:$4 sm:$0xff]   ;;  %v7740_v6 = vld [vmem:[%s11088_s1 + $0x9c4] ss:$16 sps:$4 sm:$0xff]  }
  0xfc   :  { %5004 = vmatprep.subr.bf16.mxu0 %v7648_v7  ;;  %5537 = vmatprep.subr.bf16.mxu1 %v7651_v8  ;;  %v7743_v7 = vld [vmem:[%s11088_s1 + $0x9cc] ss:$16 sps:$4 sm:$0xff]   ;;  %v7738_v8 = vld [vmem:[%s11088_s1 + $0x9c0] ss:$16 sps:$4 sm:$0xff]  }
  0xff   :  { %5005 = vmatpush1.bf16.msra.mxu0 %v7646_v9  ;;  %5538 = vmatpush1.bf16.msra.mxu1 %v7649_v10  ;;  %v7741_v9 = vld [vmem:[%s11088_s1 + $0x9c8] ss:$16 sps:$4 sm:$0xff]   ;;  %v7746_v10 = vld [vmem:[%s11088_s1 + $0x9e4] ss:$16 sps:$4 sm:$0xff]  }
 0x100   :  { %5015 = vmatprep.subr.bf16.mxu0 %v7656_v12  ;;  %5548 = vmatprep.subr.bf16.mxu1 %v7659_v13  ;;  %v7749_v12 = vld [vmem:[%s11088_s1 + $0x9ec] ss:$16 sps:$4 sm:$0xff]   ;;  %v7744_v13 = vld [vmem:[%s11088_s1 + $0x9e0] ss:$16 sps:$4 sm:$0xff]  }
 0x102   :  { %5007 = vmatmul.mubr.bf16.vlgmr.msra.gmra.mrb[0].mxu0 %v6279_v11  ;;  %5540 = vmatmul.mubr.bf16.vlgmr.msra.gmra.mrb[0].mxu1 %v6279_v11  ;;  %v7754_v11 = vld [vmem:[%s11088_s1 + $0xa04] ss:$16 sps:$4 sm:$0xff]  }
 0x103   :  { %5016 = vmatpush1.bf16.msra.mxu0 %v7654_v15  ;;  %5549 = vmatpush1.bf16.msra.mxu1 %v7657_v17  ;;  %v7747_v15 = vld [vmem:[%s11088_s1 + $0x9e8] ss:$16 sps:$4 sm:$0xff]   ;;  %v7757_v17 = vld [vmem:[%s11088_s1 + $0xa0c] ss:$16 sps:$4 sm:$0xff]  }
 0x104   :  { %5017 = vmatprep.subr.bf16.mxu0 %v7662_v18  ;;  %5550 = vmatprep.subr.bf16.mxu1 %v7665_v14  ;;  %v9532_v18 = vld [vmem:[%s11089_s0 + $0x28] sm:$0xff]  ;;  %v6281_v14 = vcombine.low %v9336_v16, %v9336_v16 }
 0x105   :  { %5047 = vmatprep.mubr.bf16.mxu0 %v6282_v19  ;;  %5580 = vmatprep.mubr.bf16.mxu1 %v6282_v19  ;;  %v7752_v19 = vld [vmem:[%s11088_s1 + $0xa00] ss:$16 sps:$4 sm:$0xff]   ;;  %v7763_v16 = vld [vmem:[%s11088_s1 + $0xa2c] ss:$16 sps:$4 sm:$0xff]  }
 0x107   :  { %5018 = vmatpush1.bf16.msra.mxu0 %v7660_v20  ;;  %5551 = vmatpush1.bf16.msra.mxu1 %v7663_v21  ;;  %v7755_v20 = vld [vmem:[%s11088_s1 + $0xa08] ss:$16 sps:$4 sm:$0xff]   ;;  %v7760_v21 = vld [vmem:[%s11088_s1 + $0xa24] ss:$16 sps:$4 sm:$0xff]  }
 0x108   :  { %5019 = vmatprep.subr.bf16.mxu0 %v7668_v22  ;;  %5552 = vmatprep.subr.bf16.mxu1 %v7671_v23  ;;  %v6284_v22 = vcombine.high %v9532_v18, %v9532_v18  ;;  %v7758_v23 = vld [vmem:[%s11088_s1 + $0xa20] ss:$16 sps:$4 sm:$0xff]  }
 0x10b   :  { %5020 = vmatpush1.bf16.msra.mxu0 %v7666_v24  ;;  %5553 = vmatpush1.bf16.msra.mxu1 %v7669_v25  ;;  %v7761_v24 = vld [vmem:[%s11088_s1 + $0xa28] ss:$16 sps:$4 sm:$0xff]   ;;  %v7766_v25 = vld [vmem:[%s11088_s1 + $0xa44] ss:$16 sps:$4 sm:$0xff]  }
 0x10c   :  { %5021 = vmatprep.subr.bf16.mxu0 %v7674_v26  ;;  %5554 = vmatprep.subr.bf16.mxu1 %v7677_v27  ;;  %v7769_v26 = vld [vmem:[%s11088_s1 + $0xa4c] ss:$16 sps:$4 sm:$0xff]   ;;  %v7764_v27 = vld [vmem:[%s11088_s1 + $0xa40] ss:$16 sps:$4 sm:$0xff]  }
 0x10f   :  { %5022 = vmatpush1.bf16.msra.mxu0 %v7672_v28  ;;  %5555 = vmatpush1.bf16.msra.mxu1 %v7675_v29  ;;  %v7767_v28 = vld [vmem:[%s11088_s1 + $0xa48] ss:$16 sps:$4 sm:$0xff]   ;;  %v7772_v29 = vld [vmem:[%s11088_s1 + $0xa64] ss:$16 sps:$4 sm:$0xff]  }
 0x110   :  { %5023 = vmatprep.subr.bf16.mxu0 %v7680_v30  ;;  %5556 = vmatprep.subr.bf16.mxu1 %v7683_v31  ;;  %v7775_v30 = vld [vmem:[%s11088_s1 + $0xa6c] ss:$16 sps:$4 sm:$0xff]   ;;  %v7770_v31 = vld [vmem:[%s11088_s1 + $0xa60] ss:$16 sps:$4 sm:$0xff]  }
 0x113   :  { %5024 = vmatpush1.bf16.msra.mxu0 %v7678_v32  ;;  %5557 = vmatpush1.bf16.msra.mxu1 %v7681_v33  ;;  %v7773_v32 = vld [vmem:[%s11088_s1 + $0xa68] ss:$16 sps:$4 sm:$0xff]   ;;  %v7778_v33 = vld [vmem:[%s11088_s1 + $0xa84] ss:$16 sps:$4 sm:$0xff]  }
 0x114   :  { %5025 = vmatprep.subr.bf16.mxu0 %v7686_v34  ;;  %5558 = vmatprep.subr.bf16.mxu1 %v7689_v35  ;;  %v7781_v34 = vld [vmem:[%s11088_s1 + $0xa8c] ss:$16 sps:$4 sm:$0xff]   ;;  %v7776_v35 = vld [vmem:[%s11088_s1 + $0xa80] ss:$16 sps:$4 sm:$0xff]  }
 0x117   :  { %5026 = vmatpush1.bf16.msra.mxu0 %v7684_v36  ;;  %5559 = vmatpush1.bf16.msra.mxu1 %v7687_v37  ;;  %v7779_v36 = vld [vmem:[%s11088_s1 + $0xa88] ss:$16 sps:$4 sm:$0xff]   ;;  %v7784_v37 = vld [vmem:[%s11088_s1 + $0xaa4] ss:$16 sps:$4 sm:$0xff]  }
 0x118   :  { %5027 = vmatprep.subr.bf16.mxu0 %v7692_v38  ;;  %5560 = vmatprep.subr.bf16.mxu1 %v7695_v39  ;;  %v7787_v38 = vld [vmem:[%s11088_s1 + $0xaac] ss:$16 sps:$4 sm:$0xff]   ;;  %v7782_v39 = vld [vmem:[%s11088_s1 + $0xaa0] ss:$16 sps:$4 sm:$0xff]  }
 0x11b   :  { %5028 = vmatpush1.bf16.msra.mxu0 %v7690_v40  ;;  %5561 = vmatpush1.bf16.msra.mxu1 %v7693_v41  ;;  %v7785_v40 = vld [vmem:[%s11088_s1 + $0xaa8] ss:$16 sps:$4 sm:$0xff]   ;;  %v7790_v41 = vld [vmem:[%s11088_s1 + $0xac4] ss:$16 sps:$4 sm:$0xff]  }
 0x11c   :  { %5029 = vmatprep.subr.bf16.mxu0 %v7698_v42  ;;  %5562 = vmatprep.subr.bf16.mxu1 %v7701_v43  ;;  %v7793_v42 = vld [vmem:[%s11088_s1 + $0xacc] ss:$16 sps:$4 sm:$0xff]   ;;  %v7788_v43 = vld [vmem:[%s11088_s1 + $0xac0] ss:$16 sps:$4 sm:$0xff]  }
 0x11f   :  { %5030 = vmatpush1.bf16.msra.mxu0 %v7696_v44  ;;  %5563 = vmatpush1.bf16.msra.mxu1 %v7699_v45  ;;  %v7791_v44 = vld [vmem:[%s11088_s1 + $0xac8] ss:$16 sps:$4 sm:$0xff]   ;;  %v7796_v45 = vld [vmem:[%s11088_s1 + $0xae4] ss:$16 sps:$4 sm:$0xff]  }
 0x120   :  { %5031 = vmatprep.subr.bf16.mxu0 %v7704_v46  ;;  %5564 = vmatprep.subr.bf16.mxu1 %v7707_v47  ;;  %v7799_v46 = vld [vmem:[%s11088_s1 + $0xaec] ss:$16 sps:$4 sm:$0xff]   ;;  %v7794_v47 = vld [vmem:[%s11088_s1 + $0xae0] ss:$16 sps:$4 sm:$0xff]  }
 0x123   :  { %5032 = vmatpush1.bf16.msra.mxu0 %v7702_v48  ;;  %5565 = vmatpush1.bf16.msra.mxu1 %v7705_v49  ;;  %v7797_v48 = vld [vmem:[%s11088_s1 + $0xae8] ss:$16 sps:$4 sm:$0xff]   ;;  %v7802_v49 = vld [vmem:[%s11088_s1 + $0xb04] ss:$16 sps:$4 sm:$0xff]  }
 0x124   :  { %5033 = vmatprep.subr.bf16.mxu0 %v7710_v50  ;;  %5566 = vmatprep.subr.bf16.mxu1 %v7713_v51  ;;  %v7805_v50 = vld [vmem:[%s11088_s1 + $0xb0c] ss:$16 sps:$4 sm:$0xff]   ;;  %v7800_v51 = vld [vmem:[%s11088_s1 + $0xb00] ss:$16 sps:$4 sm:$0xff]  }
 0x127   :  { %5034 = vmatpush1.bf16.msra.mxu0 %v7708_v52  ;;  %5567 = vmatpush1.bf16.msra.mxu1 %v7711_v53  ;;  %v7803_v52 = vld [vmem:[%s11088_s1 + $0xb08] ss:$16 sps:$4 sm:$0xff]   ;;  %v7808_v53 = vld [vmem:[%s11088_s1 + $0xb24] ss:$16 sps:$4 sm:$0xff]  }
 0x128   :  { %5035 = vmatprep.subr.bf16.mxu0 %v7716_v54  ;;  %5568 = vmatprep.subr.bf16.mxu1 %v7719_v55  ;;  %v7811_v54 = vld [vmem:[%s11088_s1 + $0xb2c] ss:$16 sps:$4 sm:$0xff]   ;;  %v7806_v55 = vld [vmem:[%s11088_s1 + $0xb20] ss:$16 sps:$4 sm:$0xff]  }
 0x12b   :  { %5036 = vmatpush1.bf16.msra.mxu0 %v7714_v56  ;;  %5569 = vmatpush1.bf16.msra.mxu1 %v7717_v57  ;;  %v7809_v56 = vld [vmem:[%s11088_s1 + $0xb28] ss:$16 sps:$4 sm:$0xff]   ;;  %v7814_v57 = vld [vmem:[%s11088_s1 + $0xb44] ss:$16 sps:$4 sm:$0xff]  }
 0x12c   :  { %5037 = vmatprep.subr.bf16.mxu0 %v7722_v58  ;;  %5570 = vmatprep.subr.bf16.mxu1 %v7725_v59  ;;  %v7817_v58 = vld [vmem:[%s11088_s1 + $0xb4c] ss:$16 sps:$4 sm:$0xff]   ;;  %v7812_v59 = vld [vmem:[%s11088_s1 + $0xb40] ss:$16 sps:$4 sm:$0xff]  }
 0x12f   :  { %5038 = vmatpush1.bf16.msra.mxu0 %v7720_v60  ;;  %5571 = vmatpush1.bf16.msra.mxu1 %v7723_v61  ;;  %v7815_v60 = vld [vmem:[%s11088_s1 + $0xb48] ss:$16 sps:$4 sm:$0xff]   ;;  %v7820_v61 = vld [vmem:[%s11088_s1 + $0xb64] ss:$16 sps:$4 sm:$0xff]  }
 0x130   :  { %5039 = vmatprep.subr.bf16.mxu0 %v7728_v62  ;;  %5572 = vmatprep.subr.bf16.mxu1 %v7731_v63  ;;  %v7823_v62 = vld [vmem:[%s11088_s1 + $0xb6c] ss:$16 sps:$4 sm:$0xff]   ;;  %v7818_v63 = vld [vmem:[%s11088_s1 + $0xb60] ss:$16 sps:$4 sm:$0xff]  }
 0x133   :  { %5040 = vmatpush1.bf16.msra.mxu0 %v7726_v0  ;;  %5573 = vmatpush1.bf16.msra.mxu1 %v7729_v1  ;;  %v7821_v0 = vld [vmem:[%s11088_s1 + $0xb68] ss:$16 sps:$4 sm:$0xff]   ;;  %v7826_v1 = vld [vmem:[%s11088_s1 + $0xb84] ss:$16 sps:$4 sm:$0xff]  }
 0x134   :  { %5041 = vmatprep.subr.bf16.mxu0 %v7734_v2  ;;  %5574 = vmatprep.subr.bf16.mxu1 %v7737_v3  ;;  %v7829_v2 = vld [vmem:[%s11088_s1 + $0xb8c] ss:$16 sps:$4 sm:$0xff]   ;;  %v7824_v3 = vld [vmem:[%s11088_s1 + $0xb80] ss:$16 sps:$4 sm:$0xff]  }
 0x137   :  { %5042 = vmatpush1.bf16.msra.mxu0 %v7732_v4  ;;  %5575 = vmatpush1.bf16.msra.mxu1 %v7735_v5  ;;  %v7827_v4 = vld [vmem:[%s11088_s1 + $0xb88] ss:$16 sps:$4 sm:$0xff]   ;;  %v7832_v5 = vld [vmem:[%s11088_s1 + $0xba4] ss:$16 sps:$4 sm:$0xff]  }
 0x138   :  { %5043 = vmatprep.subr.bf16.mxu0 %v7740_v6  ;;  %5576 = vmatprep.subr.bf16.mxu1 %v7743_v7  ;;  %v7835_v6 = vld [vmem:[%s11088_s1 + $0xbac] ss:$16 sps:$4 sm:$0xff]   ;;  %v7830_v7 = vld [vmem:[%s11088_s1 + $0xba0] ss:$16 sps:$4 sm:$0xff]  }
 0x13b   :  { %5044 = vmatpush1.bf16.msra.mxu0 %v7738_v8  ;;  %5577 = vmatpush1.bf16.msra.mxu1 %v7741_v9  ;;  %v7833_v8 = vld [vmem:[%s11088_s1 + $0xba8] ss:$16 sps:$4 sm:$0xff]   ;;  %v7838_v9 = vld [vmem:[%s11088_s1 + $0xbc4] ss:$16 sps:$4 sm:$0xff]  }
 0x13c   :  { %5045 = vmatprep.subr.bf16.mxu0 %v7746_v10  ;;  %5578 = vmatprep.subr.bf16.mxu1 %v7749_v12  ;;  %v7841_v10 = vld [vmem:[%s11088_s1 + $0xbcc] ss:$16 sps:$4 sm:$0xff]   ;;  %v7836_v12 = vld [vmem:[%s11088_s1 + $0xbc0] ss:$16 sps:$4 sm:$0xff]  }
 0x13f   :  { %5046 = vmatpush1.bf16.msra.mxu0 %v7744_v13  ;;  %5579 = vmatpush1.bf16.msra.mxu1 %v7747_v15  ;;  %v7839_v13 = vld [vmem:[%s11088_s1 + $0xbc8] ss:$16 sps:$4 sm:$0xff]   ;;  %v7844_v15 = vld [vmem:[%s11088_s1 + $0xbe4] ss:$16 sps:$4 sm:$0xff]  }
 0x140   :  { %5056 = vmatprep.subr.bf16.mxu0 %v7754_v11  ;;  %5589 = vmatprep.subr.bf16.mxu1 %v7757_v17  ;;  %v7847_v11 = vld [vmem:[%s11088_s1 + $0xbec] ss:$16 sps:$4 sm:$0xff]   ;;  %v7842_v17 = vld [vmem:[%s11088_s1 + $0xbe0] ss:$16 sps:$4 sm:$0xff]  }
 0x142   :  { %5048 = vmatmul.mubr.bf16.vlgmr.msra.gmra.mrb[0].mxu0 %v6281_v14  ;;  %5581 = vmatmul.mubr.bf16.vlgmr.msra.gmra.mrb[0].mxu1 %v6281_v14  ;;  %v7845_v14 = vld [vmem:[%s11088_s1 + $0xbe8] ss:$16 sps:$4 sm:$0xff]  }
 0x143   :  { %5057 = vmatpush1.bf16.msra.mxu0 %v7752_v19  ;;  %5590 = vmatpush1.bf16.msra.mxu1 %v7755_v20  ;;  %v7852_v19 = vld [vmem:[%s11088_s1 + $0xc04] ss:$16 sps:$4 sm:$0xff]   ;;  %v7855_v20 = vld [vmem:[%s11088_s1 + $0xc0c] ss:$16 sps:$4 sm:$0xff]  }
 0x144   :  { %5058 = vmatprep.subr.bf16.mxu0 %v7760_v21  ;;  %5591 = vmatprep.subr.bf16.mxu1 %v7763_v16  ;;  %v9733_v21 = vld [vmem:[%s11089_s0 + $0x30] sm:$0xff]  ;;  %v6283_v16 = vcombine.low %v9532_v18, %v9532_v18  ;;  %v7861_v18 = vld [vmem:[%s11088_s1 + $0xc2c] ss:$16 sps:$4 sm:$0xff]  }
 0x145   :  { %5088 = vmatprep.mubr.bf16.mxu0 %v6284_v22  ;;  %5621 = vmatprep.mubr.bf16.mxu1 %v6284_v22  ;;  %v7850_v22 = vld [vmem:[%s11088_s1 + $0xc00] ss:$16 sps:$4 sm:$0xff]  }
 0x147   :  { %5059 = vmatpush1.bf16.msra.mxu0 %v7758_v23  ;;  %5592 = vmatpush1.bf16.msra.mxu1 %v7761_v24  ;;  %v7853_v23 = vld [vmem:[%s11088_s1 + $0xc08] ss:$16 sps:$4 sm:$0xff]   ;;  %v7858_v24 = vld [vmem:[%s11088_s1 + $0xc24] ss:$16 sps:$4 sm:$0xff]  }
 0x148   :  { %5060 = vmatprep.subr.bf16.mxu0 %v7766_v25  ;;  %5593 = vmatprep.subr.bf16.mxu1 %v7769_v26  ;;  %v6286_v25 = vcombine.high %v9733_v21, %v9733_v21  ;;  %v7856_v26 = vld [vmem:[%s11088_s1 + $0xc20] ss:$16 sps:$4 sm:$0xff]  }
 0x14b   :  { %5061 = vmatpush1.bf16.msra.mxu0 %v7764_v27  ;;  %5594 = vmatpush1.bf16.msra.mxu1 %v7767_v28  ;;  %v7859_v27 = vld [vmem:[%s11088_s1 + $0xc28] ss:$16 sps:$4 sm:$0xff]   ;;  %v7864_v28 = vld [vmem:[%s11088_s1 + $0xc44] ss:$16 sps:$4 sm:$0xff]  }
 0x14c   :  { %5062 = vmatprep.subr.bf16.mxu0 %v7772_v29  ;;  %5595 = vmatprep.subr.bf16.mxu1 %v7775_v30  ;;  %v7867_v29 = vld [vmem:[%s11088_s1 + $0xc4c] ss:$16 sps:$4 sm:$0xff]   ;;  %v7862_v30 = vld [vmem:[%s11088_s1 + $0xc40] ss:$16 sps:$4 sm:$0xff]  }
 0x14f   :  { %5063 = vmatpush1.bf16.msra.mxu0 %v7770_v31  ;;  %5596 = vmatpush1.bf16.msra.mxu1 %v7773_v32  ;;  %v7865_v31 = vld [vmem:[%s11088_s1 + $0xc48] ss:$16 sps:$4 sm:$0xff]   ;;  %v7870_v32 = vld [vmem:[%s11088_s1 + $0xc64] ss:$16 sps:$4 sm:$0xff]  }
 0x150   :  { %5064 = vmatprep.subr.bf16.mxu0 %v7778_v33  ;;  %5597 = vmatprep.subr.bf16.mxu1 %v7781_v34  ;;  %v7873_v33 = vld [vmem:[%s11088_s1 + $0xc6c] ss:$16 sps:$4 sm:$0xff]   ;;  %v7868_v34 = vld [vmem:[%s11088_s1 + $0xc60] ss:$16 sps:$4 sm:$0xff]  }
 0x153   :  { %5065 = vmatpush1.bf16.msra.mxu0 %v7776_v35  ;;  %5598 = vmatpush1.bf16.msra.mxu1 %v7779_v36  ;;  %v7871_v35 = vld [vmem:[%s11088_s1 + $0xc68] ss:$16 sps:$4 sm:$0xff]   ;;  %v7876_v36 = vld [vmem:[%s11088_s1 + $0xc84] ss:$16 sps:$4 sm:$0xff]  }
 0x154   :  { %5066 = vmatprep.subr.bf16.mxu0 %v7784_v37  ;;  %5599 = vmatprep.subr.bf16.mxu1 %v7787_v38  ;;  %v7879_v37 = vld [vmem:[%s11088_s1 + $0xc8c] ss:$16 sps:$4 sm:$0xff]   ;;  %v7874_v38 = vld [vmem:[%s11088_s1 + $0xc80] ss:$16 sps:$4 sm:$0xff]  }
 0x157   :  { %5067 = vmatpush1.bf16.msra.mxu0 %v7782_v39  ;;  %5600 = vmatpush1.bf16.msra.mxu1 %v7785_v40  ;;  %v7877_v39 = vld [vmem:[%s11088_s1 + $0xc88] ss:$16 sps:$4 sm:$0xff]   ;;  %v7882_v40 = vld [vmem:[%s11088_s1 + $0xca4] ss:$16 sps:$4 sm:$0xff]  }
 0x158   :  { %5068 = vmatprep.subr.bf16.mxu0 %v7790_v41  ;;  %5601 = vmatprep.subr.bf16.mxu1 %v7793_v42  ;;  %v7885_v41 = vld [vmem:[%s11088_s1 + $0xcac] ss:$16 sps:$4 sm:$0xff]   ;;  %v7880_v42 = vld [vmem:[%s11088_s1 + $0xca0] ss:$16 sps:$4 sm:$0xff]  }
 0x15b   :  { %5069 = vmatpush1.bf16.msra.mxu0 %v7788_v43  ;;  %5602 = vmatpush1.bf16.msra.mxu1 %v7791_v44  ;;  %v7883_v43 = vld [vmem:[%s11088_s1 + $0xca8] ss:$16 sps:$4 sm:$0xff]   ;;  %v7888_v44 = vld [vmem:[%s11088_s1 + $0xcc4] ss:$16 sps:$4 sm:$0xff]  }
 0x15c   :  { %5070 = vmatprep.subr.bf16.mxu0 %v7796_v45  ;;  %5603 = vmatprep.subr.bf16.mxu1 %v7799_v46  ;;  %v7891_v45 = vld [vmem:[%s11088_s1 + $0xccc] ss:$16 sps:$4 sm:$0xff]   ;;  %v7886_v46 = vld [vmem:[%s11088_s1 + $0xcc0] ss:$16 sps:$4 sm:$0xff]  }
 0x15f   :  { %5071 = vmatpush1.bf16.msra.mxu0 %v7794_v47  ;;  %5604 = vmatpush1.bf16.msra.mxu1 %v7797_v48  ;;  %v7889_v47 = vld [vmem:[%s11088_s1 + $0xcc8] ss:$16 sps:$4 sm:$0xff]   ;;  %v7894_v48 = vld [vmem:[%s11088_s1 + $0xce4] ss:$16 sps:$4 sm:$0xff]  }
 0x160   :  { %5072 = vmatprep.subr.bf16.mxu0 %v7802_v49  ;;  %5605 = vmatprep.subr.bf16.mxu1 %v7805_v50  ;;  %v7897_v49 = vld [vmem:[%s11088_s1 + $0xcec] ss:$16 sps:$4 sm:$0xff]   ;;  %v7892_v50 = vld [vmem:[%s11088_s1 + $0xce0] ss:$16 sps:$4 sm:$0xff]  }
 0x163   :  { %5073 = vmatpush1.bf16.msra.mxu0 %v7800_v51  ;;  %5606 = vmatpush1.bf16.msra.mxu1 %v7803_v52  ;;  %v7895_v51 = vld [vmem:[%s11088_s1 + $0xce8] ss:$16 sps:$4 sm:$0xff]   ;;  %v7900_v52 = vld [vmem:[%s11088_s1 + $0xd04] ss:$16 sps:$4 sm:$0xff]  }
 0x164   :  { %5074 = vmatprep.subr.bf16.mxu0 %v7808_v53  ;;  %5607 = vmatprep.subr.bf16.mxu1 %v7811_v54  ;;  %v7903_v53 = vld [vmem:[%s11088_s1 + $0xd0c] ss:$16 sps:$4 sm:$0xff]   ;;  %v7898_v54 = vld [vmem:[%s11088_s1 + $0xd00] ss:$16 sps:$4 sm:$0xff]  }
 0x167   :  { %5075 = vmatpush1.bf16.msra.mxu0 %v7806_v55  ;;  %5608 = vmatpush1.bf16.msra.mxu1 %v7809_v56  ;;  %v7901_v55 = vld [vmem:[%s11088_s1 + $0xd08] ss:$16 sps:$4 sm:$0xff]   ;;  %v7906_v56 = vld [vmem:[%s11088_s1 + $0xd24] ss:$16 sps:$4 sm:$0xff]  }
 0x168   :  { %5076 = vmatprep.subr.bf16.mxu0 %v7814_v57  ;;  %5609 = vmatprep.subr.bf16.mxu1 %v7817_v58  ;;  %v7909_v57 = vld [vmem:[%s11088_s1 + $0xd2c] ss:$16 sps:$4 sm:$0xff]   ;;  %v7904_v58 = vld [vmem:[%s11088_s1 + $0xd20] ss:$16 sps:$4 sm:$0xff]  }
 0x16b   :  { %5077 = vmatpush1.bf16.msra.mxu0 %v7812_v59  ;;  %5610 = vmatpush1.bf16.msra.mxu1 %v7815_v60  ;;  %v7907_v59 = vld [vmem:[%s11088_s1 + $0xd28] ss:$16 sps:$4 sm:$0xff]   ;;  %v7912_v60 = vld [vmem:[%s11088_s1 + $0xd44] ss:$16 sps:$4 sm:$0xff]  }
 0x16c   :  { %5078 = vmatprep.subr.bf16.mxu0 %v7820_v61  ;;  %5611 = vmatprep.subr.bf16.mxu1 %v7823_v62  ;;  %v7915_v61 = vld [vmem:[%s11088_s1 + $0xd4c] ss:$16 sps:$4 sm:$0xff]   ;;  %v7910_v62 = vld [vmem:[%s11088_s1 + $0xd40] ss:$16 sps:$4 sm:$0xff]  }
 0x16f   :  { %5079 = vmatpush1.bf16.msra.mxu0 %v7818_v63  ;;  %5612 = vmatpush1.bf16.msra.mxu1 %v7821_v0  ;;  %v7913_v63 = vld [vmem:[%s11088_s1 + $0xd48] ss:$16 sps:$4 sm:$0xff]   ;;  %v7918_v0 = vld [vmem:[%s11088_s1 + $0xd64] ss:$16 sps:$4 sm:$0xff]  }
 0x170   :  { %5080 = vmatprep.subr.bf16.mxu0 %v7826_v1  ;;  %5613 = vmatprep.subr.bf16.mxu1 %v7829_v2  ;;  %v7921_v1 = vld [vmem:[%s11088_s1 + $0xd6c] ss:$16 sps:$4 sm:$0xff]   ;;  %v7916_v2 = vld [vmem:[%s11088_s1 + $0xd60] ss:$16 sps:$4 sm:$0xff]  }
 0x173   :  { %5081 = vmatpush1.bf16.msra.mxu0 %v7824_v3  ;;  %5614 = vmatpush1.bf16.msra.mxu1 %v7827_v4  ;;  %v7919_v3 = vld [vmem:[%s11088_s1 + $0xd68] ss:$16 sps:$4 sm:$0xff]   ;;  %v7924_v4 = vld [vmem:[%s11088_s1 + $0xd84] ss:$16 sps:$4 sm:$0xff]  }
 0x174   :  { %5082 = vmatprep.subr.bf16.mxu0 %v7832_v5  ;;  %5615 = vmatprep.subr.bf16.mxu1 %v7835_v6  ;;  %v7927_v5 = vld [vmem:[%s11088_s1 + $0xd8c] ss:$16 sps:$4 sm:$0xff]   ;;  %v7922_v6 = vld [vmem:[%s11088_s1 + $0xd80] ss:$16 sps:$4 sm:$0xff]  }
 0x177   :  { %5083 = vmatpush1.bf16.msra.mxu0 %v7830_v7  ;;  %5616 = vmatpush1.bf16.msra.mxu1 %v7833_v8  ;;  %v7925_v7 = vld [vmem:[%s11088_s1 + $0xd88] ss:$16 sps:$4 sm:$0xff]   ;;  %v7930_v8 = vld [vmem:[%s11088_s1 + $0xda4] ss:$16 sps:$4 sm:$0xff]  }
 0x178   :  { %5084 = vmatprep.subr.bf16.mxu0 %v7838_v9  ;;  %5617 = vmatprep.subr.bf16.mxu1 %v7841_v10  ;;  %v7933_v9 = vld [vmem:[%s11088_s1 + $0xdac] ss:$16 sps:$4 sm:$0xff]   ;;  %v7928_v10 = vld [vmem:[%s11088_s1 + $0xda0] ss:$16 sps:$4 sm:$0xff]  }
 0x17b   :  { %5085 = vmatpush1.bf16.msra.mxu0 %v7836_v12  ;;  %5618 = vmatpush1.bf16.msra.mxu1 %v7839_v13  ;;  %v7931_v12 = vld [vmem:[%s11088_s1 + $0xda8] ss:$16 sps:$4 sm:$0xff]   ;;  %v7936_v13 = vld [vmem:[%s11088_s1 + $0xdc4] ss:$16 sps:$4 sm:$0xff]  }
 0x17c   :  { %5086 = vmatprep.subr.bf16.mxu0 %v7844_v15  ;;  %5619 = vmatprep.subr.bf16.mxu1 %v7847_v11  ;;  %v7939_v15 = vld [vmem:[%s11088_s1 + $0xdcc] ss:$16 sps:$4 sm:$0xff]   ;;  %v7934_v11 = vld [vmem:[%s11088_s1 + $0xdc0] ss:$16 sps:$4 sm:$0xff]  }
 0x17f   :  { %5087 = vmatpush1.bf16.msra.mxu0 %v7842_v17  ;;  %5620 = vmatpush1.bf16.msra.mxu1 %v7845_v14  ;;  %v7937_v17 = vld [vmem:[%s11088_s1 + $0xdc8] ss:$16 sps:$4 sm:$0xff]   ;;  %v7942_v14 = vld [vmem:[%s11088_s1 + $0xde4] ss:$16 sps:$4 sm:$0xff]  }
 0x180   :  { %5097 = vmatprep.subr.bf16.mxu0 %v7852_v19  ;;  %5630 = vmatprep.subr.bf16.mxu1 %v7855_v20  ;;  %v7945_v19 = vld [vmem:[%s11088_s1 + $0xdec] ss:$16 sps:$4 sm:$0xff]   ;;  %v7940_v20 = vld [vmem:[%s11088_s1 + $0xde0] ss:$16 sps:$4 sm:$0xff]  }
 0x182   :  { %5089 = vmatmul.mubr.bf16.vlgmr.msra.gmra.mrb[0].mxu0 %v6283_v16  ;;  %5622 = vmatmul.mubr.bf16.vlgmr.msra.gmra.mrb[0].mxu1 %v6283_v16  ;;  %v7943_v16 = vld [vmem:[%s11088_s1 + $0xde8] ss:$16 sps:$4 sm:$0xff]  }
 0x183   :  { %5098 = vmatpush1.bf16.msra.mxu0 %v7850_v22  ;;  %5631 = vmatpush1.bf16.msra.mxu1 %v7853_v23  ;;  %v7950_v22 = vld [vmem:[%s11088_s1 + $0xe04] ss:$16 sps:$4 sm:$0xff]   ;;  %v7953_v23 = vld [vmem:[%s11088_s1 + $0xe0c] ss:$16 sps:$4 sm:$0xff]  }
 0x184   :  { %5099 = vmatprep.subr.bf16.mxu0 %v7858_v24  ;;  %5632 = vmatprep.subr.bf16.mxu1 %v7861_v18  ;;  %v9934_v24 = vld [vmem:[%s11089_s0 + $0x38] sm:$0xff]  ;;  %v6285_v18 = vcombine.low %v9733_v21, %v9733_v21 }
 0x185   :  { %5129 = vmatprep.mubr.bf16.mxu0 %v6286_v25  ;;  %5662 = vmatprep.mubr.bf16.mxu1 %v6286_v25  ;;  %v7948_v25 = vld [vmem:[%s11088_s1 + $0xe00] ss:$16 sps:$4 sm:$0xff]   ;;  %v7959_v21 = vld [vmem:[%s11088_s1 + $0xe2c] ss:$16 sps:$4 sm:$0xff]  }
 0x187   :  { %5100 = vmatpush1.bf16.msra.mxu0 %v7856_v26  ;;  %5633 = vmatpush1.bf16.msra.mxu1 %v7859_v27  ;;  %v7951_v26 = vld [vmem:[%s11088_s1 + $0xe08] ss:$16 sps:$4 sm:$0xff]   ;;  %v7956_v27 = vld [vmem:[%s11088_s1 + $0xe24] ss:$16 sps:$4 sm:$0xff]  }
 0x188   :  { %5101 = vmatprep.subr.bf16.mxu0 %v7864_v28  ;;  %5634 = vmatprep.subr.bf16.mxu1 %v7867_v29  ;;  %v6288_v28 = vcombine.high %v9934_v24, %v9934_v24  ;;  %v7954_v29 = vld [vmem:[%s11088_s1 + $0xe20] ss:$16 sps:$4 sm:$0xff]  }
 0x18b   :  { %5102 = vmatpush1.bf16.msra.mxu0 %v7862_v30  ;;  %5635 = vmatpush1.bf16.msra.mxu1 %v7865_v31  ;;  %v7957_v30 = vld [vmem:[%s11088_s1 + $0xe28] ss:$16 sps:$4 sm:$0xff]   ;;  %v7962_v31 = vld [vmem:[%s11088_s1 + $0xe44] ss:$16 sps:$4 sm:$0xff]  }
 0x18c   :  { %5103 = vmatprep.subr.bf16.mxu0 %v7870_v32  ;;  %5636 = vmatprep.subr.bf16.mxu1 %v7873_v33  ;;  %v7965_v32 = vld [vmem:[%s11088_s1 + $0xe4c] ss:$16 sps:$4 sm:$0xff]   ;;  %v7960_v33 = vld [vmem:[%s11088_s1 + $0xe40] ss:$16 sps:$4 sm:$0xff]  }
 0x18f   :  { %5104 = vmatpush1.bf16.msra.mxu0 %v7868_v34  ;;  %5637 = vmatpush1.bf16.msra.mxu1 %v7871_v35  ;;  %v7963_v34 = vld [vmem:[%s11088_s1 + $0xe48] ss:$16 sps:$4 sm:$0xff]   ;;  %v7968_v35 = vld [vmem:[%s11088_s1 + $0xe64] ss:$16 sps:$4 sm:$0xff]  }
 0x190   :  { %5105 = vmatprep.subr.bf16.mxu0 %v7876_v36  ;;  %5638 = vmatprep.subr.bf16.mxu1 %v7879_v37  ;;  %v7971_v36 = vld [vmem:[%s11088_s1 + $0xe6c] ss:$16 sps:$4 sm:$0xff]   ;;  %v7966_v37 = vld [vmem:[%s11088_s1 + $0xe60] ss:$16 sps:$4 sm:$0xff]  }
 0x193   :  { %5106 = vmatpush1.bf16.msra.mxu0 %v7874_v38  ;;  %5639 = vmatpush1.bf16.msra.mxu1 %v7877_v39  ;;  %v7969_v38 = vld [vmem:[%s11088_s1 + $0xe68] ss:$16 sps:$4 sm:$0xff]   ;;  %v7974_v39 = vld [vmem:[%s11088_s1 + $0xe84] ss:$16 sps:$4 sm:$0xff]  }
 0x194   :  { %5107 = vmatprep.subr.bf16.mxu0 %v7882_v40  ;;  %5640 = vmatprep.subr.bf16.mxu1 %v7885_v41  ;;  %v7977_v40 = vld [vmem:[%s11088_s1 + $0xe8c] ss:$16 sps:$4 sm:$0xff]   ;;  %v7972_v41 = vld [vmem:[%s11088_s1 + $0xe80] ss:$16 sps:$4 sm:$0xff]  }
 0x197   :  { %5108 = vmatpush1.bf16.msra.mxu0 %v7880_v42  ;;  %5641 = vmatpush1.bf16.msra.mxu1 %v7883_v43  ;;  %v7975_v42 = vld [vmem:[%s11088_s1 + $0xe88] ss:$16 sps:$4 sm:$0xff]   ;;  %v7980_v43 = vld [vmem:[%s11088_s1 + $0xea4] ss:$16 sps:$4 sm:$0xff]  }
 0x198   :  { %5109 = vmatprep.subr.bf16.mxu0 %v7888_v44  ;;  %5642 = vmatprep.subr.bf16.mxu1 %v7891_v45  ;;  %v7983_v44 = vld [vmem:[%s11088_s1 + $0xeac] ss:$16 sps:$4 sm:$0xff]   ;;  %v7978_v45 = vld [vmem:[%s11088_s1 + $0xea0] ss:$16 sps:$4 sm:$0xff]  }
 0x19b   :  { %5110 = vmatpush1.bf16.msra.mxu0 %v7886_v46  ;;  %5643 = vmatpush1.bf16.msra.mxu1 %v7889_v47  ;;  %v7981_v46 = vld [vmem:[%s11088_s1 + $0xea8] ss:$16 sps:$4 sm:$0xff]   ;;  %v7986_v47 = vld [vmem:[%s11088_s1 + $0xec4] ss:$16 sps:$4 sm:$0xff]  }
 0x19c   :  { %5111 = vmatprep.subr.bf16.mxu0 %v7894_v48  ;;  %5644 = vmatprep.subr.bf16.mxu1 %v7897_v49  ;;  %v7989_v48 = vld [vmem:[%s11088_s1 + $0xecc] ss:$16 sps:$4 sm:$0xff]   ;;  %v7984_v49 = vld [vmem:[%s11088_s1 + $0xec0] ss:$16 sps:$4 sm:$0xff]  }
 0x19f   :  { %5112 = vmatpush1.bf16.msra.mxu0 %v7892_v50  ;;  %5645 = vmatpush1.bf16.msra.mxu1 %v7895_v51  ;;  %v7987_v50 = vld [vmem:[%s11088_s1 + $0xec8] ss:$16 sps:$4 sm:$0xff]   ;;  %v7992_v51 = vld [vmem:[%s11088_s1 + $0xee4] ss:$16 sps:$4 sm:$0xff]  }
 0x1a0   :  { %5113 = vmatprep.subr.bf16.mxu0 %v7900_v52  ;;  %5646 = vmatprep.subr.bf16.mxu1 %v7903_v53  ;;  %v7995_v52 = vld [vmem:[%s11088_s1 + $0xeec] ss:$16 sps:$4 sm:$0xff]   ;;  %v7990_v53 = vld [vmem:[%s11088_s1 + $0xee0] ss:$16 sps:$4 sm:$0xff]  }
 0x1a3   :  { %5114 = vmatpush1.bf16.msra.mxu0 %v7898_v54  ;;  %5647 = vmatpush1.bf16.msra.mxu1 %v7901_v55  ;;  %v7993_v54 = vld [vmem:[%s11088_s1 + $0xee8] ss:$16 sps:$4 sm:$0xff]   ;;  %v7998_v55 = vld [vmem:[%s11088_s1 + $0xf04] ss:$16 sps:$4 sm:$0xff]  }
 0x1a4   :  { %5115 = vmatprep.subr.bf16.mxu0 %v7906_v56  ;;  %5648 = vmatprep.subr.bf16.mxu1 %v7909_v57  ;;  %v8001_v56 = vld [vmem:[%s11088_s1 + $0xf0c] ss:$16 sps:$4 sm:$0xff]   ;;  %v7996_v57 = vld [vmem:[%s11088_s1 + $0xf00] ss:$16 sps:$4 sm:$0xff]  }
 0x1a7   :  { %5116 = vmatpush1.bf16.msra.mxu0 %v7904_v58  ;;  %5649 = vmatpush1.bf16.msra.mxu1 %v7907_v59  ;;  %v7999_v58 = vld [vmem:[%s11088_s1 + $0xf08] ss:$16 sps:$4 sm:$0xff]   ;;  %v8004_v59 = vld [vmem:[%s11088_s1 + $0xf24] ss:$16 sps:$4 sm:$0xff]  }
 0x1a8   :  { %5117 = vmatprep.subr.bf16.mxu0 %v7912_v60  ;;  %5650 = vmatprep.subr.bf16.mxu1 %v7915_v61  ;;  %v8007_v60 = vld [vmem:[%s11088_s1 + $0xf2c] ss:$16 sps:$4 sm:$0xff]   ;;  %v8002_v61 = vld [vmem:[%s11088_s1 + $0xf20] ss:$16 sps:$4 sm:$0xff]  }
 0x1ab   :  { %5118 = vmatpush1.bf16.msra.mxu0 %v7910_v62  ;;  %5651 = vmatpush1.bf16.msra.mxu1 %v7913_v63  ;;  %v8005_v62 = vld [vmem:[%s11088_s1 + $0xf28] ss:$16 sps:$4 sm:$0xff]   ;;  %v8010_v63 = vld [vmem:[%s11088_s1 + $0xf44] ss:$16 sps:$4 sm:$0xff]  }
 0x1ac   :  { %5119 = vmatprep.subr.bf16.mxu0 %v7918_v0  ;;  %5652 = vmatprep.subr.bf16.mxu1 %v7921_v1  ;;  %v8013_v0 = vld [vmem:[%s11088_s1 + $0xf4c] ss:$16 sps:$4 sm:$0xff]   ;;  %v8008_v1 = vld [vmem:[%s11088_s1 + $0xf40] ss:$16 sps:$4 sm:$0xff]  }
 0x1af   :  { %5120 = vmatpush1.bf16.msra.mxu0 %v7916_v2  ;;  %5653 = vmatpush1.bf16.msra.mxu1 %v7919_v3  ;;  %v8011_v2 = vld [vmem:[%s11088_s1 + $0xf48] ss:$16 sps:$4 sm:$0xff]   ;;  %v8016_v3 = vld [vmem:[%s11088_s1 + $0xf64] ss:$16 sps:$4 sm:$0xff]  }
 0x1b0   :  { %5121 = vmatprep.subr.bf16.mxu0 %v7924_v4  ;;  %5654 = vmatprep.subr.bf16.mxu1 %v7927_v5  ;;  %v8019_v4 = vld [vmem:[%s11088_s1 + $0xf6c] ss:$16 sps:$4 sm:$0xff]   ;;  %v8014_v5 = vld [vmem:[%s11088_s1 + $0xf60] ss:$16 sps:$4 sm:$0xff]  }
 0x1b3   :  { %5122 = vmatpush1.bf16.msra.mxu0 %v7922_v6  ;;  %5655 = vmatpush1.bf16.msra.mxu1 %v7925_v7  ;;  %v8017_v6 = vld [vmem:[%s11088_s1 + $0xf68] ss:$16 sps:$4 sm:$0xff]   ;;  %v8022_v7 = vld [vmem:[%s11088_s1 + $0xf84] ss:$16 sps:$4 sm:$0xff]  }
 0x1b4   :  { %5123 = vmatprep.subr.bf16.mxu0 %v7930_v8  ;;  %5656 = vmatprep.subr.bf16.mxu1 %v7933_v9  ;;  %v8025_v8 = vld [vmem:[%s11088_s1 + $0xf8c] ss:$16 sps:$4 sm:$0xff]   ;;  %v8020_v9 = vld [vmem:[%s11088_s1 + $0xf80] ss:$16 sps:$4 sm:$0xff]  }
 0x1b7   :  { %5124 = vmatpush1.bf16.msra.mxu0 %v7928_v10  ;;  %5657 = vmatpush1.bf16.msra.mxu1 %v7931_v12  ;;  %v8023_v10 = vld [vmem:[%s11088_s1 + $0xf88] ss:$16 sps:$4 sm:$0xff]   ;;  %v8028_v12 = vld [vmem:[%s11088_s1 + $0xfa4] ss:$16 sps:$4 sm:$0xff]  }
 0x1b8   :  { %5125 = vmatprep.subr.bf16.mxu0 %v7936_v13  ;;  %5658 = vmatprep.subr.bf16.mxu1 %v7939_v15  ;;  %v8031_v13 = vld [vmem:[%s11088_s1 + $0xfac] ss:$16 sps:$4 sm:$0xff]   ;;  %v8026_v15 = vld [vmem:[%s11088_s1 + $0xfa0] ss:$16 sps:$4 sm:$0xff]  }
 0x1bb   :  { %5126 = vmatpush1.bf16.msra.mxu0 %v7934_v11  ;;  %5659 = vmatpush1.bf16.msra.mxu1 %v7937_v17  ;;  %v8029_v11 = vld [vmem:[%s11088_s1 + $0xfa8] ss:$16 sps:$4 sm:$0xff]   ;;  %v8034_v17 = vld [vmem:[%s11088_s1 + $0xfc4] ss:$16 sps:$4 sm:$0xff]  }
 0x1bc   :  { %5127 = vmatprep.subr.bf16.mxu0 %v7942_v14  ;;  %5660 = vmatprep.subr.bf16.mxu1 %v7945_v19  ;;  %v8037_v14 = vld [vmem:[%s11088_s1 + $0xfcc] ss:$16 sps:$4 sm:$0xff]   ;;  %v8032_v19 = vld [vmem:[%s11088_s1 + $0xfc0] ss:$16 sps:$4 sm:$0xff]  }
 0x1bf   :  { %5128 = vmatpush1.bf16.msra.mxu0 %v7940_v20  ;;  %5661 = vmatpush1.bf16.msra.mxu1 %v7943_v16  ;;  %v8035_v20 = vld [vmem:[%s11088_s1 + $0xfc8] ss:$16 sps:$4 sm:$0xff]   ;;  %v8040_v16 = vld [vmem:[%s11088_s1 + $0xfe4] ss:$16 sps:$4 sm:$0xff]  }
 0x1c0   :  { %5138 = vmatprep.subr.bf16.mxu0 %v7950_v22  ;;  %5671 = vmatprep.subr.bf16.mxu1 %v7953_v23  ;;  %v8043_v22 = vld [vmem:[%s11088_s1 + $0xfec] ss:$16 sps:$4 sm:$0xff]   ;;  %v8038_v23 = vld [vmem:[%s11088_s1 + $0xfe0] ss:$16 sps:$4 sm:$0xff]  }
 0x1c2   :  { %5130 = vmatmul.mubr.bf16.vlgmr.msra.gmra.mrb[0].mxu0 %v6285_v18  ;;  %5663 = vmatmul.mubr.bf16.vlgmr.msra.gmra.mrb[0].mxu1 %v6285_v18  ;;  %v8041_v18 = vld [vmem:[%s11088_s1 + $0xfe8] ss:$16 sps:$4 sm:$0xff]  }
 0x1c3   :  { %5139 = vmatpush1.bf16.msra.mxu0 %v7948_v25  ;;  %5672 = vmatpush1.bf16.msra.mxu1 %v7951_v26  ;;  %v8048_v25 = vld [vmem:[%s11088_s1 + $0x1004] ss:$16 sps:$4 sm:$0xff]   ;;  %v8051_v26 = vld [vmem:[%s11088_s1 + $0x100c] ss:$16 sps:$4 sm:$0xff]  }
 0x1c4   :  { %5140 = vmatprep.subr.bf16.mxu0 %v7956_v27  ;;  %5673 = vmatprep.subr.bf16.mxu1 %v7959_v21  ;;  %v6287_v27 = vcombine.low %v9934_v24, %v9934_v24  ;;  %v10137_v21 = vld [vmem:[%s11089_s0 + $0x40] sm:$0xff] }
 0x1c5   :  { %5170 = vmatprep.mubr.bf16.mxu0 %v6288_v28  ;;  %5703 = vmatprep.mubr.bf16.mxu1 %v6288_v28  ;;  %v8046_v28 = vld [vmem:[%s11088_s1 + $0x1000] ss:$16 sps:$4 sm:$0xff]   ;;  %v8054_v24 = vld [vmem:[%s11088_s1 + $0x1024] ss:$16 sps:$4 sm:$0xff]  }
 0x1c7   :  { %5141 = vmatpush1.bf16.msra.mxu0 %v7954_v29  ;;  %5674 = vmatpush1.bf16.msra.mxu1 %v7957_v30  ;;  %v8049_v29 = vld [vmem:[%s11088_s1 + $0x1008] ss:$16 sps:$4 sm:$0xff]   ;;  %v8057_v30 = vld [vmem:[%s11088_s1 + $0x102c] ss:$16 sps:$4 sm:$0xff]  }
 0x1c8   :  { %5142 = vmatprep.subr.bf16.mxu0 %v7962_v31  ;;  %5675 = vmatprep.subr.bf16.mxu1 %v7965_v32  ;;  %v6290_v31 = vcombine.high %v10137_v21, %v10137_v21  ;;  %v8052_v32 = vld [vmem:[%s11088_s1 + $0x1020] ss:$16 sps:$4 sm:$0xff]  }
 0x1cb   :  { %5143 = vmatpush1.bf16.msra.mxu0 %v7960_v33  ;;  %5676 = vmatpush1.bf16.msra.mxu1 %v7963_v34  ;;  %v8055_v33 = vld [vmem:[%s11088_s1 + $0x1028] ss:$16 sps:$4 sm:$0xff]   ;;  %v8060_v34 = vld [vmem:[%s11088_s1 + $0x1044] ss:$16 sps:$4 sm:$0xff]  }
 0x1cc   :  { %5144 = vmatprep.subr.bf16.mxu0 %v7968_v35  ;;  %5677 = vmatprep.subr.bf16.mxu1 %v7971_v36  ;;  %v8063_v35 = vld [vmem:[%s11088_s1 + $0x104c] ss:$16 sps:$4 sm:$0xff]   ;;  %v8058_v36 = vld [vmem:[%s11088_s1 + $0x1040] ss:$16 sps:$4 sm:$0xff]  }
 0x1cf   :  { %5145 = vmatpush1.bf16.msra.mxu0 %v7966_v37  ;;  %5678 = vmatpush1.bf16.msra.mxu1 %v7969_v38  ;;  %v8061_v37 = vld [vmem:[%s11088_s1 + $0x1048] ss:$16 sps:$4 sm:$0xff]   ;;  %v8066_v38 = vld [vmem:[%s11088_s1 + $0x1064] ss:$16 sps:$4 sm:$0xff]  }
 0x1d0   :  { %5146 = vmatprep.subr.bf16.mxu0 %v7974_v39  ;;  %5679 = vmatprep.subr.bf16.mxu1 %v7977_v40  ;;  %v8069_v39 = vld [vmem:[%s11088_s1 + $0x106c] ss:$16 sps:$4 sm:$0xff]   ;;  %v8064_v40 = vld [vmem:[%s11088_s1 + $0x1060] ss:$16 sps:$4 sm:$0xff]  }
 0x1d3   :  { %5147 = vmatpush1.bf16.msra.mxu0 %v7972_v41  ;;  %5680 = vmatpush1.bf16.msra.mxu1 %v7975_v42  ;;  %v8067_v41 = vld [vmem:[%s11088_s1 + $0x1068] ss:$16 sps:$4 sm:$0xff]   ;;  %v8072_v42 = vld [vmem:[%s11088_s1 + $0x1084] ss:$16 sps:$4 sm:$0xff]  }
 0x1d4   :  { %5148 = vmatprep.subr.bf16.mxu0 %v7980_v43  ;;  %5681 = vmatprep.subr.bf16.mxu1 %v7983_v44  ;;  %v8075_v43 = vld [vmem:[%s11088_s1 + $0x108c] ss:$16 sps:$4 sm:$0xff]   ;;  %v8070_v44 = vld [vmem:[%s11088_s1 + $0x1080] ss:$16 sps:$4 sm:$0xff]  }
 0x1d7   :  { %5149 = vmatpush1.bf16.msra.mxu0 %v7978_v45  ;;  %5682 = vmatpush1.bf16.msra.mxu1 %v7981_v46  ;;  %v8073_v45 = vld [vmem:[%s11088_s1 + $0x1088] ss:$16 sps:$4 sm:$0xff]   ;;  %v8078_v46 = vld [vmem:[%s11088_s1 + $0x10a4] ss:$16 sps:$4 sm:$0xff]  }
 0x1d8   :  { %5150 = vmatprep.subr.bf16.mxu0 %v7986_v47  ;;  %5683 = vmatprep.subr.bf16.mxu1 %v7989_v48  ;;  %v8081_v47 = vld [vmem:[%s11088_s1 + $0x10ac] ss:$16 sps:$4 sm:$0xff]   ;;  %v8076_v48 = vld [vmem:[%s11088_s1 + $0x10a0] ss:$16 sps:$4 sm:$0xff]  }
 0x1db   :  { %5151 = vmatpush1.bf16.msra.mxu0 %v7984_v49  ;;  %5684 = vmatpush1.bf16.msra.mxu1 %v7987_v50  ;;  %v8079_v49 = vld [vmem:[%s11088_s1 + $0x10a8] ss:$16 sps:$4 sm:$0xff]   ;;  %v8084_v50 = vld [vmem:[%s11088_s1 + $0x10c4] ss:$16 sps:$4 sm:$0xff]  }
 0x1dc   :  { %5152 = vmatprep.subr.bf16.mxu0 %v7992_v51  ;;  %5685 = vmatprep.subr.bf16.mxu1 %v7995_v52  ;;  %v8087_v51 = vld [vmem:[%s11088_s1 + $0x10cc] ss:$16 sps:$4 sm:$0xff]   ;;  %v8082_v52 = vld [vmem:[%s11088_s1 + $0x10c0] ss:$16 sps:$4 sm:$0xff]  }
 0x1df   :  { %5153 = vmatpush1.bf16.msra.mxu0 %v7990_v53  ;;  %5686 = vmatpush1.bf16.msra.mxu1 %v7993_v54  ;;  %v8085_v53 = vld [vmem:[%s11088_s1 + $0x10c8] ss:$16 sps:$4 sm:$0xff]   ;;  %v8090_v54 = vld [vmem:[%s11088_s1 + $0x10e4] ss:$16 sps:$4 sm:$0xff]  }
 0x1e0   :  { %5154 = vmatprep.subr.bf16.mxu0 %v7998_v55  ;;  %5687 = vmatprep.subr.bf16.mxu1 %v8001_v56  ;;  %v8093_v55 = vld [vmem:[%s11088_s1 + $0x10ec] ss:$16 sps:$4 sm:$0xff]   ;;  %v8088_v56 = vld [vmem:[%s11088_s1 + $0x10e0] ss:$16 sps:$4 sm:$0xff]  }
 0x1e3   :  { %5155 = vmatpush1.bf16.msra.mxu0 %v7996_v57  ;;  %5688 = vmatpush1.bf16.msra.mxu1 %v7999_v58  ;;  %v8091_v57 = vld [vmem:[%s11088_s1 + $0x10e8] ss:$16 sps:$4 sm:$0xff]   ;;  %v8096_v58 = vld [vmem:[%s11088_s1 + $0x1104] ss:$16 sps:$4 sm:$0xff]  }
 0x1e4   :  { %5156 = vmatprep.subr.bf16.mxu0 %v8004_v59  ;;  %5689 = vmatprep.subr.bf16.mxu1 %v8007_v60  ;;  %v8099_v59 = vld [vmem:[%s11088_s1 + $0x110c] ss:$16 sps:$4 sm:$0xff]   ;;  %v8094_v60 = vld [vmem:[%s11088_s1 + $0x1100] ss:$16 sps:$4 sm:$0xff]  }
 0x1e7   :  { %5157 = vmatpush1.bf16.msra.mxu0 %v8002_v61  ;;  %5690 = vmatpush1.bf16.msra.mxu1 %v8005_v62  ;;  %v8097_v61 = vld [vmem:[%s11088_s1 + $0x1108] ss:$16 sps:$4 sm:$0xff]   ;;  %v8102_v62 = vld [vmem:[%s11088_s1 + $0x1124] ss:$16 sps:$4 sm:$0xff]  }
 0x1e8   :  { %5158 = vmatprep.subr.bf16.mxu0 %v8010_v63  ;;  %5691 = vmatprep.subr.bf16.mxu1 %v8013_v0  ;;  %v8105_v63 = vld [vmem:[%s11088_s1 + $0x112c] ss:$16 sps:$4 sm:$0xff]   ;;  %v8100_v0 = vld [vmem:[%s11088_s1 + $0x1120] ss:$16 sps:$4 sm:$0xff]  }
 0x1eb   :  { %5159 = vmatpush1.bf16.msra.mxu0 %v8008_v1  ;;  %5692 = vmatpush1.bf16.msra.mxu1 %v8011_v2  ;;  %v8103_v1 = vld [vmem:[%s11088_s1 + $0x1128] ss:$16 sps:$4 sm:$0xff]   ;;  %v8108_v2 = vld [vmem:[%s11088_s1 + $0x1144] ss:$16 sps:$4 sm:$0xff]  }
 0x1ec   :  { %5160 = vmatprep.subr.bf16.mxu0 %v8016_v3  ;;  %5693 = vmatprep.subr.bf16.mxu1 %v8019_v4  ;;  %v8111_v3 = vld [vmem:[%s11088_s1 + $0x114c] ss:$16 sps:$4 sm:$0xff]   ;;  %v8106_v4 = vld [vmem:[%s11088_s1 + $0x1140] ss:$16 sps:$4 sm:$0xff]  }
 0x1ef   :  { %5161 = vmatpush1.bf16.msra.mxu0 %v8014_v5  ;;  %5694 = vmatpush1.bf16.msra.mxu1 %v8017_v6  ;;  %v8109_v5 = vld [vmem:[%s11088_s1 + $0x1148] ss:$16 sps:$4 sm:$0xff]   ;;  %v8114_v6 = vld [vmem:[%s11088_s1 + $0x1164] ss:$16 sps:$4 sm:$0xff]  }
 0x1f0   :  { %5162 = vmatprep.subr.bf16.mxu0 %v8022_v7  ;;  %5695 = vmatprep.subr.bf16.mxu1 %v8025_v8  ;;  %v8117_v7 = vld [vmem:[%s11088_s1 + $0x116c] ss:$16 sps:$4 sm:$0xff]   ;;  %v8112_v8 = vld [vmem:[%s11088_s1 + $0x1160] ss:$16 sps:$4 sm:$0xff]  }
 0x1f3   :  { %5163 = vmatpush1.bf16.msra.mxu0 %v8020_v9  ;;  %5696 = vmatpush1.bf16.msra.mxu1 %v8023_v10  ;;  %v8115_v9 = vld [vmem:[%s11088_s1 + $0x1168] ss:$16 sps:$4 sm:$0xff]   ;;  %v8120_v10 = vld [vmem:[%s11088_s1 + $0x1184] ss:$16 sps:$4 sm:$0xff]  }
 0x1f4   :  { %5164 = vmatprep.subr.bf16.mxu0 %v8028_v12  ;;  %5697 = vmatprep.subr.bf16.mxu1 %v8031_v13  ;;  %v8123_v12 = vld [vmem:[%s11088_s1 + $0x118c] ss:$16 sps:$4 sm:$0xff]   ;;  %v8118_v13 = vld [vmem:[%s11088_s1 + $0x1180] ss:$16 sps:$4 sm:$0xff]  }
 0x1f7   :  { %5165 = vmatpush1.bf16.msra.mxu0 %v8026_v15  ;;  %5698 = vmatpush1.bf16.msra.mxu1 %v8029_v11  ;;  %v8121_v15 = vld [vmem:[%s11088_s1 + $0x1188] ss:$16 sps:$4 sm:$0xff]   ;;  %v8126_v11 = vld [vmem:[%s11088_s1 + $0x11a4] ss:$16 sps:$4 sm:$0xff]  }
 0x1f8   :  { %5166 = vmatprep.subr.bf16.mxu0 %v8034_v17  ;;  %5699 = vmatprep.subr.bf16.mxu1 %v8037_v14  ;;  %v8129_v17 = vld [vmem:[%s11088_s1 + $0x11ac] ss:$16 sps:$4 sm:$0xff]   ;;  %v8124_v14 = vld [vmem:[%s11088_s1 + $0x11a0] ss:$16 sps:$4 sm:$0xff]  }
 0x1fb   :  { %5167 = vmatpush1.bf16.msra.mxu0 %v8032_v19  ;;  %5700 = vmatpush1.bf16.msra.mxu1 %v8035_v20  ;;  %v8127_v19 = vld [vmem:[%s11088_s1 + $0x11a8] ss:$16 sps:$4 sm:$0xff]   ;;  %v8132_v20 = vld [vmem:[%s11088_s1 + $0x11c4] ss:$16 sps:$4 sm:$0xff]  }
 0x1fc   :  { %5168 = vmatprep.subr.bf16.mxu0 %v8040_v16  ;;  %5701 = vmatprep.subr.bf16.mxu1 %v8043_v22  ;;  %v8135_v16 = vld [vmem:[%s11088_s1 + $0x11cc] ss:$16 sps:$4 sm:$0xff]   ;;  %v8130_v22 = vld [vmem:[%s11088_s1 + $0x11c0] ss:$16 sps:$4 sm:$0xff]  }
 0x1ff   :  { %5169 = vmatpush1.bf16.msra.mxu0 %v8038_v23  ;;  %5702 = vmatpush1.bf16.msra.mxu1 %v8041_v18  ;;  %v8133_v23 = vld [vmem:[%s11088_s1 + $0x11c8] ss:$16 sps:$4 sm:$0xff]   ;;  %v8138_v18 = vld [vmem:[%s11088_s1 + $0x11e4] ss:$16 sps:$4 sm:$0xff]  }
 0x200   :  { %5179 = vmatprep.subr.bf16.mxu0 %v8048_v25  ;;  %5712 = vmatprep.subr.bf16.mxu1 %v8051_v26  ;;  %v8141_v25 = vld [vmem:[%s11088_s1 + $0x11ec] ss:$16 sps:$4 sm:$0xff]   ;;  %v8136_v26 = vld [vmem:[%s11088_s1 + $0x11e0] ss:$16 sps:$4 sm:$0xff]  }
 0x202   :  { %5171 = vmatmul.mubr.bf16.vlgmr.msra.gmra.mrb[0].mxu0 %v6287_v27  ;;  %5704 = vmatmul.mubr.bf16.vlgmr.msra.gmra.mrb[0].mxu1 %v6287_v27  ;;  %v8139_v27 = vld [vmem:[%s11088_s1 + $0x11e8] ss:$16 sps:$4 sm:$0xff]  }
 0x203   :  { %5180 = vmatpush1.bf16.msra.mxu0 %v8046_v28  ;;  %5713 = vmatpush1.bf16.msra.mxu1 %v8049_v29  ;;  %v8146_v28 = vld [vmem:[%s11088_s1 + $0x1204] ss:$16 sps:$4 sm:$0xff]   ;;  %v8149_v29 = vld [vmem:[%s11088_s1 + $0x120c] ss:$16 sps:$4 sm:$0xff]  }
 0x204   :  { %5181 = vmatprep.subr.bf16.mxu0 %v8054_v24  ;;  %5714 = vmatprep.subr.bf16.mxu1 %v8057_v30  ;;  %v6289_v24 = vcombine.low %v10137_v21, %v10137_v21  ;;  %v10338_v30 = vld [vmem:[%s11089_s0 + $0x48] sm:$0xff]  ;;  %v8152_v21 = vld [vmem:[%s11088_s1 + $0x1224] ss:$16 sps:$4 sm:$0xff]  }
 0x205   :  { %5211 = vmatprep.mubr.bf16.mxu0 %v6290_v31  ;;  %5744 = vmatprep.mubr.bf16.mxu1 %v6290_v31  ;;  %v8144_v31 = vld [vmem:[%s11088_s1 + $0x1200] ss:$16 sps:$4 sm:$0xff]  }
 0x207   :  { %5182 = vmatpush1.bf16.msra.mxu0 %v8052_v32  ;;  %5715 = vmatpush1.bf16.msra.mxu1 %v8055_v33  ;;  %v8147_v32 = vld [vmem:[%s11088_s1 + $0x1208] ss:$16 sps:$4 sm:$0xff]   ;;  %v8155_v33 = vld [vmem:[%s11088_s1 + $0x122c] ss:$16 sps:$4 sm:$0xff]  }
 0x208   :  { %5183 = vmatprep.subr.bf16.mxu0 %v8060_v34  ;;  %5716 = vmatprep.subr.bf16.mxu1 %v8063_v35  ;;  %v6292_v34 = vcombine.high %v10338_v30, %v10338_v30  ;;  %v8150_v35 = vld [vmem:[%s11088_s1 + $0x1220] ss:$16 sps:$4 sm:$0xff]  }
 0x20b   :  { %5184 = vmatpush1.bf16.msra.mxu0 %v8058_v36  ;;  %5717 = vmatpush1.bf16.msra.mxu1 %v8061_v37  ;;  %v8153_v36 = vld [vmem:[%s11088_s1 + $0x1228] ss:$16 sps:$4 sm:$0xff]   ;;  %v8158_v37 = vld [vmem:[%s11088_s1 + $0x1244] ss:$16 sps:$4 sm:$0xff]  }
 0x20c   :  { %5185 = vmatprep.subr.bf16.mxu0 %v8066_v38  ;;  %5718 = vmatprep.subr.bf16.mxu1 %v8069_v39  ;;  %v8161_v38 = vld [vmem:[%s11088_s1 + $0x124c] ss:$16 sps:$4 sm:$0xff]   ;;  %v8156_v39 = vld [vmem:[%s11088_s1 + $0x1240] ss:$16 sps:$4 sm:$0xff]  }
 0x20f   :  { %5186 = vmatpush1.bf16.msra.mxu0 %v8064_v40  ;;  %5719 = vmatpush1.bf16.msra.mxu1 %v8067_v41  ;;  %v8159_v40 = vld [vmem:[%s11088_s1 + $0x1248] ss:$16 sps:$4 sm:$0xff]   ;;  %v8164_v41 = vld [vmem:[%s11088_s1 + $0x1264] ss:$16 sps:$4 sm:$0xff]  }
 0x210   :  { %5187 = vmatprep.subr.bf16.mxu0 %v8072_v42  ;;  %5720 = vmatprep.subr.bf16.mxu1 %v8075_v43  ;;  %v8167_v42 = vld [vmem:[%s11088_s1 + $0x126c] ss:$16 sps:$4 sm:$0xff]   ;;  %v8162_v43 = vld [vmem:[%s11088_s1 + $0x1260] ss:$16 sps:$4 sm:$0xff]  }
 0x213   :  { %5188 = vmatpush1.bf16.msra.mxu0 %v8070_v44  ;;  %5721 = vmatpush1.bf16.msra.mxu1 %v8073_v45  ;;  %v8165_v44 = vld [vmem:[%s11088_s1 + $0x1268] ss:$16 sps:$4 sm:$0xff]   ;;  %v8170_v45 = vld [vmem:[%s11088_s1 + $0x1284] ss:$16 sps:$4 sm:$0xff]  }
 0x214   :  { %5189 = vmatprep.subr.bf16.mxu0 %v8078_v46  ;;  %5722 = vmatprep.subr.bf16.mxu1 %v8081_v47  ;;  %v8173_v46 = vld [vmem:[%s11088_s1 + $0x128c] ss:$16 sps:$4 sm:$0xff]   ;;  %v8168_v47 = vld [vmem:[%s11088_s1 + $0x1280] ss:$16 sps:$4 sm:$0xff]  }
 0x217   :  { %5190 = vmatpush1.bf16.msra.mxu0 %v8076_v48  ;;  %5723 = vmatpush1.bf16.msra.mxu1 %v8079_v49  ;;  %v8171_v48 = vld [vmem:[%s11088_s1 + $0x1288] ss:$16 sps:$4 sm:$0xff]   ;;  %v8176_v49 = vld [vmem:[%s11088_s1 + $0x12a4] ss:$16 sps:$4 sm:$0xff]  }
 0x218   :  { %5191 = vmatprep.subr.bf16.mxu0 %v8084_v50  ;;  %5724 = vmatprep.subr.bf16.mxu1 %v8087_v51  ;;  %v8179_v50 = vld [vmem:[%s11088_s1 + $0x12ac] ss:$16 sps:$4 sm:$0xff]   ;;  %v8174_v51 = vld [vmem:[%s11088_s1 + $0x12a0] ss:$16 sps:$4 sm:$0xff]  }
 0x21b   :  { %5192 = vmatpush1.bf16.msra.mxu0 %v8082_v52  ;;  %5725 = vmatpush1.bf16.msra.mxu1 %v8085_v53  ;;  %v8177_v52 = vld [vmem:[%s11088_s1 + $0x12a8] ss:$16 sps:$4 sm:$0xff]   ;;  %v8182_v53 = vld [vmem:[%s11088_s1 + $0x12c4] ss:$16 sps:$4 sm:$0xff]  }
 0x21c   :  { %5193 = vmatprep.subr.bf16.mxu0 %v8090_v54  ;;  %5726 = vmatprep.subr.bf16.mxu1 %v8093_v55  ;;  %v8185_v54 = vld [vmem:[%s11088_s1 + $0x12cc] ss:$16 sps:$4 sm:$0xff]   ;;  %v8180_v55 = vld [vmem:[%s11088_s1 + $0x12c0] ss:$16 sps:$4 sm:$0xff]  }
 0x21f   :  { %5194 = vmatpush1.bf16.msra.mxu0 %v8088_v56  ;;  %5727 = vmatpush1.bf16.msra.mxu1 %v8091_v57  ;;  %v8183_v56 = vld [vmem:[%s11088_s1 + $0x12c8] ss:$16 sps:$4 sm:$0xff]   ;;  %v8188_v57 = vld [vmem:[%s11088_s1 + $0x12e4] ss:$16 sps:$4 sm:$0xff]  }
 0x220   :  { %5195 = vmatprep.subr.bf16.mxu0 %v8096_v58  ;;  %5728 = vmatprep.subr.bf16.mxu1 %v8099_v59  ;;  %v8191_v58 = vld [vmem:[%s11088_s1 + $0x12ec] ss:$16 sps:$4 sm:$0xff]   ;;  %v8186_v59 = vld [vmem:[%s11088_s1 + $0x12e0] ss:$16 sps:$4 sm:$0xff]  }
 0x223   :  { %5196 = vmatpush1.bf16.msra.mxu0 %v8094_v60  ;;  %5729 = vmatpush1.bf16.msra.mxu1 %v8097_v61  ;;  %v8189_v60 = vld [vmem:[%s11088_s1 + $0x12e8] ss:$16 sps:$4 sm:$0xff]   ;;  %v8194_v61 = vld [vmem:[%s11088_s1 + $0x1304] ss:$16 sps:$4 sm:$0xff]  }
 0x224   :  { %5197 = vmatprep.subr.bf16.mxu0 %v8102_v62  ;;  %5730 = vmatprep.subr.bf16.mxu1 %v8105_v63  ;;  %v8197_v62 = vld [vmem:[%s11088_s1 + $0x130c] ss:$16 sps:$4 sm:$0xff]   ;;  %v8192_v63 = vld [vmem:[%s11088_s1 + $0x1300] ss:$16 sps:$4 sm:$0xff]  }
 0x227   :  { %5198 = vmatpush1.bf16.msra.mxu0 %v8100_v0  ;;  %5731 = vmatpush1.bf16.msra.mxu1 %v8103_v1  ;;  %v8195_v0 = vld [vmem:[%s11088_s1 + $0x1308] ss:$16 sps:$4 sm:$0xff]   ;;  %v8200_v1 = vld [vmem:[%s11088_s1 + $0x1324] ss:$16 sps:$4 sm:$0xff]  }
 0x228   :  { %5199 = vmatprep.subr.bf16.mxu0 %v8108_v2  ;;  %5732 = vmatprep.subr.bf16.mxu1 %v8111_v3  ;;  %v8203_v2 = vld [vmem:[%s11088_s1 + $0x132c] ss:$16 sps:$4 sm:$0xff]   ;;  %v8198_v3 = vld [vmem:[%s11088_s1 + $0x1320] ss:$16 sps:$4 sm:$0xff]  }
 0x22b   :  { %5200 = vmatpush1.bf16.msra.mxu0 %v8106_v4  ;;  %5733 = vmatpush1.bf16.msra.mxu1 %v8109_v5  ;;  %v8201_v4 = vld [vmem:[%s11088_s1 + $0x1328] ss:$16 sps:$4 sm:$0xff]   ;;  %v8206_v5 = vld [vmem:[%s11088_s1 + $0x1344] ss:$16 sps:$4 sm:$0xff]  }
 0x22c   :  { %5201 = vmatprep.subr.bf16.mxu0 %v8114_v6  ;;  %5734 = vmatprep.subr.bf16.mxu1 %v8117_v7  ;;  %v8209_v6 = vld [vmem:[%s11088_s1 + $0x134c] ss:$16 sps:$4 sm:$0xff]   ;;  %v8204_v7 = vld [vmem:[%s11088_s1 + $0x1340] ss:$16 sps:$4 sm:$0xff]  }
 0x22f   :  { %5202 = vmatpush1.bf16.msra.mxu0 %v8112_v8  ;;  %5735 = vmatpush1.bf16.msra.mxu1 %v8115_v9  ;;  %v8207_v8 = vld [vmem:[%s11088_s1 + $0x1348] ss:$16 sps:$4 sm:$0xff]   ;;  %v8212_v9 = vld [vmem:[%s11088_s1 + $0x1364] ss:$16 sps:$4 sm:$0xff]  }
 0x230   :  { %5203 = vmatprep.subr.bf16.mxu0 %v8120_v10  ;;  %5736 = vmatprep.subr.bf16.mxu1 %v8123_v12  ;;  %v8215_v10 = vld [vmem:[%s11088_s1 + $0x136c] ss:$16 sps:$4 sm:$0xff]   ;;  %v8210_v12 = vld [vmem:[%s11088_s1 + $0x1360] ss:$16 sps:$4 sm:$0xff]  }
 0x233   :  { %5204 = vmatpush1.bf16.msra.mxu0 %v8118_v13  ;;  %5737 = vmatpush1.bf16.msra.mxu1 %v8121_v15  ;;  %v8213_v13 = vld [vmem:[%s11088_s1 + $0x1368] ss:$16 sps:$4 sm:$0xff]   ;;  %v8218_v15 = vld [vmem:[%s11088_s1 + $0x1384] ss:$16 sps:$4 sm:$0xff]  }
 0x234   :  { %5205 = vmatprep.subr.bf16.mxu0 %v8126_v11  ;;  %5738 = vmatprep.subr.bf16.mxu1 %v8129_v17  ;;  %v8221_v11 = vld [vmem:[%s11088_s1 + $0x138c] ss:$16 sps:$4 sm:$0xff]   ;;  %v8216_v17 = vld [vmem:[%s11088_s1 + $0x1380] ss:$16 sps:$4 sm:$0xff]  }
 0x237   :  { %5206 = vmatpush1.bf16.msra.mxu0 %v8124_v14  ;;  %5739 = vmatpush1.bf16.msra.mxu1 %v8127_v19  ;;  %v8219_v14 = vld [vmem:[%s11088_s1 + $0x1388] ss:$16 sps:$4 sm:$0xff]   ;;  %v8224_v19 = vld [vmem:[%s11088_s1 + $0x13a4] ss:$16 sps:$4 sm:$0xff]  }
 0x238   :  { %5207 = vmatprep.subr.bf16.mxu0 %v8132_v20  ;;  %5740 = vmatprep.subr.bf16.mxu1 %v8135_v16  ;;  %v8227_v20 = vld [vmem:[%s11088_s1 + $0x13ac] ss:$16 sps:$4 sm:$0xff]   ;;  %v8222_v16 = vld [vmem:[%s11088_s1 + $0x13a0] ss:$16 sps:$4 sm:$0xff]  }
 0x23b   :  { %5208 = vmatpush1.bf16.msra.mxu0 %v8130_v22  ;;  %5741 = vmatpush1.bf16.msra.mxu1 %v8133_v23  ;;  %v8225_v22 = vld [vmem:[%s11088_s1 + $0x13a8] ss:$16 sps:$4 sm:$0xff]   ;;  %v8230_v23 = vld [vmem:[%s11088_s1 + $0x13c4] ss:$16 sps:$4 sm:$0xff]  }
 0x23c   :  { %5209 = vmatprep.subr.bf16.mxu0 %v8138_v18  ;;  %5742 = vmatprep.subr.bf16.mxu1 %v8141_v25  ;;  %v8233_v18 = vld [vmem:[%s11088_s1 + $0x13cc] ss:$16 sps:$4 sm:$0xff]   ;;  %v8228_v25 = vld [vmem:[%s11088_s1 + $0x13c0] ss:$16 sps:$4 sm:$0xff]  }
 0x23f   :  { %5210 = vmatpush1.bf16.msra.mxu0 %v8136_v26  ;;  %5743 = vmatpush1.bf16.msra.mxu1 %v8139_v27  ;;  %v8231_v26 = vld [vmem:[%s11088_s1 + $0x13c8] ss:$16 sps:$4 sm:$0xff]   ;;  %v8236_v27 = vld [vmem:[%s11088_s1 + $0x13e4] ss:$16 sps:$4 sm:$0xff]  }
 0x240   :  { %5220 = vmatprep.subr.bf16.mxu0 %v8146_v28  ;;  %5753 = vmatprep.subr.bf16.mxu1 %v8149_v29  ;;  %v8239_v28 = vld [vmem:[%s11088_s1 + $0x13ec] ss:$16 sps:$4 sm:$0xff]   ;;  %v8234_v29 = vld [vmem:[%s11088_s1 + $0x13e0] ss:$16 sps:$4 sm:$0xff]  }
 0x242   :  { %5212 = vmatmul.mubr.bf16.vlgmr.msra.gmra.mrb[0].mxu0 %v6289_v24  ;;  %5745 = vmatmul.mubr.bf16.vlgmr.msra.gmra.mrb[0].mxu1 %v6289_v24  ;;  %v8237_v24 = vld [vmem:[%s11088_s1 + $0x13e8] ss:$16 sps:$4 sm:$0xff]  }
 0x243   :  { %5221 = vmatpush1.bf16.msra.mxu0 %v8144_v31  ;;  %5754 = vmatpush1.bf16.msra.mxu1 %v8147_v32  ;;  %v8244_v31 = vld [vmem:[%s11088_s1 + $0x1404] ss:$16 sps:$4 sm:$0xff]   ;;  %v8247_v32 = vld [vmem:[%s11088_s1 + $0x140c] ss:$16 sps:$4 sm:$0xff]  }
 0x244   :  { %5222 = vmatprep.subr.bf16.mxu0 %v8152_v21  ;;  %5755 = vmatprep.subr.bf16.mxu1 %v8155_v33  ;;  %v6291_v21 = vcombine.low %v10338_v30, %v10338_v30  ;;  %v10539_v33 = vld [vmem:[%s11089_s0 + $0x50] sm:$0xff] }
 0x245   :  { %5252 = vmatprep.mubr.bf16.mxu0 %v6292_v34  ;;  %5785 = vmatprep.mubr.bf16.mxu1 %v6292_v34  ;;  %v8242_v34 = vld [vmem:[%s11088_s1 + $0x1400] ss:$16 sps:$4 sm:$0xff]   ;;  %v8250_v30 = vld [vmem:[%s11088_s1 + $0x1424] ss:$16 sps:$4 sm:$0xff]  }
 0x247   :  { %5223 = vmatpush1.bf16.msra.mxu0 %v8150_v35  ;;  %5756 = vmatpush1.bf16.msra.mxu1 %v8153_v36  ;;  %v8245_v35 = vld [vmem:[%s11088_s1 + $0x1408] ss:$16 sps:$4 sm:$0xff]   ;;  %v8253_v36 = vld [vmem:[%s11088_s1 + $0x142c] ss:$16 sps:$4 sm:$0xff]  }
 0x248   :  { %5224 = vmatprep.subr.bf16.mxu0 %v8158_v37  ;;  %5757 = vmatprep.subr.bf16.mxu1 %v8161_v38  ;;  %v6294_v37 = vcombine.high %v10539_v33, %v10539_v33  ;;  %v8248_v38 = vld [vmem:[%s11088_s1 + $0x1420] ss:$16 sps:$4 sm:$0xff]  }
 0x24b   :  { %5225 = vmatpush1.bf16.msra.mxu0 %v8156_v39  ;;  %5758 = vmatpush1.bf16.msra.mxu1 %v8159_v40  ;;  %v8251_v39 = vld [vmem:[%s11088_s1 + $0x1428] ss:$16 sps:$4 sm:$0xff]   ;;  %v8256_v40 = vld [vmem:[%s11088_s1 + $0x1444] ss:$16 sps:$4 sm:$0xff]  }
 0x24c   :  { %5226 = vmatprep.subr.bf16.mxu0 %v8164_v41  ;;  %5759 = vmatprep.subr.bf16.mxu1 %v8167_v42  ;;  %v8259_v41 = vld [vmem:[%s11088_s1 + $0x144c] ss:$16 sps:$4 sm:$0xff]   ;;  %v8254_v42 = vld [vmem:[%s11088_s1 + $0x1440] ss:$16 sps:$4 sm:$0xff]  }
 0x24f   :  { %5227 = vmatpush1.bf16.msra.mxu0 %v8162_v43  ;;  %5760 = vmatpush1.bf16.msra.mxu1 %v8165_v44  ;;  %v8257_v43 = vld [vmem:[%s11088_s1 + $0x1448] ss:$16 sps:$4 sm:$0xff]   ;;  %v8262_v44 = vld [vmem:[%s11088_s1 + $0x1464] ss:$16 sps:$4 sm:$0xff]  }
 0x250   :  { %5228 = vmatprep.subr.bf16.mxu0 %v8170_v45  ;;  %5761 = vmatprep.subr.bf16.mxu1 %v8173_v46  ;;  %v8265_v45 = vld [vmem:[%s11088_s1 + $0x146c] ss:$16 sps:$4 sm:$0xff]   ;;  %v8260_v46 = vld [vmem:[%s11088_s1 + $0x1460] ss:$16 sps:$4 sm:$0xff]  }
 0x253   :  { %5229 = vmatpush1.bf16.msra.mxu0 %v8168_v47  ;;  %5762 = vmatpush1.bf16.msra.mxu1 %v8171_v48  ;;  %v8263_v47 = vld [vmem:[%s11088_s1 + $0x1468] ss:$16 sps:$4 sm:$0xff]   ;;  %v8268_v48 = vld [vmem:[%s11088_s1 + $0x1484] ss:$16 sps:$4 sm:$0xff]  }
 0x254   :  { %5230 = vmatprep.subr.bf16.mxu0 %v8176_v49  ;;  %5763 = vmatprep.subr.bf16.mxu1 %v8179_v50  ;;  %v8271_v49 = vld [vmem:[%s11088_s1 + $0x148c] ss:$16 sps:$4 sm:$0xff]   ;;  %v8266_v50 = vld [vmem:[%s11088_s1 + $0x1480] ss:$16 sps:$4 sm:$0xff]  }
 0x257   :  { %5231 = vmatpush1.bf16.msra.mxu0 %v8174_v51  ;;  %5764 = vmatpush1.bf16.msra.mxu1 %v8177_v52  ;;  %v8269_v51 = vld [vmem:[%s11088_s1 + $0x1488] ss:$16 sps:$4 sm:$0xff]   ;;  %v8274_v52 = vld [vmem:[%s11088_s1 + $0x14a4] ss:$16 sps:$4 sm:$0xff]  }
 0x258   :  { %5232 = vmatprep.subr.bf16.mxu0 %v8182_v53  ;;  %5765 = vmatprep.subr.bf16.mxu1 %v8185_v54  ;;  %v8277_v53 = vld [vmem:[%s11088_s1 + $0x14ac] ss:$16 sps:$4 sm:$0xff]   ;;  %v8272_v54 = vld [vmem:[%s11088_s1 + $0x14a0] ss:$16 sps:$4 sm:$0xff]  }
 0x25b   :  { %5233 = vmatpush1.bf16.msra.mxu0 %v8180_v55  ;;  %5766 = vmatpush1.bf16.msra.mxu1 %v8183_v56  ;;  %v8275_v55 = vld [vmem:[%s11088_s1 + $0x14a8] ss:$16 sps:$4 sm:$0xff]   ;;  %v8280_v56 = vld [vmem:[%s11088_s1 + $0x14c4] ss:$16 sps:$4 sm:$0xff]  }
 0x25c   :  { %5234 = vmatprep.subr.bf16.mxu0 %v8188_v57  ;;  %5767 = vmatprep.subr.bf16.mxu1 %v8191_v58  ;;  %v8283_v57 = vld [vmem:[%s11088_s1 + $0x14cc] ss:$16 sps:$4 sm:$0xff]   ;;  %v8278_v58 = vld [vmem:[%s11088_s1 + $0x14c0] ss:$16 sps:$4 sm:$0xff]  }
 0x25f   :  { %5235 = vmatpush1.bf16.msra.mxu0 %v8186_v59  ;;  %5768 = vmatpush1.bf16.msra.mxu1 %v8189_v60  ;;  %v8281_v59 = vld [vmem:[%s11088_s1 + $0x14c8] ss:$16 sps:$4 sm:$0xff]   ;;  %v8286_v60 = vld [vmem:[%s11088_s1 + $0x14e4] ss:$16 sps:$4 sm:$0xff]  }
 0x260   :  { %5236 = vmatprep.subr.bf16.mxu0 %v8194_v61  ;;  %5769 = vmatprep.subr.bf16.mxu1 %v8197_v62  ;;  %v8289_v61 = vld [vmem:[%s11088_s1 + $0x14ec] ss:$16 sps:$4 sm:$0xff]   ;;  %v8284_v62 = vld [vmem:[%s11088_s1 + $0x14e0] ss:$16 sps:$4 sm:$0xff]  }
 0x263   :  { %5237 = vmatpush1.bf16.msra.mxu0 %v8192_v63  ;;  %5770 = vmatpush1.bf16.msra.mxu1 %v8195_v0  ;;  %v8287_v63 = vld [vmem:[%s11088_s1 + $0x14e8] ss:$16 sps:$4 sm:$0xff]   ;;  %v8292_v0 = vld [vmem:[%s11088_s1 + $0x1504] ss:$16 sps:$4 sm:$0xff]  }
 0x264   :  { %5238 = vmatprep.subr.bf16.mxu0 %v8200_v1  ;;  %5771 = vmatprep.subr.bf16.mxu1 %v8203_v2  ;;  %v8295_v1 = vld [vmem:[%s11088_s1 + $0x150c] ss:$16 sps:$4 sm:$0xff]   ;;  %v8290_v2 = vld [vmem:[%s11088_s1 + $0x1500] ss:$16 sps:$4 sm:$0xff]  }
 0x267   :  { %5239 = vmatpush1.bf16.msra.mxu0 %v8198_v3  ;;  %5772 = vmatpush1.bf16.msra.mxu1 %v8201_v4  ;;  %v8293_v3 = vld [vmem:[%s11088_s1 + $0x1508] ss:$16 sps:$4 sm:$0xff]   ;;  %v8298_v4 = vld [vmem:[%s11088_s1 + $0x1524] ss:$16 sps:$4 sm:$0xff]  }
 0x268   :  { %5240 = vmatprep.subr.bf16.mxu0 %v8206_v5  ;;  %5773 = vmatprep.subr.bf16.mxu1 %v8209_v6  ;;  %v8301_v5 = vld [vmem:[%s11088_s1 + $0x152c] ss:$16 sps:$4 sm:$0xff]   ;;  %v8296_v6 = vld [vmem:[%s11088_s1 + $0x1520] ss:$16 sps:$4 sm:$0xff]  }
 0x26b   :  { %5241 = vmatpush1.bf16.msra.mxu0 %v8204_v7  ;;  %5774 = vmatpush1.bf16.msra.mxu1 %v8207_v8  ;;  %v8299_v7 = vld [vmem:[%s11088_s1 + $0x1528] ss:$16 sps:$4 sm:$0xff]   ;;  %v8304_v8 = vld [vmem:[%s11088_s1 + $0x1544] ss:$16 sps:$4 sm:$0xff]  }
 0x26c   :  { %5242 = vmatprep.subr.bf16.mxu0 %v8212_v9  ;;  %5775 = vmatprep.subr.bf16.mxu1 %v8215_v10  ;;  %v8307_v9 = vld [vmem:[%s11088_s1 + $0x154c] ss:$16 sps:$4 sm:$0xff]   ;;  %v8302_v10 = vld [vmem:[%s11088_s1 + $0x1540] ss:$16 sps:$4 sm:$0xff]  }
 0x26f   :  { %5243 = vmatpush1.bf16.msra.mxu0 %v8210_v12  ;;  %5776 = vmatpush1.bf16.msra.mxu1 %v8213_v13  ;;  %v8305_v12 = vld [vmem:[%s11088_s1 + $0x1548] ss:$16 sps:$4 sm:$0xff]   ;;  %v8310_v13 = vld [vmem:[%s11088_s1 + $0x1564] ss:$16 sps:$4 sm:$0xff]  }
 0x270   :  { %5244 = vmatprep.subr.bf16.mxu0 %v8218_v15  ;;  %5777 = vmatprep.subr.bf16.mxu1 %v8221_v11  ;;  %v8313_v15 = vld [vmem:[%s11088_s1 + $0x156c] ss:$16 sps:$4 sm:$0xff]   ;;  %v8308_v11 = vld [vmem:[%s11088_s1 + $0x1560] ss:$16 sps:$4 sm:$0xff]  }
 0x273   :  { %5245 = vmatpush1.bf16.msra.mxu0 %v8216_v17  ;;  %5778 = vmatpush1.bf16.msra.mxu1 %v8219_v14  ;;  %v8311_v17 = vld [vmem:[%s11088_s1 + $0x1568] ss:$16 sps:$4 sm:$0xff]   ;;  %v8316_v14 = vld [vmem:[%s11088_s1 + $0x1584] ss:$16 sps:$4 sm:$0xff]  }
 0x274   :  { %5246 = vmatprep.subr.bf16.mxu0 %v8224_v19  ;;  %5779 = vmatprep.subr.bf16.mxu1 %v8227_v20  ;;  %v8319_v19 = vld [vmem:[%s11088_s1 + $0x158c] ss:$16 sps:$4 sm:$0xff]   ;;  %v8314_v20 = vld [vmem:[%s11088_s1 + $0x1580] ss:$16 sps:$4 sm:$0xff]  }
 0x277   :  { %5247 = vmatpush1.bf16.msra.mxu0 %v8222_v16  ;;  %5780 = vmatpush1.bf16.msra.mxu1 %v8225_v22  ;;  %v8317_v16 = vld [vmem:[%s11088_s1 + $0x1588] ss:$16 sps:$4 sm:$0xff]   ;;  %v8322_v22 = vld [vmem:[%s11088_s1 + $0x15a4] ss:$16 sps:$4 sm:$0xff]  }
 0x278   :  { %5248 = vmatprep.subr.bf16.mxu0 %v8230_v23  ;;  %5781 = vmatprep.subr.bf16.mxu1 %v8233_v18  ;;  %v8325_v23 = vld [vmem:[%s11088_s1 + $0x15ac] ss:$16 sps:$4 sm:$0xff]   ;;  %v8320_v18 = vld [vmem:[%s11088_s1 + $0x15a0] ss:$16 sps:$4 sm:$0xff]  }
 0x27b   :  { %5249 = vmatpush1.bf16.msra.mxu0 %v8228_v25  ;;  %5782 = vmatpush1.bf16.msra.mxu1 %v8231_v26  ;;  %v8323_v25 = vld [vmem:[%s11088_s1 + $0x15a8] ss:$16 sps:$4 sm:$0xff]   ;;  %v8328_v26 = vld [vmem:[%s11088_s1 + $0x15c4] ss:$16 sps:$4 sm:$0xff]  }
 0x27c   :  { %5250 = vmatprep.subr.bf16.mxu0 %v8236_v27  ;;  %5783 = vmatprep.subr.bf16.mxu1 %v8239_v28  ;;  %v8331_v27 = vld [vmem:[%s11088_s1 + $0x15cc] ss:$16 sps:$4 sm:$0xff]   ;;  %v8326_v28 = vld [vmem:[%s11088_s1 + $0x15c0] ss:$16 sps:$4 sm:$0xff]  }
 0x27f   :  { %5251 = vmatpush1.bf16.msra.mxu0 %v8234_v29  ;;  %5784 = vmatpush1.bf16.msra.mxu1 %v8237_v24  ;;  %v8329_v29 = vld [vmem:[%s11088_s1 + $0x15c8] ss:$16 sps:$4 sm:$0xff]   ;;  %v8334_v24 = vld [vmem:[%s11088_s1 + $0x15e4] ss:$16 sps:$4 sm:$0xff]  }
 0x280   :  { %5261 = vmatprep.subr.bf16.mxu0 %v8244_v31  ;;  %5794 = vmatprep.subr.bf16.mxu1 %v8247_v32  ;;  %v8337_v31 = vld [vmem:[%s11088_s1 + $0x15ec] ss:$16 sps:$4 sm:$0xff]   ;;  %v8332_v32 = vld [vmem:[%s11088_s1 + $0x15e0] ss:$16 sps:$4 sm:$0xff]  }
 0x282   :  { %5253 = vmatmul.mubr.bf16.vlgmr.msra.gmra.mrb[0].mxu0 %v6291_v21  ;;  %5786 = vmatmul.mubr.bf16.vlgmr.msra.gmra.mrb[0].mxu1 %v6291_v21  ;;  %v8335_v21 = vld [vmem:[%s11088_s1 + $0x15e8] ss:$16 sps:$4 sm:$0xff]  }
 0x283   :  { %5262 = vmatpush1.bf16.msra.mxu0 %v8242_v34  ;;  %5795 = vmatpush1.bf16.msra.mxu1 %v8245_v35  ;;  %v8342_v34 = vld [vmem:[%s11088_s1 + $0x1604] ss:$16 sps:$4 sm:$0xff]   ;;  %v8345_v35 = vld [vmem:[%s11088_s1 + $0x160c] ss:$16 sps:$4 sm:$0xff]  }
 0x284   :  { %5263 = vmatprep.subr.bf16.mxu0 %v8250_v30  ;;  %5796 = vmatprep.subr.bf16.mxu1 %v8253_v36  ;;  %v6293_v30 = vcombine.low %v10539_v33, %v10539_v33  ;;  %v10740_v36 = vld [vmem:[%s11089_s0 + $0x58] sm:$0xff]  ;;  %v8348_v33 = vld [vmem:[%s11088_s1 + $0x1624] ss:$16 sps:$4 sm:$0xff]  }
 0x285   :  { %5293 = vmatprep.mubr.bf16.mxu0 %v6294_v37  ;;  %5826 = vmatprep.mubr.bf16.mxu1 %v6294_v37  ;;  %v8340_v37 = vld [vmem:[%s11088_s1 + $0x1600] ss:$16 sps:$4 sm:$0xff]  }
 0x287   :  { %5264 = vmatpush1.bf16.msra.mxu0 %v8248_v38  ;;  %5797 = vmatpush1.bf16.msra.mxu1 %v8251_v39  ;;  %v8343_v38 = vld [vmem:[%s11088_s1 + $0x1608] ss:$16 sps:$4 sm:$0xff]   ;;  %v8351_v39 = vld [vmem:[%s11088_s1 + $0x162c] ss:$16 sps:$4 sm:$0xff]  }
 0x288   :  { %5265 = vmatprep.subr.bf16.mxu0 %v8256_v40  ;;  %5798 = vmatprep.subr.bf16.mxu1 %v8259_v41  ;;  %v6296_v40 = vcombine.high %v10740_v36, %v10740_v36  ;;  %v8346_v41 = vld [vmem:[%s11088_s1 + $0x1620] ss:$16 sps:$4 sm:$0xff]  }
 0x28b   :  { %5266 = vmatpush1.bf16.msra.mxu0 %v8254_v42  ;;  %5799 = vmatpush1.bf16.msra.mxu1 %v8257_v43  ;;  %v8349_v42 = vld [vmem:[%s11088_s1 + $0x1628] ss:$16 sps:$4 sm:$0xff]   ;;  %v8354_v43 = vld [vmem:[%s11088_s1 + $0x1644] ss:$16 sps:$4 sm:$0xff]  }
 0x28c   :  { %5267 = vmatprep.subr.bf16.mxu0 %v8262_v44  ;;  %5800 = vmatprep.subr.bf16.mxu1 %v8265_v45  ;;  %v8357_v44 = vld [vmem:[%s11088_s1 + $0x164c] ss:$16 sps:$4 sm:$0xff]   ;;  %v8352_v45 = vld [vmem:[%s11088_s1 + $0x1640] ss:$16 sps:$4 sm:$0xff]  }
 0x28f   :  { %5268 = vmatpush1.bf16.msra.mxu0 %v8260_v46  ;;  %5801 = vmatpush1.bf16.msra.mxu1 %v8263_v47  ;;  %v8355_v46 = vld [vmem:[%s11088_s1 + $0x1648] ss:$16 sps:$4 sm:$0xff]   ;;  %v8360_v47 = vld [vmem:[%s11088_s1 + $0x1664] ss:$16 sps:$4 sm:$0xff]  }
 0x290   :  { %5269 = vmatprep.subr.bf16.mxu0 %v8268_v48  ;;  %5802 = vmatprep.subr.bf16.mxu1 %v8271_v49  ;;  %v8363_v48 = vld [vmem:[%s11088_s1 + $0x166c] ss:$16 sps:$4 sm:$0xff]   ;;  %v8358_v49 = vld [vmem:[%s11088_s1 + $0x1660] ss:$16 sps:$4 sm:$0xff]  }
 0x293   :  { %5270 = vmatpush1.bf16.msra.mxu0 %v8266_v50  ;;  %5803 = vmatpush1.bf16.msra.mxu1 %v8269_v51  ;;  %v8361_v50 = vld [vmem:[%s11088_s1 + $0x1668] ss:$16 sps:$4 sm:$0xff]   ;;  %v8366_v51 = vld [vmem:[%s11088_s1 + $0x1684] ss:$16 sps:$4 sm:$0xff]  }
 0x294   :  { %5271 = vmatprep.subr.bf16.mxu0 %v8274_v52  ;;  %5804 = vmatprep.subr.bf16.mxu1 %v8277_v53  ;;  %v8369_v52 = vld [vmem:[%s11088_s1 + $0x168c] ss:$16 sps:$4 sm:$0xff]   ;;  %v8364_v53 = vld [vmem:[%s11088_s1 + $0x1680] ss:$16 sps:$4 sm:$0xff]  }
 0x297   :  { %5272 = vmatpush1.bf16.msra.mxu0 %v8272_v54  ;;  %5805 = vmatpush1.bf16.msra.mxu1 %v8275_v55  ;;  %v8367_v54 = vld [vmem:[%s11088_s1 + $0x1688] ss:$16 sps:$4 sm:$0xff]   ;;  %v8372_v55 = vld [vmem:[%s11088_s1 + $0x16a4] ss:$16 sps:$4 sm:$0xff]  }
 0x298   :  { %5273 = vmatprep.subr.bf16.mxu0 %v8280_v56  ;;  %5806 = vmatprep.subr.bf16.mxu1 %v8283_v57  ;;  %v8375_v56 = vld [vmem:[%s11088_s1 + $0x16ac] ss:$16 sps:$4 sm:$0xff]   ;;  %v8370_v57 = vld [vmem:[%s11088_s1 + $0x16a0] ss:$16 sps:$4 sm:$0xff]  }
 0x29b   :  { %5274 = vmatpush1.bf16.msra.mxu0 %v8278_v58  ;;  %5807 = vmatpush1.bf16.msra.mxu1 %v8281_v59  ;;  %v8373_v58 = vld [vmem:[%s11088_s1 + $0x16a8] ss:$16 sps:$4 sm:$0xff]   ;;  %v8378_v59 = vld [vmem:[%s11088_s1 + $0x16c4] ss:$16 sps:$4 sm:$0xff]  }
 0x29c   :  { %5275 = vmatprep.subr.bf16.mxu0 %v8286_v60  ;;  %5808 = vmatprep.subr.bf16.mxu1 %v8289_v61  ;;  %v8381_v60 = vld [vmem:[%s11088_s1 + $0x16cc] ss:$16 sps:$4 sm:$0xff]   ;;  %v8376_v61 = vld [vmem:[%s11088_s1 + $0x16c0] ss:$16 sps:$4 sm:$0xff]  }
 0x29f   :  { %5276 = vmatpush1.bf16.msra.mxu0 %v8284_v62  ;;  %5809 = vmatpush1.bf16.msra.mxu1 %v8287_v63  ;;  %v8379_v62 = vld [vmem:[%s11088_s1 + $0x16c8] ss:$16 sps:$4 sm:$0xff]   ;;  %v8384_v63 = vld [vmem:[%s11088_s1 + $0x16e4] ss:$16 sps:$4 sm:$0xff]  }
 0x2a0   :  { %5277 = vmatprep.subr.bf16.mxu0 %v8292_v0  ;;  %5810 = vmatprep.subr.bf16.mxu1 %v8295_v1  ;;  %v8387_v0 = vld [vmem:[%s11088_s1 + $0x16ec] ss:$16 sps:$4 sm:$0xff]   ;;  %v8382_v1 = vld [vmem:[%s11088_s1 + $0x16e0] ss:$16 sps:$4 sm:$0xff]  }
 0x2a3   :  { %5278 = vmatpush1.bf16.msra.mxu0 %v8290_v2  ;;  %5811 = vmatpush1.bf16.msra.mxu1 %v8293_v3  ;;  %v8385_v2 = vld [vmem:[%s11088_s1 + $0x16e8] ss:$16 sps:$4 sm:$0xff]   ;;  %v8390_v3 = vld [vmem:[%s11088_s1 + $0x1704] ss:$16 sps:$4 sm:$0xff]  }
 0x2a4   :  { %5279 = vmatprep.subr.bf16.mxu0 %v8298_v4  ;;  %5812 = vmatprep.subr.bf16.mxu1 %v8301_v5  ;;  %v8393_v4 = vld [vmem:[%s11088_s1 + $0x170c] ss:$16 sps:$4 sm:$0xff]   ;;  %v8388_v5 = vld [vmem:[%s11088_s1 + $0x1700] ss:$16 sps:$4 sm:$0xff]  }
 0x2a7   :  { %5280 = vmatpush1.bf16.msra.mxu0 %v8296_v6  ;;  %5813 = vmatpush1.bf16.msra.mxu1 %v8299_v7  ;;  %v8391_v6 = vld [vmem:[%s11088_s1 + $0x1708] ss:$16 sps:$4 sm:$0xff]   ;;  %v8396_v7 = vld [vmem:[%s11088_s1 + $0x1724] ss:$16 sps:$4 sm:$0xff]  }
 0x2a8   :  { %5281 = vmatprep.subr.bf16.mxu0 %v8304_v8  ;;  %5814 = vmatprep.subr.bf16.mxu1 %v8307_v9  ;;  %v8399_v8 = vld [vmem:[%s11088_s1 + $0x172c] ss:$16 sps:$4 sm:$0xff]   ;;  %v8394_v9 = vld [vmem:[%s11088_s1 + $0x1720] ss:$16 sps:$4 sm:$0xff]  }
 0x2ab   :  { %5282 = vmatpush1.bf16.msra.mxu0 %v8302_v10  ;;  %5815 = vmatpush1.bf16.msra.mxu1 %v8305_v12  ;;  %v8397_v10 = vld [vmem:[%s11088_s1 + $0x1728] ss:$16 sps:$4 sm:$0xff]   ;;  %v8402_v12 = vld [vmem:[%s11088_s1 + $0x1744] ss:$16 sps:$4 sm:$0xff]  }
 0x2ac   :  { %5283 = vmatprep.subr.bf16.mxu0 %v8310_v13  ;;  %5816 = vmatprep.subr.bf16.mxu1 %v8313_v15  ;;  %v8405_v13 = vld [vmem:[%s11088_s1 + $0x174c] ss:$16 sps:$4 sm:$0xff]   ;;  %v8400_v15 = vld [vmem:[%s11088_s1 + $0x1740] ss:$16 sps:$4 sm:$0xff]  }
 0x2af   :  { %5284 = vmatpush1.bf16.msra.mxu0 %v8308_v11  ;;  %5817 = vmatpush1.bf16.msra.mxu1 %v8311_v17  ;;  %v8403_v11 = vld [vmem:[%s11088_s1 + $0x1748] ss:$16 sps:$4 sm:$0xff]   ;;  %v8408_v17 = vld [vmem:[%s11088_s1 + $0x1764] ss:$16 sps:$4 sm:$0xff]  }
 0x2b0   :  { %5285 = vmatprep.subr.bf16.mxu0 %v8316_v14  ;;  %5818 = vmatprep.subr.bf16.mxu1 %v8319_v19  ;;  %v8411_v14 = vld [vmem:[%s11088_s1 + $0x176c] ss:$16 sps:$4 sm:$0xff]   ;;  %v8406_v19 = vld [vmem:[%s11088_s1 + $0x1760] ss:$16 sps:$4 sm:$0xff]  }
 0x2b3   :  { %5286 = vmatpush1.bf16.msra.mxu0 %v8314_v20  ;;  %5819 = vmatpush1.bf16.msra.mxu1 %v8317_v16  ;;  %v8409_v20 = vld [vmem:[%s11088_s1 + $0x1768] ss:$16 sps:$4 sm:$0xff]   ;;  %v8414_v16 = vld [vmem:[%s11088_s1 + $0x1784] ss:$16 sps:$4 sm:$0xff]  }
 0x2b4   :  { %5287 = vmatprep.subr.bf16.mxu0 %v8322_v22  ;;  %5820 = vmatprep.subr.bf16.mxu1 %v8325_v23  ;;  %v8417_v22 = vld [vmem:[%s11088_s1 + $0x178c] ss:$16 sps:$4 sm:$0xff]   ;;  %v8412_v23 = vld [vmem:[%s11088_s1 + $0x1780] ss:$16 sps:$4 sm:$0xff]  }
 0x2b7   :  { %5288 = vmatpush1.bf16.msra.mxu0 %v8320_v18  ;;  %5821 = vmatpush1.bf16.msra.mxu1 %v8323_v25  ;;  %v8415_v18 = vld [vmem:[%s11088_s1 + $0x1788] ss:$16 sps:$4 sm:$0xff]   ;;  %v8420_v25 = vld [vmem:[%s11088_s1 + $0x17a4] ss:$16 sps:$4 sm:$0xff]  }
 0x2b8   :  { %5289 = vmatprep.subr.bf16.mxu0 %v8328_v26  ;;  %5822 = vmatprep.subr.bf16.mxu1 %v8331_v27  ;;  %v8423_v26 = vld [vmem:[%s11088_s1 + $0x17ac] ss:$16 sps:$4 sm:$0xff]   ;;  %v8418_v27 = vld [vmem:[%s11088_s1 + $0x17a0] ss:$16 sps:$4 sm:$0xff]  }
 0x2bb   :  { %5290 = vmatpush1.bf16.msra.mxu0 %v8326_v28  ;;  %5823 = vmatpush1.bf16.msra.mxu1 %v8329_v29  ;;  %v8421_v28 = vld [vmem:[%s11088_s1 + $0x17a8] ss:$16 sps:$4 sm:$0xff]   ;;  %v8426_v29 = vld [vmem:[%s11088_s1 + $0x17c4] ss:$16 sps:$4 sm:$0xff]  }
 0x2bc   :  { %5291 = vmatprep.subr.bf16.mxu0 %v8334_v24  ;;  %5824 = vmatprep.subr.bf16.mxu1 %v8337_v31  ;;  %v8429_v24 = vld [vmem:[%s11088_s1 + $0x17cc] ss:$16 sps:$4 sm:$0xff]   ;;  %v8424_v31 = vld [vmem:[%s11088_s1 + $0x17c0] ss:$16 sps:$4 sm:$0xff]  }
 0x2bf   :  { %5292 = vmatpush1.bf16.msra.mxu0 %v8332_v32  ;;  %5825 = vmatpush1.bf16.msra.mxu1 %v8335_v21  ;;  %v8427_v32 = vld [vmem:[%s11088_s1 + $0x17c8] ss:$16 sps:$4 sm:$0xff]   ;;  %v8432_v21 = vld [vmem:[%s11088_s1 + $0x17e4] ss:$16 sps:$4 sm:$0xff]  }
 0x2c0   :  { %5302 = vmatprep.subr.bf16.mxu0 %v8342_v34  ;;  %5835 = vmatprep.subr.bf16.mxu1 %v8345_v35  ;;  %v8435_v34 = vld [vmem:[%s11088_s1 + $0x17ec] ss:$16 sps:$4 sm:$0xff]   ;;  %v8430_v35 = vld [vmem:[%s11088_s1 + $0x17e0] ss:$16 sps:$4 sm:$0xff]  }
 0x2c2   :  { %5294 = vmatmul.mubr.bf16.vlgmr.msra.gmra.mrb[0].mxu0 %v6293_v30  ;;  %5827 = vmatmul.mubr.bf16.vlgmr.msra.gmra.mrb[0].mxu1 %v6293_v30  ;;  %v8433_v30 = vld [vmem:[%s11088_s1 + $0x17e8] ss:$16 sps:$4 sm:$0xff]  }
 0x2c3   :  { %5303 = vmatpush1.bf16.msra.mxu0 %v8340_v37  ;;  %5836 = vmatpush1.bf16.msra.mxu1 %v8343_v38  ;;  %v8440_v37 = vld [vmem:[%s11088_s1 + $0x1804] ss:$16 sps:$4 sm:$0xff]   ;;  %v8443_v38 = vld [vmem:[%s11088_s1 + $0x180c] ss:$16 sps:$4 sm:$0xff]  }
 0x2c4   :  { %5304 = vmatprep.subr.bf16.mxu0 %v8348_v33  ;;  %5837 = vmatprep.subr.bf16.mxu1 %v8351_v39  ;;  %v6295_v33 = vcombine.low %v10740_v36, %v10740_v36  ;;  %v8438_v39 = vld [vmem:[%s11088_s1 + $0x1800] ss:$16 sps:$4 sm:$0xff]   ;;  %v8449_v36 = vld [vmem:[%s11088_s1 + $0x182c] ss:$16 sps:$4 sm:$0xff]  }
 0x2c5   :  { %5334 = vmatprep.mubr.bf16.mxu0 %v6296_v40  ;;  %5867 = vmatprep.mubr.bf16.mxu1 %v6296_v40  ;;  %v8441_v40 = vld [vmem:[%s11088_s1 + $0x1808] ss:$16 sps:$4 sm:$0xff]  }
 0x2c7   :  { %5305 = vmatpush1.bf16.msra.mxu0 %v8346_v41  ;;  %5838 = vmatpush1.bf16.msra.mxu1 %v8349_v42  ;;  %v8446_v41 = vld [vmem:[%s11088_s1 + $0x1824] ss:$16 sps:$4 sm:$0xff]   ;;  %v8444_v42 = vld [vmem:[%s11088_s1 + $0x1820] ss:$16 sps:$4 sm:$0xff]  }
 0x2c8   :  { %5306 = vmatprep.subr.bf16.mxu0 %v8354_v43  ;;  %5839 = vmatprep.subr.bf16.mxu1 %v8357_v44  ;;  %v8447_v43 = vld [vmem:[%s11088_s1 + $0x1828] ss:$16 sps:$4 sm:$0xff]   ;;  %v8452_v44 = vld [vmem:[%s11088_s1 + $0x1844] ss:$16 sps:$4 sm:$0xff]  }
 0x2cb   :  { %5307 = vmatpush1.bf16.msra.mxu0 %v8352_v45  ;;  %5840 = vmatpush1.bf16.msra.mxu1 %v8355_v46  ;;  %v8455_v45 = vld [vmem:[%s11088_s1 + $0x184c] ss:$16 sps:$4 sm:$0xff]   ;;  %v8495_v46 = vmov 0  }
 0x2cc   :  { %5308 = vmatprep.subr.bf16.mxu0 %v8360_v47  ;;  %5841 = vmatprep.subr.bf16.mxu1 %v8363_v48  ;;  %v8450_v47 = vld [vmem:[%s11088_s1 + $0x1840] ss:$16 sps:$4 sm:$0xff]   ;;  %v8453_v48 = vld [vmem:[%s11088_s1 + $0x1848] ss:$16 sps:$4 sm:$0xff]  }
 0x2cf   :  { %5309 = vmatpush1.bf16.msra.mxu0 %v8358_v49  ;;  %5842 = vmatpush1.bf16.msra.mxu1 %v8361_v50  ;;  %v8458_v49 = vld [vmem:[%s11088_s1 + $0x1864] ss:$16 sps:$4 sm:$0xff]   ;;  %v8461_v50 = vld [vmem:[%s11088_s1 + $0x186c] ss:$16 sps:$4 sm:$0xff]  }
 0x2d0   :  { %5310 = vmatprep.subr.bf16.mxu0 %v8366_v51  ;;  %5843 = vmatprep.subr.bf16.mxu1 %v8369_v52  ;;  %v8456_v51 = vld [vmem:[%s11088_s1 + $0x1860] ss:$16 sps:$4 sm:$0xff]   ;;  %v8459_v52 = vld [vmem:[%s11088_s1 + $0x1868] ss:$16 sps:$4 sm:$0xff]  }
 0x2d3   :  { %5311 = vmatpush1.bf16.msra.mxu0 %v8364_v53  ;;  %5844 = vmatpush1.bf16.msra.mxu1 %v8367_v54  ;;  %v8463_v53 = vld [vmem:[%s11090_s3 + $0x40] sm:$0xff]  }
 0x2d4   :  { %5312 = vmatprep.subr.bf16.mxu0 %v8372_v55  ;;  %5845 = vmatprep.subr.bf16.mxu1 %v8375_v56  ;;  %v8464_v54 = vld [vmem:[%s11090_s3 + $0xc0] sm:$0xff]  }
 0x2d5   :  { %v8462_v55 = vld [vmem:[%s11089_s0 + $0x60] ss:$0 sps:$4 sm:$0xff]  }
 0x2d6   :  { %v8465_v56 = vld [vmem:[%s11090_s3] sm:$0xff]  }
 0x2d7   :  { %5313 = vmatpush1.bf16.msra.mxu0 %v8370_v57  ;;  %5846 = vmatpush1.bf16.msra.mxu1 %v8373_v58  ;;  %v8466_v57 = vld [vmem:[%s11090_s3 + $0x80] sm:$0xff]   ;;  %v8467_v58 = vld [vmem:[%s11090_s3 + $0x48] sm:$0xff]  }
 0x2d8   :  { %5314 = vmatprep.subr.bf16.mxu0 %v8378_v59  ;;  %5847 = vmatprep.subr.bf16.mxu1 %v8381_v60  ;;  %v8468_v59 = vld [vmem:[%s11090_s3 + $0xc8] sm:$0xff]  }
 0x2d9   :  { %v8469_v60 = vld [vmem:[%s11090_s3 + $0x8] sm:$0xff]  }
 0x2db   :  { %5315 = vmatpush1.bf16.msra.mxu0 %v8376_v61  ;;  %5848 = vmatpush1.bf16.msra.mxu1 %v8379_v62  ;;  %v8470_v61 = vld [vmem:[%s11090_s3 + $0x88] sm:$0xff]   ;;  %v8471_v62 = vld [vmem:[%s11090_s3 + $0x50] sm:$0xff]  }
 0x2dc   :  { %5316 = vmatprep.subr.bf16.mxu0 %v8384_v63  ;;  %5849 = vmatprep.subr.bf16.mxu1 %v8387_v0  ;;  %v8472_v63 = vld [vmem:[%s11090_s3 + $0xd0] sm:$0xff]  }
 0x2dd   :  { %v8473_v0 = vld [vmem:[%s11090_s3 + $0x10] sm:$0xff]  }
 0x2df   :  { %5317 = vmatpush1.bf16.msra.mxu0 %v8382_v1  ;;  %5850 = vmatpush1.bf16.msra.mxu1 %v8385_v2  ;;  %v8474_v1 = vld [vmem:[%s11090_s3 + $0x90] sm:$0xff]   ;;  %v8475_v2 = vld [vmem:[%s11090_s3 + $0x58] sm:$0xff]  }
 0x2e0   :  { %5318 = vmatprep.subr.bf16.mxu0 %v8390_v3  ;;  %5851 = vmatprep.subr.bf16.mxu1 %v8393_v4  ;;  %v8476_v3 = vld [vmem:[%s11090_s3 + $0xd8] sm:$0xff]  }
 0x2e1   :  { %v8477_v4 = vld [vmem:[%s11090_s3 + $0x18] sm:$0xff]  }
 0x2e3   :  { %5319 = vmatpush1.bf16.msra.mxu0 %v8388_v5  ;;  %5852 = vmatpush1.bf16.msra.mxu1 %v8391_v6  ;;  %v8478_v5 = vld [vmem:[%s11090_s3 + $0x98] sm:$0xff]   ;;  %v8479_v6 = vld [vmem:[%s11090_s3 + $0x60] sm:$0xff]  }
 0x2e4   :  { %5320 = vmatprep.subr.bf16.mxu0 %v8396_v7  ;;  %5853 = vmatprep.subr.bf16.mxu1 %v8399_v8  ;;  %v8480_v7 = vld [vmem:[%s11090_s3 + $0xe0] sm:$0xff]  }
 0x2e5   :  { %v8481_v8 = vld [vmem:[%s11090_s3 + $0x20] sm:$0xff]  }
 0x2e7   :  { %5321 = vmatpush1.bf16.msra.mxu0 %v8394_v9  ;;  %5854 = vmatpush1.bf16.msra.mxu1 %v8397_v10  ;;  %v8482_v9 = vld [vmem:[%s11090_s3 + $0xa0] sm:$0xff]   ;;  %v8483_v10 = vld [vmem:[%s11090_s3 + $0x68] sm:$0xff]  }
 0x2e8   :  { %5322 = vmatprep.subr.bf16.mxu0 %v8402_v12  ;;  %5855 = vmatprep.subr.bf16.mxu1 %v8405_v13  ;;  %v8484_v12 = vld [vmem:[%s11090_s3 + $0xe8] sm:$0xff]  }
 0x2e9   :  { %v8485_v13 = vld [vmem:[%s11090_s3 + $0x28] sm:$0xff]  }
 0x2eb   :  { %5323 = vmatpush1.bf16.msra.mxu0 %v8400_v15  ;;  %5856 = vmatpush1.bf16.msra.mxu1 %v8403_v11  ;;  %v8486_v15 = vld [vmem:[%s11090_s3 + $0xa8] sm:$0xff]   ;;  %v8487_v11 = vld [vmem:[%s11090_s3 + $0x70] sm:$0xff]  }
 0x2ec   :  { %5324 = vmatprep.subr.bf16.mxu0 %v8408_v17  ;;  %5857 = vmatprep.subr.bf16.mxu1 %v8411_v14  ;;  %v8488_v17 = vld [vmem:[%s11090_s3 + $0xf0] sm:$0xff]  }
 0x2ed   :  { %v8489_v14 = vld [vmem:[%s11090_s3 + $0x30] sm:$0xff]  }
 0x2ef   :  { %5325 = vmatpush1.bf16.msra.mxu0 %v8406_v19  ;;  %5858 = vmatpush1.bf16.msra.mxu1 %v8409_v20  ;;  %v8490_v19 = vld [vmem:[%s11090_s3 + $0xb0] sm:$0xff]   ;;  %v8491_v20 = vld [vmem:[%s11090_s3 + $0x78] sm:$0xff]  }
 0x2f0   :  { %5326 = vmatprep.subr.bf16.mxu0 %v8414_v16  ;;  %5859 = vmatprep.subr.bf16.mxu1 %v8417_v22  ;;  %v8492_v16 = vld [vmem:[%s11090_s3 + $0xf8] sm:$0xff]  }
 0x2f1   :  { %v8493_v22 = vld [vmem:[%s11090_s3 + $0x38] sm:$0xff]  }
 0x2f3   :  { %5327 = vmatpush1.bf16.msra.mxu0 %v8412_v23  ;;  %5860 = vmatpush1.bf16.msra.mxu1 %v8415_v18  ;;  %v8494_v23 = vld [vmem:[%s11090_s3 + $0xb8] sm:$0xff]   ;;  %v820_v18 = vlaneseq }
 0x2f4   :  { %5328 = vmatprep.subr.bf16.mxu0 %v8420_v25  ;;  %5861 = vmatprep.subr.bf16.mxu1 %v8423_v26 }
 0x2f5   :  { %v821_v25 = vshrl.u32 %v820_v18, 7 }
 0x2f7   :  { %5329 = vmatpush1.bf16.msra.mxu0 %v8418_v27  ;;  %5862 = vmatpush1.bf16.msra.mxu1 %v8421_v28  ;;  %v822_v26 = vsub.s32 0, %v821_v25  ;;  %v830_v27 = vsub.s32 2, %v821_v25  ;;  %v818_v28 = vld [vmem:[%s11091_s2] sm:$0xf] }
 0x2f8   :  { %5330 = vmatprep.subr.bf16.mxu0 %v8426_v29  ;;  %5863 = vmatprep.subr.bf16.mxu1 %v8429_v24  ;;  %v826_v29 = vsub.s32 1, %v821_v25  ;;  %v834_v24 = vsub.s32 3, %v821_v25 }
 0x2fb   :  { %5331 = vmatpush1.bf16.msra.mxu0 %v8424_v31  ;;  %5864 = vmatpush1.bf16.msra.mxu1 %v8427_v32  ;;  %v823_v31 = vrot.slane %v818_v28, %v822_v26  ;;  %v831_v32 = vrot.slane %v818_v28, %v830_v27 }
 0x2fc   :  { %5332 = vmatprep.subr.bf16.mxu0 %v8432_v21  ;;  %5865 = vmatprep.subr.bf16.mxu1 %v8435_v34  ;;  %v827_v21 = vrot.slane %v818_v28, %v826_v29  ;;  %v835_v34 = vrot.slane %v818_v28, %v834_v24 }
 0x2ff   :  { %5333 = vmatpush1.bf16.msra.mxu0 %v8430_v35  ;;  %5866 = vmatpush1.bf16.msra.mxu1 %v8433_v30 }
 0x300   :  { %5343 = vmatprep.subr.bf16.mxu0 %v8440_v37  ;;  %5876 = vmatprep.subr.bf16.mxu1 %v8443_v38 }
 0x302   :  { %5335 = vmatmul.mubr.bf16.vlgmr.msra.gmra.mrb[0].mxu0 %v6295_v33  ;;  %5868 = vmatmul.mubr.bf16.vlgmr.msra.gmra.mrb[0].mxu1 %v6295_v33 }
 0x303   :  { %5344 = vmatpush1.bf16.msra.mxu0 %v8438_v39  ;;  %5877 = vmatpush1.bf16.msra.mxu1 %v8441_v40 }
 0x304   :  { %5345 = vmatprep.subr.bf16.mxu0 %v8446_v41  ;;  %5878 = vmatprep.subr.bf16.mxu1 %v8449_v36 }
 0x305   :  { %5375 = vmatprep.mubr.bf16.mxu0 %v8495_v46  ;;  %5908 = vmatprep.mubr.bf16.mxu1 %v8495_v46 }
 0x307   :  { %5346 = vmatpush1.bf16.msra.mxu0 %v8444_v42  ;;  %5879 = vmatpush1.bf16.msra.mxu1 %v8447_v43 }
 0x308   :  { %5347 = vmatprep.subr.bf16.mxu0 %v8452_v44  ;;  %5880 = vmatprep.subr.bf16.mxu1 %v8455_v45 }
 0x30b   :  { %5348 = vmatpush1.bf16.msra.mxu0 %v8450_v47  ;;  %5881 = vmatpush1.bf16.msra.mxu1 %v8453_v48 }
 0x30c   :  { %5349 = vmatprep.subr.bf16.mxu0 %v8458_v49  ;;  %5882 = vmatprep.subr.bf16.mxu1 %v8461_v50 }
 0x30f   :  { %5350 = vmatpush1.bf16.msra.mxu0 %v8456_v51  ;;  %5883 = vmatpush1.bf16.msra.mxu1 %v8459_v52 }
 0x310   :  { %7117 = vmatprep.subr.bf16.mxu0 %v8463_v53  ;;  %7139 = vmatprep.subr.bf16.mxu1 %v8464_v54 }
 0x312   :  { %7082 = vmatmul.mubr.msk.bf16.vlgmr.msra.gmra.mrb[0].mxu0 %vm4847_vm0, %v8462_v55  ;;  %7083 = vmatmul.mubr.msk.bf16.vlgmr.msra.gmra.mrb[0].mxu1 %vm4847_vm0, %v8462_v55  ;;  %v7084_v55 = vld [vmem:[%s11092_s4] ss:$0 sm:$0xff] }
 0x313   :  { %7118 = vmatpush3.bf16.msra.mxu0 %v8465_v56  ;;  %7140 = vmatpush3.bf16.msra.mxu1 %v8466_v57 }
 0x314   :  { %7119 = vmatprep.subr.bf16.mxu0 %v8467_v58  ;;  %7141 = vmatprep.subr.bf16.mxu1 %v8468_v59 }
 0x317   :  { %7120 = vmatpush3.bf16.msra.mxu0 %v8469_v60  ;;  %7142 = vmatpush3.bf16.msra.mxu1 %v8470_v61 }
 0x318   :  { %7121 = vmatprep.subr.bf16.mxu0 %v8471_v62  ;;  %7143 = vmatprep.subr.bf16.mxu1 %v8472_v63 }
 0x31b   :  { %7122 = vmatpush3.bf16.msra.mxu0 %v8473_v0  ;;  %7144 = vmatpush3.bf16.msra.mxu1 %v8474_v1 }
 0x31c   :  { %7123 = vmatprep.subr.bf16.mxu0 %v8475_v2  ;;  %7145 = vmatprep.subr.bf16.mxu1 %v8476_v3 }
 0x31f   :  { %7124 = vmatpush3.bf16.msra.mxu0 %v8477_v4  ;;  %7146 = vmatpush3.bf16.msra.mxu1 %v8478_v5 }
 0x320   :  { %7125 = vmatprep.subr.bf16.mxu0 %v8479_v6  ;;  %7147 = vmatprep.subr.bf16.mxu1 %v8480_v7 }
 0x323   :  { %7126 = vmatpush3.bf16.msra.mxu0 %v8481_v8  ;;  %7148 = vmatpush3.bf16.msra.mxu1 %v8482_v9 }
 0x324   :  { %7127 = vmatprep.subr.bf16.mxu0 %v8483_v10  ;;  %7149 = vmatprep.subr.bf16.mxu1 %v8484_v12 }
 0x327   :  { %7128 = vmatpush3.bf16.msra.mxu0 %v8485_v13  ;;  %7150 = vmatpush3.bf16.msra.mxu1 %v8486_v15 }
 0x328   :  { %7129 = vmatprep.subr.bf16.mxu0 %v8487_v11  ;;  %7151 = vmatprep.subr.bf16.mxu1 %v8488_v17 }
 0x32b   :  { %7130 = vmatpush3.bf16.msra.mxu0 %v8489_v14  ;;  %7152 = vmatpush3.bf16.msra.mxu1 %v8490_v19 }
 0x32c   :  { %7131 = vmatprep.subr.bf16.mxu0 %v8491_v20  ;;  %7153 = vmatprep.subr.bf16.mxu1 %v8492_v16 }
 0x32f   :  { %7132 = vmatpush3.bf16.msra.mxu0 %v8493_v22  ;;  %7154 = vmatpush3.bf16.msra.mxu1 %v8494_v23 }
 0x3e5   :  { %v5377_v35 = vpop.f32.mrb[0].mxu0  ;;  %v5910_v30 = vpop.f32.mrb[0].mxu1 }
 0x3e6   :  { %v7161_v37 = vadd.f32 %v5377_v35, %v823_v31  ;;  %v7163_v38 = vadd.f32 %v5910_v30, %v831_v32  ;;  %v5379_v33 = vpop.f32.mrb[1].mxu0  ;;  %v5912_v39 = vpop.f32.mrb[1].mxu1 }
 0x3e7   :  { %v7162_v40 = vadd.f32 %v5379_v33, %v827_v21  ;;  %v7164_v41 = vadd.f32 %v5912_v39, %v835_v34  ;;  %v5381_v36 = vpop.f32.mrb[2].mxu0  ;;  %v5914_v42 = vpop.f32.mrb[2].mxu1 }
 0x3e8   :  { %v5917_v43 = vmax.f32 %v7161_v37, 0.0  ;;  %v5919_v44 = vmax.f32 %v7163_v38, 0.0  ;;  %v5382_v45 = vpop.f32.mrb[3].mxu0  ;;  %v5915_v46 = vpop.f32.mrb[3].mxu1 }
 0x3e9   :  { %v5918_v47 = vmax.f32 %v7162_v40, 0.0  ;;  %v5920_v48 = vmax.f32 %v7164_v41, 0.0 }
 0x3ea   :  { %v5921_v51 = vpack.c.bf16 %v5917_v43, %v5917_v43  ;;  %v5923_v52 = vpack.c.bf16 %v5919_v44, %v5919_v44 }
 0x3eb   :  { %v5922_v49 = vpack.c.bf16 %v5918_v47, %v5918_v47  ;;  %v5924_v50 = vpack.c.bf16 %v5920_v48, %v5920_v48 }
 0x3ed   :  { %6220 = vmatprep.mubr.bf16.mxu0 %v5922_v49  ;;  %6260 = vmatprep.mubr.bf16.mxu1 %v5924_v50 }
 0x3ee   :  { %6221 = vmatmul.mubr.bf16.vlgmr.msra.gmra.mrb[4].mxu0 %v5921_v51  ;;  %6261 = vmatmul.mubr.bf16.vlgmr.msra.gmra.mrb[4].mxu1 %v5923_v52 }
 0x4c1   :  { %v7133_v53 = vpop.f32.mrb[4].mxu0  ;;  %v7155_v54 = vpop.f32.mrb[4].mxu1 }
 0x4c2   :  { %v7134_v56 = vpop.f32.mrb[5].mxu0  ;;  %v7156_v57 = vpop.f32.mrb[5].mxu1 }
 0x4c3   :  { %v7135_v58 = vadd.f32 %v7134_v56, %v7133_v53  ;;  %v7157_v59 = vadd.f32 %v7156_v57, %v7155_v54  ;;  %v7136_v60 = vpop.f32.mrb[6].mxu0  ;;  %v7158_v61 = vpop.f32.mrb[6].mxu1 }
 0x4c4   :  { %v7137_v62 = vpop.f32.mrb[7].mxu0  ;;  %v7159_v63 = vpop.f32.mrb[7].mxu1 }
 0x4c5   :  { %v6223_v0 = vadd.f32 %v7135_v58, %v7084_v55 }
 0x4c7   :  { %v6263_v1 = vadd.f32 %v7157_v59, %v6223_v0 }
 0x4c9   :  { %6268 = vst [vmem:[%s11093_s5] sm:$0xff] %v6263_v1 }

</bundles_post_ra>
